<compile_context>
chip_gen: v7x
topology: tpu7x:2x2x1
jax: 0.10.0
libtpu: 0.0.40
codegen_flags: <defaults>
</compile_context>

<pallas_src>
from functools import partial

import jax
import jax.numpy as jnp
from jax.experimental import pallas as pl
from jax.experimental.pallas import tpu as pltpu


def _basic_block_kernel(x_ref, w1_ref, w2_ref, s1_ref, b1_ref, s2_ref, b2_ref,
                        out_ref, q1_ref, q2_ref, *, D, H, W, Cin, C):
    # x_ref  : (D, H, W, Cin)            bf16   (batch dim squeezed by BlockSpec)
    # w1_ref : (9, 3*Cin, C)             bf16   rows ordered (kw, ci) per (kd, kh) tap
    # w2_ref : (9, 3*C, C)               bf16
    # s*/b*  : (1, C)                    f32    folded BN scale / bias
    # out_ref: (D, H, W, C)              f32
    # q1_ref : (D+2, H+2, W, 3*Cin) VMEM bf16   W-folded, padded input slab
    # q2_ref : (D+2, H+2, W, 3*C)   VMEM bf16   W-folded, padded conv1 output slab
    f32 = jnp.float32

    # Zero the W-folded slabs; the untouched regions below ARE the conv "same"
    # padding.  Re-zeroed every grid step so the batch axis can be "parallel".
    q1_ref[...] = jnp.zeros_like(q1_ref)
    q2_ref[...] = jnp.zeros_like(q2_ref)

    # Q1[dd, hh, w, kw*Cin + ci] = x_padded[dd, hh, w + kw, ci], built straight
    # from the unpadded input (no padded copy in HBM).
    q1_ref[1:D + 1, 1:H + 1, 1:W, 0:Cin] = x_ref[:, :, 0:W - 1, :]
    q1_ref[1:D + 1, 1:H + 1, 0:W, Cin:2 * Cin] = x_ref[:, :, :, :]
    q1_ref[1:D + 1, 1:H + 1, 0:W - 1, 2 * Cin:3 * Cin] = x_ref[:, :, 1:W, :]

    s1 = s1_ref[0, :]
    b1 = b1_ref[0, :]

    # ---- conv1 + BN1 + ReLU, one depth row at a time (M = H*W) -------------
    def conv1_row(d, carry):
        acc = jnp.zeros((H * W, C), f32)
        for kd in range(3):
            for kh in range(3):
                slab = q1_ref[d + kd, kh:kh + H, :, :].reshape(H * W, 3 * Cin)
                acc = acc + jnp.dot(slab, w1_ref[kd * 3 + kh, :, :],
                                    preferred_element_type=f32)
        y = jnp.maximum(acc * s1 + b1, 0.0)
        yb = y.reshape(H, W, C).astype(q2_ref.dtype)
        # Scatter conv1's activation straight into conv2's W-folded slab
        # (Q2[dd, hh, w, kw*C + c] = mid_padded[dd, hh, w + kw, c]); the
        # intermediate tensor never touches HBM.
        q2_ref[d + 1, 1:H + 1, 1:W, 0:C] = yb[:, 0:W - 1, :]
        q2_ref[d + 1, 1:H + 1, 0:W, C:2 * C] = yb
        q2_ref[d + 1, 1:H + 1, 0:W - 1, 2 * C:3 * C] = yb[:, 1:W, :]
        return carry

    jax.lax.fori_loop(0, D, conv1_row, None)

    s2 = s2_ref[0, :]
    b2 = b2_ref[0, :]

    # ---- conv2 + BN2 + residual + ReLU --------------------------------------
    def conv2_row(d, carry):
        acc = jnp.zeros((H * W, C), f32)
        for kd in range(3):
            for kh in range(3):
                slab = q2_ref[d + kd, kh:kh + H, :, :].reshape(H * W, 3 * C)
                acc = acc + jnp.dot(slab, w2_ref[kd * 3 + kh, :, :],
                                    preferred_element_type=f32)
        res = x_ref[d, :, :, :].astype(f32).reshape(H * W, C)
        y = jnp.maximum(acc * s2 + b2 + res, 0.0)
        out_ref[d, :, :, :] = y.reshape(H, W, C).astype(out_ref.dtype)
        return carry

    jax.lax.fori_loop(0, D, conv2_row, None)


def basic_block_forward(x_ncdhw, params):
    """BasicBlock forward (stride=1, downsample=None). Input/output are NCDHW f32."""
    x = jnp.transpose(x_ncdhw, (0, 2, 3, 4, 1))           # -> NDHWC
    N, D, H, W, Cin = x.shape
    C = params["w1"].shape[-1]
    assert Cin == C, "stride=1 BasicBlock without downsample requires Cin == Cout"

    xb = x.astype(jnp.bfloat16)
    # (3,3,3,Cin,C) -> (9, 3*Cin, C): row t = kd*3+kh, column-group r = kw*Cin+ci
    w1r = params["w1"].astype(jnp.bfloat16).reshape(9, 3 * Cin, C)
    w2r = params["w2"].astype(jnp.bfloat16).reshape(9, 3 * C, C)
    s1 = params["scale1"].reshape(1, C).astype(jnp.float32)
    b1 = params["bias1"].reshape(1, C).astype(jnp.float32)
    s2 = params["scale2"].reshape(1, C).astype(jnp.float32)
    b2 = params["bias2"].reshape(1, C).astype(jnp.float32)

    kernel = partial(_basic_block_kernel, D=D, H=H, W=W, Cin=Cin, C=C)

    out = pl.pallas_call(
        kernel,
        out_shape=jax.ShapeDtypeStruct((N, D, H, W, C), jnp.float32),
        grid=(N,),
        in_specs=[
            pl.BlockSpec((None, D, H, W, Cin), lambda n: (n, 0, 0, 0, 0)),
            pl.BlockSpec((9, 3 * Cin, C), lambda n: (0, 0, 0)),
            pl.BlockSpec((9, 3 * C, C), lambda n: (0, 0, 0)),
            pl.BlockSpec((1, C), lambda n: (0, 0)),
            pl.BlockSpec((1, C), lambda n: (0, 0)),
            pl.BlockSpec((1, C), lambda n: (0, 0)),
            pl.BlockSpec((1, C), lambda n: (0, 0)),
        ],
        out_specs=pl.BlockSpec((None, D, H, W, C), lambda n: (n, 0, 0, 0, 0)),
        scratch_shapes=[
            pltpu.VMEM((D + 2, H + 2, W, 3 * Cin), jnp.bfloat16),
            pltpu.VMEM((D + 2, H + 2, W, 3 * C), jnp.bfloat16),
        ],
        compiler_params=pltpu.CompilerParams(
            dimension_semantics=("parallel",),
            vmem_limit_bytes=32 * 1024 * 1024),
    )(xb, w1r, w2r, s1, b1, s2, b2)

    return jnp.transpose(out, (0, 4, 1, 2, 3))            # -> NCDHW


def fold_bn(gamma, beta, running_mean, running_var, eps=1e-5):
    scale = gamma / jnp.sqrt(running_var + eps)
    bias = beta - running_mean * scale
    return scale, bias


def init_params(key, in_planes, planes):
    k1, k2, k3, k4, k5, k6 = jax.random.split(key, 6)
    # conv weights in DHWIO layout (3,3,3,Cin,Cout)
    w1 = 0.1 * jax.random.normal(k1, (3, 3, 3, in_planes, planes), jnp.float32)
    w2 = 0.1 * jax.random.normal(k2, (3, 3, 3, planes, planes), jnp.float32)
    g1 = 1.0 + 0.1 * jax.random.normal(k3, (planes,), jnp.float32)
    b1 = 0.1 * jax.random.normal(k4, (planes,), jnp.float32)
    g2 = 1.0 + 0.1 * jax.random.normal(k5, (planes,), jnp.float32)
    b2 = 0.1 * jax.random.normal(k6, (planes,), jnp.float32)
    rm1 = jnp.zeros((planes,), jnp.float32)
    rv1 = jnp.ones((planes,), jnp.float32)
    rm2 = jnp.zeros((planes,), jnp.float32)
    rv2 = jnp.ones((planes,), jnp.float32)
    s1, bb1 = fold_bn(g1, b1, rm1, rv1)
    s2, bb2 = fold_bn(g2, b2, rm2, rv2)
    return {"w1": w1, "scale1": s1, "bias1": bb1,
            "w2": w2, "scale2": s2, "bias2": bb2}


def _reference_forward(x_ncdhw, params):
    """Pure-JAX reference of the same math (same bf16 rounding points as the kernel)."""
    f32, bf16 = jnp.float32, jnp.bfloat16
    x = jnp.transpose(x_ncdhw, (0, 2, 3, 4, 1)).astype(bf16).astype(f32)
    w1 = params["w1"].astype(bf16).astype(f32)
    w2 = params["w2"].astype(bf16).astype(f32)
    dn = ("NDHWC", "DHWIO", "NDHWC")

    def conv(inp, w):
        return jax.lax.conv_general_dilated(
            inp, w, window_strides=(1, 1, 1), padding="SAME",
            dimension_numbers=dn, precision=jax.lax.Precision.HIGHEST)

    h = conv(x, w1) * params["scale1"] + params["bias1"]
    h = jnp.maximum(h, 0.0)
    h = h.astype(bf16).astype(f32)   # kernel keeps the intermediate in bf16 VMEM
    out = conv(h, w2) * params["scale2"] + params["bias2"]
    out = jnp.maximum(out + x, 0.0)
    return jnp.transpose(out, (0, 4, 1, 2, 3))


if __name__ == "__main__":
    N, C, D, H, W = 2, 4, 8, 8, 8          # NCDHW, in_planes == planes, stride=1
    key = jax.random.PRNGKey(0)
    kx, kp = jax.random.split(key)
    x = jax.random.normal(kx, (N, C, D, H, W), jnp.float32)
    params = init_params(kp, in_planes=C, planes=C)

    out = jax.block_until_ready(basic_block_forward(x, params))
    ref = _reference_forward(x, params)

    assert out.shape == (N, C, D, H, W)
    assert jnp.allclose(out, ref, atol=1e-2, rtol=1e-2), \
        f"max abs err = {float(jnp.max(jnp.abs(out - ref)))}"

    print("KERNEL_OK")
</pallas_src>

<mosaic_0001>
module attributes {stable_mosaic.version = 11 : i64} {
  func.func @_basic_block_kernel(%arg0: i32, %arg1: memref<1x8x8x8x4xbf16, #tpu.memory_space<vmem>>, %arg2: memref<9x12x4xbf16, #tpu.memory_space<vmem>>, %arg3: memref<9x12x4xbf16, #tpu.memory_space<vmem>>, %arg4: memref<1x4xf32, #tpu.memory_space<vmem>>, %arg5: memref<1x4xf32, #tpu.memory_space<vmem>>, %arg6: memref<1x4xf32, #tpu.memory_space<vmem>>, %arg7: memref<1x4xf32, #tpu.memory_space<vmem>>, %arg8: memref<1x8x8x8x4xf32, #tpu.memory_space<vmem>>, %arg9: memref<10x10x8x12xbf16, #tpu.memory_space<vmem>>, %arg10: memref<10x10x8x12xbf16, #tpu.memory_space<vmem>>) attributes {dimension_semantics = [#tpu.dimension_semantics<parallel>], iteration_bounds = array<i64: 2>, scalar_prefetch = 0 : i64, scratch_operands = 2 : i64, tpu.core_type = #tpu.core_type<tc>, window_params = [{transform_indices = @transform_0, window_bounds = array<i64: 1, 8, 8, 8, 4>}, {pipeline_mode = #tpu.pipeline_mode<synchronous>, transform_indices = @transform_1, window_bounds = array<i64: 9, 12, 4>}, {pipeline_mode = #tpu.pipeline_mode<synchronous>, transform_indices = @transform_2, window_bounds = array<i64: 9, 12, 4>}, {pipeline_mode = #tpu.pipeline_mode<synchronous>, transform_indices = @transform_3, window_bounds = array<i64: 1, 4>}, {pipeline_mode = #tpu.pipeline_mode<synchronous>, transform_indices = @transform_4, window_bounds = array<i64: 1, 4>}, {pipeline_mode = #tpu.pipeline_mode<synchronous>, transform_indices = @transform_5, window_bounds = array<i64: 1, 4>}, {pipeline_mode = #tpu.pipeline_mode<synchronous>, transform_indices = @transform_6, window_bounds = array<i64: 1, 4>}, {transform_indices = @transform_7, window_bounds = array<i64: 1, 8, 8, 8, 4>}]} {
    %cst = arith.constant 0.000000e+00 : bf16
    %0 = vector.broadcast %cst : bf16 to vector<10x10x8x12xbf16>
    %c0 = arith.constant 0 : index
    %c0_0 = arith.constant 0 : index
    %c0_1 = arith.constant 0 : index
    %c0_2 = arith.constant 0 : index
    %1 = vector.load %arg9[%c0, %c0_0, %c0_1, %c0_2] : memref<10x10x8x12xbf16, #tpu.memory_space<vmem>>, vector<10x10x8x12xbf16>
    tpu.vector_store %arg9[%c0, %c0_0, %c0_1, %c0_2], %0 {strides = array<i32>} : memref<10x10x8x12xbf16, #tpu.memory_space<vmem>>, vector<10x10x8x12xbf16>,
    %cst_3 = arith.constant 0.000000e+00 : bf16
    %2 = vector.broadcast %cst_3 : bf16 to vector<10x10x8x12xbf16>
    %c0_4 = arith.constant 0 : index
    %c0_5 = arith.constant 0 : index
    %c0_6 = arith.constant 0 : index
    %c0_7 = arith.constant 0 : index
    %3 = vector.load %arg10[%c0_4, %c0_5, %c0_6, %c0_7] : memref<10x10x8x12xbf16, #tpu.memory_space<vmem>>, vector<10x10x8x12xbf16>
    tpu.vector_store %arg10[%c0_4, %c0_5, %c0_6, %c0_7], %2 {strides = array<i32>} : memref<10x10x8x12xbf16, #tpu.memory_space<vmem>>, vector<10x10x8x12xbf16>,
    %c0_8 = arith.constant 0 : index
    %c0_9 = arith.constant 0 : index
    %c0_10 = arith.constant 0 : index
    %c0_11 = arith.constant 0 : index
    %c0_12 = arith.constant 0 : index
    %4 = vector.load %arg1[%c0_8, %c0_9, %c0_10, %c0_11, %c0_12] : memref<1x8x8x8x4xbf16, #tpu.memory_space<vmem>>, vector<1x8x8x7x4xbf16>
    %5 = vector.shape_cast %4 : vector<1x8x8x7x4xbf16> to vector<8x8x7x4xbf16>
    %c1 = arith.constant 1 : index
    %c1_13 = arith.constant 1 : index
    %c1_14 = arith.constant 1 : index
    %c0_15 = arith.constant 0 : index
    %6 = vector.load %arg9[%c1, %c1_13, %c1_14, %c0_15] : memref<10x10x8x12xbf16, #tpu.memory_space<vmem>>, vector<8x8x7x4xbf16>
    tpu.vector_store %arg9[%c1, %c1_13, %c1_14, %c0_15], %5 {strides = array<i32>} : memref<10x10x8x12xbf16, #tpu.memory_space<vmem>>, vector<8x8x7x4xbf16>,
    %c0_16 = arith.constant 0 : index
    %c0_17 = arith.constant 0 : index
    %c0_18 = arith.constant 0 : index
    %c0_19 = arith.constant 0 : index
    %c0_20 = arith.constant 0 : index
    %7 = vector.load %arg1[%c0_16, %c0_17, %c0_18, %c0_19, %c0_20] : memref<1x8x8x8x4xbf16, #tpu.memory_space<vmem>>, vector<1x8x8x8x4xbf16>
    %8 = vector.shape_cast %7 : vector<1x8x8x8x4xbf16> to vector<8x8x8x4xbf16>
    %c1_21 = arith.constant 1 : index
    %c1_22 = arith.constant 1 : index
    %c0_23 = arith.constant 0 : index
    %c4 = arith.constant 4 : index
    %9 = vector.load %arg9[%c1_21, %c1_22, %c0_23, %c4] : memref<10x10x8x12xbf16, #tpu.memory_space<vmem>>, vector<8x8x8x4xbf16>
    tpu.vector_store %arg9[%c1_21, %c1_22, %c0_23, %c4], %8 {strides = array<i32>} : memref<10x10x8x12xbf16, #tpu.memory_space<vmem>>, vector<8x8x8x4xbf16>,
    %c0_24 = arith.constant 0 : index
    %c0_25 = arith.constant 0 : index
    %c0_26 = arith.constant 0 : index
    %c1_27 = arith.constant 1 : index
    %c0_28 = arith.constant 0 : index
    %10 = vector.load %arg1[%c0_24, %c0_25, %c0_26, %c1_27, %c0_28] : memref<1x8x8x8x4xbf16, #tpu.memory_space<vmem>>, vector<1x8x8x7x4xbf16>
    %11 = vector.shape_cast %10 : vector<1x8x8x7x4xbf16> to vector<8x8x7x4xbf16>
    %c1_29 = arith.constant 1 : index
    %c1_30 = arith.constant 1 : index
    %c0_31 = arith.constant 0 : index
    %c8 = arith.constant 8 : index
    %12 = vector.load %arg9[%c1_29, %c1_30, %c0_31, %c8] : memref<10x10x8x12xbf16, #tpu.memory_space<vmem>>, vector<8x8x7x4xbf16>
    tpu.vector_store %arg9[%c1_29, %c1_30, %c0_31, %c8], %11 {strides = array<i32>} : memref<10x10x8x12xbf16, #tpu.memory_space<vmem>>, vector<8x8x7x4xbf16>,
    %c0_32 = arith.constant 0 : index
    %c0_33 = arith.constant 0 : index
    %13 = vector.load %arg4[%c0_32, %c0_33] : memref<1x4xf32, #tpu.memory_space<vmem>>, vector<1x4xf32>
    %14 = vector.shape_cast %13 : vector<1x4xf32> to vector<4xf32>
    %c0_34 = arith.constant 0 : index
    %c0_35 = arith.constant 0 : index
    %15 = vector.load %arg5[%c0_34, %c0_35] : memref<1x4xf32, #tpu.memory_space<vmem>>, vector<1x4xf32>
    %16 = vector.shape_cast %15 : vector<1x4xf32> to vector<4xf32>
    %c0_i32 = arith.constant 0 : i32
    %c8_i32 = arith.constant 8 : i32
    %17 = arith.addi %c0_i32, %c8_i32 : i32
    %c1_i32 = arith.constant 1 : i32
    scf.for %arg11 = %c0_i32 to %17 step %c1_i32  : i32 {
      %cst_45 = arith.constant 0.000000e+00 : f32
      %23 = vector.broadcast %cst_45 : f32 to vector<64x4xf32>
      %c0_i32_46 = arith.constant 0 : i32
      %24 = arith.addi %arg11, %c0_i32_46 : i32
      %25 = arith.index_cast %24 : i32 to index
      %c0_47 = arith.constant 0 : index
      %c0_48 = arith.constant 0 : index
      %c0_49 = arith.constant 0 : index
      %26 = vector.load %arg9[%25, %c0_47, %c0_48, %c0_49] : memref<10x10x8x12xbf16, #tpu.memory_space<vmem>>, vector<1x8x8x12xbf16>
      %27 = vector.shape_cast %26 : vector<1x8x8x12xbf16> to vector<8x8x12xbf16>
      %28 = vector.shape_cast %27 : vector<8x8x12xbf16> to vector<64x12xbf16>
      %c0_50 = arith.constant 0 : index
      %c0_51 = arith.constant 0 : index
      %c0_52 = arith.constant 0 : index
      %29 = vector.load %arg2[%c0_50, %c0_51, %c0_52] : memref<9x12x4xbf16, #tpu.memory_space<vmem>>, vector<1x12x4xbf16>
      %30 = vector.shape_cast %29 : vector<1x12x4xbf16> to vector<12x4xbf16>
      %cst_53 = arith.constant dense<0.000000e+00> : vector<64x4xf32>
      %31 = tpu.matmul %28, %30, %cst_53 {dimension_numbers = #tpu.dot_dimension_numbers<[1], [0], [0], [1], [0, 0, 1, 1], [], []>} : vector<64x12xbf16>, vector<12x4xbf16>, vector<64x4xf32> -> vector<64x4xf32>
      %32 = arith.addf %23, %31 : vector<64x4xf32>
      %c0_i32_54 = arith.constant 0 : i32
      %33 = arith.addi %arg11, %c0_i32_54 : i32
      %34 = arith.index_cast %33 : i32 to index
      %c1_55 = arith.constant 1 : index
      %c0_56 = arith.constant 0 : index
      %c0_57 = arith.constant 0 : index
      %35 = vector.load %arg9[%34, %c1_55, %c0_56, %c0_57] : memref<10x10x8x12xbf16, #tpu.memory_space<vmem>>, vector<1x8x8x12xbf16>
      %36 = vector.shape_cast %35 : vector<1x8x8x12xbf16> to vector<8x8x12xbf16>
      %37 = vector.shape_cast %36 : vector<8x8x12xbf16> to vector<64x12xbf16>
      %c1_58 = arith.constant 1 : index
      %c0_59 = arith.constant 0 : index
      %c0_60 = arith.constant 0 : index
      %38 = vector.load %arg2[%c1_58, %c0_59, %c0_60] : memref<9x12x4xbf16, #tpu.memory_space<vmem>>, vector<1x12x4xbf16>
      %39 = vector.shape_cast %38 : vector<1x12x4xbf16> to vector<12x4xbf16>
      %cst_61 = arith.constant dense<0.000000e+00> : vector<64x4xf32>
      %40 = tpu.matmul %37, %39, %cst_61 {dimension_numbers = #tpu.dot_dimension_numbers<[1], [0], [0], [1], [0, 0, 1, 1], [], []>} : vector<64x12xbf16>, vector<12x4xbf16>, vector<64x4xf32> -> vector<64x4xf32>
      %41 = arith.addf %32, %40 : vector<64x4xf32>
      %c0_i32_62 = arith.constant 0 : i32
      %42 = arith.addi %arg11, %c0_i32_62 : i32
      %43 = arith.index_cast %42 : i32 to index
      %c2 = arith.constant 2 : index
      %c0_63 = arith.constant 0 : index
      %c0_64 = arith.constant 0 : index
      %44 = vector.load %arg9[%43, %c2, %c0_63, %c0_64] : memref<10x10x8x12xbf16, #tpu.memory_space<vmem>>, vector<1x8x8x12xbf16>
      %45 = vector.shape_cast %44 : vector<1x8x8x12xbf16> to vector<8x8x12xbf16>
      %46 = vector.shape_cast %45 : vector<8x8x12xbf16> to vector<64x12xbf16>
      %c2_65 = arith.constant 2 : index
      %c0_66 = arith.constant 0 : index
      %c0_67 = arith.constant 0 : index
      %47 = vector.load %arg2[%c2_65, %c0_66, %c0_67] : memref<9x12x4xbf16, #tpu.memory_space<vmem>>, vector<1x12x4xbf16>
      %48 = vector.shape_cast %47 : vector<1x12x4xbf16> to vector<12x4xbf16>
      %cst_68 = arith.constant dense<0.000000e+00> : vector<64x4xf32>
      %49 = tpu.matmul %46, %48, %cst_68 {dimension_numbers = #tpu.dot_dimension_numbers<[1], [0], [0], [1], [0, 0, 1, 1], [], []>} : vector<64x12xbf16>, vector<12x4xbf16>, vector<64x4xf32> -> vector<64x4xf32>
      %50 = arith.addf %41, %49 : vector<64x4xf32>
      %c1_i32_69 = arith.constant 1 : i32
      %51 = arith.addi %arg11, %c1_i32_69 : i32
      %52 = arith.index_cast %51 : i32 to index
      %c0_70 = arith.constant 0 : index
      %c0_71 = arith.constant 0 : index
      %c0_72 = arith.constant 0 : index
      %53 = vector.load %arg9[%52, %c0_70, %c0_71, %c0_72] : memref<10x10x8x12xbf16, #tpu.memory_space<vmem>>, vector<1x8x8x12xbf16>
      %54 = vector.shape_cast %53 : vector<1x8x8x12xbf16> to vector<8x8x12xbf16>
      %55 = vector.shape_cast %54 : vector<8x8x12xbf16> to vector<64x12xbf16>
      %c3 = arith.constant 3 : index
      %c0_73 = arith.constant 0 : index
      %c0_74 = arith.constant 0 : index
      %56 = vector.load %arg2[%c3, %c0_73, %c0_74] : memref<9x12x4xbf16, #tpu.memory_space<vmem>>, vector<1x12x4xbf16>
      %57 = vector.shape_cast %56 : vector<1x12x4xbf16> to vector<12x4xbf16>
      %cst_75 = arith.constant dense<0.000000e+00> : vector<64x4xf32>
      %58 = tpu.matmul %55, %57, %cst_75 {dimension_numbers = #tpu.dot_dimension_numbers<[1], [0], [0], [1], [0, 0, 1, 1], [], []>} : vector<64x12xbf16>, vector<12x4xbf16>, vector<64x4xf32> -> vector<64x4xf32>
      %59 = arith.addf %50, %58 : vector<64x4xf32>
      %c1_i32_76 = arith.constant 1 : i32
      %60 = arith.addi %arg11, %c1_i32_76 : i32
      %61 = arith.index_cast %60 : i32 to index
      %c1_77 = arith.constant 1 : index
      %c0_78 = arith.constant 0 : index
      %c0_79 = arith.constant 0 : index
      %62 = vector.load %arg9[%61, %c1_77, %c0_78, %c0_79] : memref<10x10x8x12xbf16, #tpu.memory_space<vmem>>, vector<1x8x8x12xbf16>
      %63 = vector.shape_cast %62 : vector<1x8x8x12xbf16> to vector<8x8x12xbf16>
      %64 = vector.shape_cast %63 : vector<8x8x12xbf16> to vector<64x12xbf16>
      %c4_80 = arith.constant 4 : index
      %c0_81 = arith.constant 0 : index
      %c0_82 = arith.constant 0 : index
      %65 = vector.load %arg2[%c4_80, %c0_81, %c0_82] : memref<9x12x4xbf16, #tpu.memory_space<vmem>>, vector<1x12x4xbf16>
      %66 = vector.shape_cast %65 : vector<1x12x4xbf16> to vector<12x4xbf16>
      %cst_83 = arith.constant dense<0.000000e+00> : vector<64x4xf32>
      %67 = tpu.matmul %64, %66, %cst_83 {dimension_numbers = #tpu.dot_dimension_numbers<[1], [0], [0], [1], [0, 0, 1, 1], [], []>} : vector<64x12xbf16>, vector<12x4xbf16>, vector<64x4xf32> -> vector<64x4xf32>
      %68 = arith.addf %59, %67 : vector<64x4xf32>
      %c1_i32_84 = arith.constant 1 : i32
      %69 = arith.addi %arg11, %c1_i32_84 : i32
      %70 = arith.index_cast %69 : i32 to index
      %c2_85 = arith.constant 2 : index
      %c0_86 = arith.constant 0 : index
      %c0_87 = arith.constant 0 : index
      %71 = vector.load %arg9[%70, %c2_85, %c0_86, %c0_87] : memref<10x10x8x12xbf16, #tpu.memory_space<vmem>>, vector<1x8x8x12xbf16>
      %72 = vector.shape_cast %71 : vector<1x8x8x12xbf16> to vector<8x8x12xbf16>
      %73 = vector.shape_cast %72 : vector<8x8x12xbf16> to vector<64x12xbf16>
      %c5 = arith.constant 5 : index
      %c0_88 = arith.constant 0 : index
      %c0_89 = arith.constant 0 : index
      %74 = vector.load %arg2[%c5, %c0_88, %c0_89] : memref<9x12x4xbf16, #tpu.memory_space<vmem>>, vector<1x12x4xbf16>
      %75 = vector.shape_cast %74 : vector<1x12x4xbf16> to vector<12x4xbf16>
      %cst_90 = arith.constant dense<0.000000e+00> : vector<64x4xf32>
      %76 = tpu.matmul %73, %75, %cst_90 {dimension_numbers = #tpu.dot_dimension_numbers<[1], [0], [0], [1], [0, 0, 1, 1], [], []>} : vector<64x12xbf16>, vector<12x4xbf16>, vector<64x4xf32> -> vector<64x4xf32>
      %77 = arith.addf %68, %76 : vector<64x4xf32>
      %c2_i32 = arith.constant 2 : i32
      %78 = arith.addi %arg11, %c2_i32 : i32
      %79 = arith.index_cast %78 : i32 to index
      %c0_91 = arith.constant 0 : index
      %c0_92 = arith.constant 0 : index
      %c0_93 = arith.constant 0 : index
      %80 = vector.load %arg9[%79, %c0_91, %c0_92, %c0_93] : memref<10x10x8x12xbf16, #tpu.memory_space<vmem>>, vector<1x8x8x12xbf16>
      %81 = vector.shape_cast %80 : vector<1x8x8x12xbf16> to vector<8x8x12xbf16>
      %82 = vector.shape_cast %81 : vector<8x8x12xbf16> to vector<64x12xbf16>
      %c6 = arith.constant 6 : index
      %c0_94 = arith.constant 0 : index
      %c0_95 = arith.constant 0 : index
      %83 = vector.load %arg2[%c6, %c0_94, %c0_95] : memref<9x12x4xbf16, #tpu.memory_space<vmem>>, vector<1x12x4xbf16>
      %84 = vector.shape_cast %83 : vector<1x12x4xbf16> to vector<12x4xbf16>
      %cst_96 = arith.constant dense<0.000000e+00> : vector<64x4xf32>
      %85 = tpu.matmul %82, %84, %cst_96 {dimension_numbers = #tpu.dot_dimension_numbers<[1], [0], [0], [1], [0, 0, 1, 1], [], []>} : vector<64x12xbf16>, vector<12x4xbf16>, vector<64x4xf32> -> vector<64x4xf32>
      %86 = arith.addf %77, %85 : vector<64x4xf32>
      %c2_i32_97 = arith.constant 2 : i32
      %87 = arith.addi %arg11, %c2_i32_97 : i32
      %88 = arith.index_cast %87 : i32 to index
      %c1_98 = arith.constant 1 : index
      %c0_99 = arith.constant 0 : index
      %c0_100 = arith.constant 0 : index
      %89 = vector.load %arg9[%88, %c1_98, %c0_99, %c0_100] : memref<10x10x8x12xbf16, #tpu.memory_space<vmem>>, vector<1x8x8x12xbf16>
      %90 = vector.shape_cast %89 : vector<1x8x8x12xbf16> to vector<8x8x12xbf16>
      %91 = vector.shape_cast %90 : vector<8x8x12xbf16> to vector<64x12xbf16>
      %c7 = arith.constant 7 : index
      %c0_101 = arith.constant 0 : index
      %c0_102 = arith.constant 0 : index
      %92 = vector.load %arg2[%c7, %c0_101, %c0_102] : memref<9x12x4xbf16, #tpu.memory_space<vmem>>, vector<1x12x4xbf16>
      %93 = vector.shape_cast %92 : vector<1x12x4xbf16> to vector<12x4xbf16>
      %cst_103 = arith.constant dense<0.000000e+00> : vector<64x4xf32>
      %94 = tpu.matmul %91, %93, %cst_103 {dimension_numbers = #tpu.dot_dimension_numbers<[1], [0], [0], [1], [0, 0, 1, 1], [], []>} : vector<64x12xbf16>, vector<12x4xbf16>, vector<64x4xf32> -> vector<64x4xf32>
      %95 = arith.addf %86, %94 : vector<64x4xf32>
      %c2_i32_104 = arith.constant 2 : i32
      %96 = arith.addi %arg11, %c2_i32_104 : i32
      %97 = arith.index_cast %96 : i32 to index
      %c2_105 = arith.constant 2 : index
      %c0_106 = arith.constant 0 : index
      %c0_107 = arith.constant 0 : index
      %98 = vector.load %arg9[%97, %c2_105, %c0_106, %c0_107] : memref<10x10x8x12xbf16, #tpu.memory_space<vmem>>, vector<1x8x8x12xbf16>
      %99 = vector.shape_cast %98 : vector<1x8x8x12xbf16> to vector<8x8x12xbf16>
      %100 = vector.shape_cast %99 : vector<8x8x12xbf16> to vector<64x12xbf16>
      %c8_108 = arith.constant 8 : index
      %c0_109 = arith.constant 0 : index
      %c0_110 = arith.constant 0 : index
      %101 = vector.load %arg2[%c8_108, %c0_109, %c0_110] : memref<9x12x4xbf16, #tpu.memory_space<vmem>>, vector<1x12x4xbf16>
      %102 = vector.shape_cast %101 : vector<1x12x4xbf16> to vector<12x4xbf16>
      %cst_111 = arith.constant dense<0.000000e+00> : vector<64x4xf32>
      %103 = tpu.matmul %100, %102, %cst_111 {dimension_numbers = #tpu.dot_dimension_numbers<[1], [0], [0], [1], [0, 0, 1, 1], [], []>} : vector<64x12xbf16>, vector<12x4xbf16>, vector<64x4xf32> -> vector<64x4xf32>
      %104 = arith.addf %95, %103 : vector<64x4xf32>
      %105 = vector.shape_cast %14 : vector<4xf32> to vector<1x4xf32>
      %106 = vector.broadcast %105 : vector<1x4xf32> to vector<64x4xf32>
      %107 = arith.mulf %104, %106 : vector<64x4xf32>
      %108 = vector.shape_cast %16 : vector<4xf32> to vector<1x4xf32>
      %109 = vector.broadcast %108 : vector<1x4xf32> to vector<64x4xf32>
      %110 = arith.addf %107, %109 : vector<64x4xf32>
      %cst_112 = arith.constant 0.000000e+00 : f32
      %111 = vector.broadcast %cst_112 : f32 to vector<64x4xf32>
      %112 = arith.maximumf %110, %111 : vector<64x4xf32>
      %113 = vector.shape_cast %112 : vector<64x4xf32> to vector<8x8x4xf32>
      %114 = arith.truncf %113 : vector<8x8x4xf32> to vector<8x8x4xbf16>
      %115 = vector.extract_strided_slice %114 {offsets = [0, 0, 0], sizes = [8, 7, 4], strides = [1, 1, 1]} : vector<8x8x4xbf16> to vector<8x7x4xbf16>
      %c1_i32_113 = arith.constant 1 : i32
      %116 = arith.addi %arg11, %c1_i32_113 : i32
      %117 = arith.index_cast %116 : i32 to index
      %c1_114 = arith.constant 1 : index
      %c1_115 = arith.constant 1 : index
      %c0_116 = arith.constant 0 : index
      %118 = vector.load %arg10[%117, %c1_114, %c1_115, %c0_116] : memref<10x10x8x12xbf16, #tpu.memory_space<vmem>>, vector<1x8x7x4xbf16>
      %119 = vector.shape_cast %118 : vector<1x8x7x4xbf16> to vector<8x7x4xbf16>
      %120 = vector.shape_cast %115 : vector<8x7x4xbf16> to vector<1x8x7x4xbf16>
      tpu.vector_store %arg10[%117, %c1_114, %c1_115, %c0_116], %120 {strides = array<i32>} : memref<10x10x8x12xbf16, #tpu.memory_space<vmem>>, vector<1x8x7x4xbf16>,
      %c1_i32_117 = arith.constant 1 : i32
      %121 = arith.addi %arg11, %c1_i32_117 : i32
      %122 = arith.index_cast %121 : i32 to index
      %c1_118 = arith.constant 1 : index
      %c0_119 = arith.constant 0 : index
      %c4_120 = arith.constant 4 : index
      %123 = vector.load %arg10[%122, %c1_118, %c0_119, %c4_120] : memref<10x10x8x12xbf16, #tpu.memory_space<vmem>>, vector<1x8x8x4xbf16>
      %124 = vector.shape_cast %123 : vector<1x8x8x4xbf16> to vector<8x8x4xbf16>
      %125 = vector.shape_cast %114 : vector<8x8x4xbf16> to vector<1x8x8x4xbf16>
      tpu.vector_store %arg10[%122, %c1_118, %c0_119, %c4_120], %125 {strides = array<i32>} : memref<10x10x8x12xbf16, #tpu.memory_space<vmem>>, vector<1x8x8x4xbf16>,
      %126 = vector.extract_strided_slice %114 {offsets = [0, 1, 0], sizes = [8, 7, 4], strides = [1, 1, 1]} : vector<8x8x4xbf16> to vector<8x7x4xbf16>
      %c1_i32_121 = arith.constant 1 : i32
      %127 = arith.addi %arg11, %c1_i32_121 : i32
      %128 = arith.index_cast %127 : i32 to index
      %c1_122 = arith.constant 1 : index
      %c0_123 = arith.constant 0 : index
      %c8_124 = arith.constant 8 : index
      %129 = vector.load %arg10[%128, %c1_122, %c0_123, %c8_124] : memref<10x10x8x12xbf16, #tpu.memory_space<vmem>>, vector<1x8x7x4xbf16>
      %130 = vector.shape_cast %129 : vector<1x8x7x4xbf16> to vector<8x7x4xbf16>
      %131 = vector.shape_cast %126 : vector<8x7x4xbf16> to vector<1x8x7x4xbf16>
      tpu.vector_store %arg10[%128, %c1_122, %c0_123, %c8_124], %131 {strides = array<i32>} : memref<10x10x8x12xbf16, #tpu.memory_space<vmem>>, vector<1x8x7x4xbf16>,
    }
    %c8_i32_36 = arith.constant 8 : i32
    %c0_37 = arith.constant 0 : index
    %c0_38 = arith.constant 0 : index
    %18 = vector.load %arg6[%c0_37, %c0_38] : memref<1x4xf32, #tpu.memory_space<vmem>>, vector<1x4xf32>
    %19 = vector.shape_cast %18 : vector<1x4xf32> to vector<4xf32>
    %c0_39 = arith.constant 0 : index
    %c0_40 = arith.constant 0 : index
    %20 = vector.load %arg7[%c0_39, %c0_40] : memref<1x4xf32, #tpu.memory_space<vmem>>, vector<1x4xf32>
    %21 = vector.shape_cast %20 : vector<1x4xf32> to vector<4xf32>
    %c0_i32_41 = arith.constant 0 : i32
    %c8_i32_42 = arith.constant 8 : i32
    %22 = arith.addi %c0_i32_41, %c8_i32_42 : i32
    %c1_i32_43 = arith.constant 1 : i32
    scf.for %arg11 = %c0_i32_41 to %22 step %c1_i32_43  : i32 {
      %cst_45 = arith.constant 0.000000e+00 : f32
      %23 = vector.broadcast %cst_45 : f32 to vector<64x4xf32>
      %c0_i32_46 = arith.constant 0 : i32
      %24 = arith.addi %arg11, %c0_i32_46 : i32
      %25 = arith.index_cast %24 : i32 to index
      %c0_47 = arith.constant 0 : index
      %c0_48 = arith.constant 0 : index
      %c0_49 = arith.constant 0 : index
      %26 = vector.load %arg10[%25, %c0_47, %c0_48, %c0_49] : memref<10x10x8x12xbf16, #tpu.memory_space<vmem>>, vector<1x8x8x12xbf16>
      %27 = vector.shape_cast %26 : vector<1x8x8x12xbf16> to vector<8x8x12xbf16>
      %28 = vector.shape_cast %27 : vector<8x8x12xbf16> to vector<64x12xbf16>
      %c0_50 = arith.constant 0 : index
      %c0_51 = arith.constant 0 : index
      %c0_52 = arith.constant 0 : index
      %29 = vector.load %arg3[%c0_50, %c0_51, %c0_52] : memref<9x12x4xbf16, #tpu.memory_space<vmem>>, vector<1x12x4xbf16>
      %30 = vector.shape_cast %29 : vector<1x12x4xbf16> to vector<12x4xbf16>
      %cst_53 = arith.constant dense<0.000000e+00> : vector<64x4xf32>
      %31 = tpu.matmul %28, %30, %cst_53 {dimension_numbers = #tpu.dot_dimension_numbers<[1], [0], [0], [1], [0, 0, 1, 1], [], []>} : vector<64x12xbf16>, vector<12x4xbf16>, vector<64x4xf32> -> vector<64x4xf32>
      %32 = arith.addf %23, %31 : vector<64x4xf32>
      %c0_i32_54 = arith.constant 0 : i32
      %33 = arith.addi %arg11, %c0_i32_54 : i32
      %34 = arith.index_cast %33 : i32 to index
      %c1_55 = arith.constant 1 : index
      %c0_56 = arith.constant 0 : index
      %c0_57 = arith.constant 0 : index
      %35 = vector.load %arg10[%34, %c1_55, %c0_56, %c0_57] : memref<10x10x8x12xbf16, #tpu.memory_space<vmem>>, vector<1x8x8x12xbf16>
      %36 = vector.shape_cast %35 : vector<1x8x8x12xbf16> to vector<8x8x12xbf16>
      %37 = vector.shape_cast %36 : vector<8x8x12xbf16> to vector<64x12xbf16>
      %c1_58 = arith.constant 1 : index
      %c0_59 = arith.constant 0 : index
      %c0_60 = arith.constant 0 : index
      %38 = vector.load %arg3[%c1_58, %c0_59, %c0_60] : memref<9x12x4xbf16, #tpu.memory_space<vmem>>, vector<1x12x4xbf16>
      %39 = vector.shape_cast %38 : vector<1x12x4xbf16> to vector<12x4xbf16>
      %cst_61 = arith.constant dense<0.000000e+00> : vector<64x4xf32>
      %40 = tpu.matmul %37, %39, %cst_61 {dimension_numbers = #tpu.dot_dimension_numbers<[1], [0], [0], [1], [0, 0, 1, 1], [], []>} : vector<64x12xbf16>, vector<12x4xbf16>, vector<64x4xf32> -> vector<64x4xf32>
      %41 = arith.addf %32, %40 : vector<64x4xf32>
      %c0_i32_62 = arith.constant 0 : i32
      %42 = arith.addi %arg11, %c0_i32_62 : i32
      %43 = arith.index_cast %42 : i32 to index
      %c2 = arith.constant 2 : index
      %c0_63 = arith.constant 0 : index
      %c0_64 = arith.constant 0 : index
      %44 = vector.load %arg10[%43, %c2, %c0_63, %c0_64] : memref<10x10x8x12xbf16, #tpu.memory_space<vmem>>, vector<1x8x8x12xbf16>
      %45 = vector.shape_cast %44 : vector<1x8x8x12xbf16> to vector<8x8x12xbf16>
      %46 = vector.shape_cast %45 : vector<8x8x12xbf16> to vector<64x12xbf16>
      %c2_65 = arith.constant 2 : index
      %c0_66 = arith.constant 0 : index
      %c0_67 = arith.constant 0 : index
      %47 = vector.load %arg3[%c2_65, %c0_66, %c0_67] : memref<9x12x4xbf16, #tpu.memory_space<vmem>>, vector<1x12x4xbf16>
      %48 = vector.shape_cast %47 : vector<1x12x4xbf16> to vector<12x4xbf16>
      %cst_68 = arith.constant dense<0.000000e+00> : vector<64x4xf32>
      %49 = tpu.matmul %46, %48, %cst_68 {dimension_numbers = #tpu.dot_dimension_numbers<[1], [0], [0], [1], [0, 0, 1, 1], [], []>} : vector<64x12xbf16>, vector<12x4xbf16>, vector<64x4xf32> -> vector<64x4xf32>
      %50 = arith.addf %41, %49 : vector<64x4xf32>
      %c1_i32_69 = arith.constant 1 : i32
      %51 = arith.addi %arg11, %c1_i32_69 : i32
      %52 = arith.index_cast %51 : i32 to index
      %c0_70 = arith.constant 0 : index
      %c0_71 = arith.constant 0 : index
      %c0_72 = arith.constant 0 : index
      %53 = vector.load %arg10[%52, %c0_70, %c0_71, %c0_72] : memref<10x10x8x12xbf16, #tpu.memory_space<vmem>>, vector<1x8x8x12xbf16>
      %54 = vector.shape_cast %53 : vector<1x8x8x12xbf16> to vector<8x8x12xbf16>
      %55 = vector.shape_cast %54 : vector<8x8x12xbf16> to vector<64x12xbf16>
      %c3 = arith.constant 3 : index
      %c0_73 = arith.constant 0 : index
      %c0_74 = arith.constant 0 : index
      %56 = vector.load %arg3[%c3, %c0_73, %c0_74] : memref<9x12x4xbf16, #tpu.memory_space<vmem>>, vector<1x12x4xbf16>
      %57 = vector.shape_cast %56 : vector<1x12x4xbf16> to vector<12x4xbf16>
      %cst_75 = arith.constant dense<0.000000e+00> : vector<64x4xf32>
      %58 = tpu.matmul %55, %57, %cst_75 {dimension_numbers = #tpu.dot_dimension_numbers<[1], [0], [0], [1], [0, 0, 1, 1], [], []>} : vector<64x12xbf16>, vector<12x4xbf16>, vector<64x4xf32> -> vector<64x4xf32>
      %59 = arith.addf %50, %58 : vector<64x4xf32>
      %c1_i32_76 = arith.constant 1 : i32
      %60 = arith.addi %arg11, %c1_i32_76 : i32
      %61 = arith.index_cast %60 : i32 to index
      %c1_77 = arith.constant 1 : index
      %c0_78 = arith.constant 0 : index
      %c0_79 = arith.constant 0 : index
      %62 = vector.load %arg10[%61, %c1_77, %c0_78, %c0_79] : memref<10x10x8x12xbf16, #tpu.memory_space<vmem>>, vector<1x8x8x12xbf16>
      %63 = vector.shape_cast %62 : vector<1x8x8x12xbf16> to vector<8x8x12xbf16>
      %64 = vector.shape_cast %63 : vector<8x8x12xbf16> to vector<64x12xbf16>
      %c4_80 = arith.constant 4 : index
      %c0_81 = arith.constant 0 : index
      %c0_82 = arith.constant 0 : index
      %65 = vector.load %arg3[%c4_80, %c0_81, %c0_82] : memref<9x12x4xbf16, #tpu.memory_space<vmem>>, vector<1x12x4xbf16>
      %66 = vector.shape_cast %65 : vector<1x12x4xbf16> to vector<12x4xbf16>
      %cst_83 = arith.constant dense<0.000000e+00> : vector<64x4xf32>
      %67 = tpu.matmul %64, %66, %cst_83 {dimension_numbers = #tpu.dot_dimension_numbers<[1], [0], [0], [1], [0, 0, 1, 1], [], []>} : vector<64x12xbf16>, vector<12x4xbf16>, vector<64x4xf32> -> vector<64x4xf32>
      %68 = arith.addf %59, %67 : vector<64x4xf32>
      %c1_i32_84 = arith.constant 1 : i32
      %69 = arith.addi %arg11, %c1_i32_84 : i32
      %70 = arith.index_cast %69 : i32 to index
      %c2_85 = arith.constant 2 : index
      %c0_86 = arith.constant 0 : index
      %c0_87 = arith.constant 0 : index
      %71 = vector.load %arg10[%70, %c2_85, %c0_86, %c0_87] : memref<10x10x8x12xbf16, #tpu.memory_space<vmem>>, vector<1x8x8x12xbf16>
      %72 = vector.shape_cast %71 : vector<1x8x8x12xbf16> to vector<8x8x12xbf16>
      %73 = vector.shape_cast %72 : vector<8x8x12xbf16> to vector<64x12xbf16>
      %c5 = arith.constant 5 : index
      %c0_88 = arith.constant 0 : index
      %c0_89 = arith.constant 0 : index
      %74 = vector.load %arg3[%c5, %c0_88, %c0_89] : memref<9x12x4xbf16, #tpu.memory_space<vmem>>, vector<1x12x4xbf16>
      %75 = vector.shape_cast %74 : vector<1x12x4xbf16> to vector<12x4xbf16>
      %cst_90 = arith.constant dense<0.000000e+00> : vector<64x4xf32>
      %76 = tpu.matmul %73, %75, %cst_90 {dimension_numbers = #tpu.dot_dimension_numbers<[1], [0], [0], [1], [0, 0, 1, 1], [], []>} : vector<64x12xbf16>, vector<12x4xbf16>, vector<64x4xf32> -> vector<64x4xf32>
      %77 = arith.addf %68, %76 : vector<64x4xf32>
      %c2_i32 = arith.constant 2 : i32
      %78 = arith.addi %arg11, %c2_i32 : i32
      %79 = arith.index_cast %78 : i32 to index
      %c0_91 = arith.constant 0 : index
      %c0_92 = arith.constant 0 : index
      %c0_93 = arith.constant 0 : index
      %80 = vector.load %arg10[%79, %c0_91, %c0_92, %c0_93] : memref<10x10x8x12xbf16, #tpu.memory_space<vmem>>, vector<1x8x8x12xbf16>
      %81 = vector.shape_cast %80 : vector<1x8x8x12xbf16> to vector<8x8x12xbf16>
      %82 = vector.shape_cast %81 : vector<8x8x12xbf16> to vector<64x12xbf16>
      %c6 = arith.constant 6 : index
      %c0_94 = arith.constant 0 : index
      %c0_95 = arith.constant 0 : index
      %83 = vector.load %arg3[%c6, %c0_94, %c0_95] : memref<9x12x4xbf16, #tpu.memory_space<vmem>>, vector<1x12x4xbf16>
      %84 = vector.shape_cast %83 : vector<1x12x4xbf16> to vector<12x4xbf16>
      %cst_96 = arith.constant dense<0.000000e+00> : vector<64x4xf32>
      %85 = tpu.matmul %82, %84, %cst_96 {dimension_numbers = #tpu.dot_dimension_numbers<[1], [0], [0], [1], [0, 0, 1, 1], [], []>} : vector<64x12xbf16>, vector<12x4xbf16>, vector<64x4xf32> -> vector<64x4xf32>
      %86 = arith.addf %77, %85 : vector<64x4xf32>
      %c2_i32_97 = arith.constant 2 : i32
      %87 = arith.addi %arg11, %c2_i32_97 : i32
      %88 = arith.index_cast %87 : i32 to index
      %c1_98 = arith.constant 1 : index
      %c0_99 = arith.constant 0 : index
      %c0_100 = arith.constant 0 : index
      %89 = vector.load %arg10[%88, %c1_98, %c0_99, %c0_100] : memref<10x10x8x12xbf16, #tpu.memory_space<vmem>>, vector<1x8x8x12xbf16>
      %90 = vector.shape_cast %89 : vector<1x8x8x12xbf16> to vector<8x8x12xbf16>
      %91 = vector.shape_cast %90 : vector<8x8x12xbf16> to vector<64x12xbf16>
      %c7 = arith.constant 7 : index
      %c0_101 = arith.constant 0 : index
      %c0_102 = arith.constant 0 : index
      %92 = vector.load %arg3[%c7, %c0_101, %c0_102] : memref<9x12x4xbf16, #tpu.memory_space<vmem>>, vector<1x12x4xbf16>
      %93 = vector.shape_cast %92 : vector<1x12x4xbf16> to vector<12x4xbf16>
      %cst_103 = arith.constant dense<0.000000e+00> : vector<64x4xf32>
      %94 = tpu.matmul %91, %93, %cst_103 {dimension_numbers = #tpu.dot_dimension_numbers<[1], [0], [0], [1], [0, 0, 1, 1], [], []>} : vector<64x12xbf16>, vector<12x4xbf16>, vector<64x4xf32> -> vector<64x4xf32>
      %95 = arith.addf %86, %94 : vector<64x4xf32>
      %c2_i32_104 = arith.constant 2 : i32
      %96 = arith.addi %arg11, %c2_i32_104 : i32
      %97 = arith.index_cast %96 : i32 to index
      %c2_105 = arith.constant 2 : index
      %c0_106 = arith.constant 0 : index
      %c0_107 = arith.constant 0 : index
      %98 = vector.load %arg10[%97, %c2_105, %c0_106, %c0_107] : memref<10x10x8x12xbf16, #tpu.memory_space<vmem>>, vector<1x8x8x12xbf16>
      %99 = vector.shape_cast %98 : vector<1x8x8x12xbf16> to vector<8x8x12xbf16>
      %100 = vector.shape_cast %99 : vector<8x8x12xbf16> to vector<64x12xbf16>
      %c8_108 = arith.constant 8 : index
      %c0_109 = arith.constant 0 : index
      %c0_110 = arith.constant 0 : index
      %101 = vector.load %arg3[%c8_108, %c0_109, %c0_110] : memref<9x12x4xbf16, #tpu.memory_space<vmem>>, vector<1x12x4xbf16>
      %102 = vector.shape_cast %101 : vector<1x12x4xbf16> to vector<12x4xbf16>
      %cst_111 = arith.constant dense<0.000000e+00> : vector<64x4xf32>
      %103 = tpu.matmul %100, %102, %cst_111 {dimension_numbers = #tpu.dot_dimension_numbers<[1], [0], [0], [1], [0, 0, 1, 1], [], []>} : vector<64x12xbf16>, vector<12x4xbf16>, vector<64x4xf32> -> vector<64x4xf32>
      %104 = arith.addf %95, %103 : vector<64x4xf32>
      %c0_112 = arith.constant 0 : index
      %105 = arith.index_cast %arg11 : i32 to index
      %c0_113 = arith.constant 0 : index
      %c0_114 = arith.constant 0 : index
      %c0_115 = arith.constant 0 : index
      %106 = vector.load %arg1[%c0_112, %105, %c0_113, %c0_114, %c0_115] : memref<1x8x8x8x4xbf16, #tpu.memory_space<vmem>>, vector<1x1x8x8x4xbf16>
      %107 = vector.shape_cast %106 : vector<1x1x8x8x4xbf16> to vector<8x8x4xbf16>
      %108 = arith.extf %107 : vector<8x8x4xbf16> to vector<8x8x4xf32>
      %109 = vector.shape_cast %108 : vector<8x8x4xf32> to vector<64x4xf32>
      %110 = vector.shape_cast %19 : vector<4xf32> to vector<1x4xf32>
      %111 = vector.broadcast %110 : vector<1x4xf32> to vector<64x4xf32>
      %112 = arith.mulf %104, %111 : vector<64x4xf32>
      %113 = vector.shape_cast %21 : vector<4xf32> to vector<1x4xf32>
      %114 = vector.broadcast %113 : vector<1x4xf32> to vector<64x4xf32>
      %115 = arith.addf %112, %114 : vector<64x4xf32>
      %116 = arith.addf %115, %109 : vector<64x4xf32>
      %cst_116 = arith.constant 0.000000e+00 : f32
      %117 = vector.broadcast %cst_116 : f32 to vector<64x4xf32>
      %118 = arith.maximumf %116, %117 : vector<64x4xf32>
      %119 = vector.shape_cast %118 : vector<64x4xf32> to vector<8x8x4xf32>
      %c0_117 = arith.constant 0 : index
      %120 = arith.index_cast %arg11 : i32 to index
      %c0_118 = arith.constant 0 : index
      %c0_119 = arith.constant 0 : index
      %c0_120 = arith.constant 0 : index
      %121 = vector.load %arg8[%c0_117, %120, %c0_118, %c0_119, %c0_120] : memref<1x8x8x8x4xf32, #tpu.memory_space<vmem>>, vector<1x1x8x8x4xf32>
      %122 = vector.shape_cast %121 : vector<1x1x8x8x4xf32> to vector<8x8x4xf32>
      %123 = vector.shape_cast %119 : vector<8x8x4xf32> to vector<1x1x8x8x4xf32>
      tpu.vector_store %arg8[%c0_117, %120, %c0_118, %c0_119, %c0_120], %123 {strides = array<i32>} : memref<1x8x8x8x4xf32, #tpu.memory_space<vmem>>, vector<1x1x8x8x4xf32>,
    }
    %c8_i32_44 = arith.constant 8 : i32
    return
  }
  func.func @transform_0(%arg0: i32) -> (i32, i32, i32, i32, i32) {
    %c0_i32 = arith.constant 0 : i32
    %c0_i32_0 = arith.constant 0 : i32
    %c0_i32_1 = arith.constant 0 : i32
    %c0_i32_2 = arith.constant 0 : i32
    %c0_i32_3 = arith.constant 0 : i32
    return %arg0, %c0_i32, %c0_i32_0, %c0_i32_1, %c0_i32_2 : i32, i32, i32, i32, i32
  }
  func.func @transform_1(%arg0: i32) -> (i32, i32, i32) {
    %c0_i32 = arith.constant 0 : i32
    %c0_i32_0 = arith.constant 0 : i32
    %c0_i32_1 = arith.constant 0 : i32
    %c0_i32_2 = arith.constant 0 : i32
    return %c0_i32, %c0_i32_0, %c0_i32_1 : i32, i32, i32
  }
  func.func @transform_2(%arg0: i32) -> (i32, i32, i32) {
    %c0_i32 = arith.constant 0 : i32
    %c0_i32_0 = arith.constant 0 : i32
    %c0_i32_1 = arith.constant 0 : i32
    %c0_i32_2 = arith.constant 0 : i32
    return %c0_i32, %c0_i32_0, %c0_i32_1 : i32, i32, i32
  }
  func.func @transform_3(%arg0: i32) -> (i32, i32) {
    %c0_i32 = arith.constant 0 : i32
    %c0_i32_0 = arith.constant 0 : i32
    %c0_i32_1 = arith.constant 0 : i32
    return %c0_i32, %c0_i32_0 : i32, i32
  }
  func.func @transform_4(%arg0: i32) -> (i32, i32) {
    %c0_i32 = arith.constant 0 : i32
    %c0_i32_0 = arith.constant 0 : i32
    %c0_i32_1 = arith.constant 0 : i32
    return %c0_i32, %c0_i32_0 : i32, i32
  }
  func.func @transform_5(%arg0: i32) -> (i32, i32) {
    %c0_i32 = arith.constant 0 : i32
    %c0_i32_0 = arith.constant 0 : i32
    %c0_i32_1 = arith.constant 0 : i32
    return %c0_i32, %c0_i32_0 : i32, i32
  }
  func.func @transform_6(%arg0: i32) -> (i32, i32) {
    %c0_i32 = arith.constant 0 : i32
    %c0_i32_0 = arith.constant 0 : i32
    %c0_i32_1 = arith.constant 0 : i32
    return %c0_i32, %c0_i32_0 : i32, i32
  }
  func.func @transform_7(%arg0: i32) -> (i32, i32, i32, i32, i32) {
    %c0_i32 = arith.constant 0 : i32
    %c0_i32_0 = arith.constant 0 : i32
    %c0_i32_1 = arith.constant 0 : i32
    %c0_i32_2 = arith.constant 0 : i32
    %c0_i32_3 = arith.constant 0 : i32
    return %arg0, %c0_i32, %c0_i32_0, %c0_i32_1, %c0_i32_2 : i32, i32, i32, i32, i32
  }
}

</mosaic_0001>

<bundles_post_ra>
// kernel: tpu_custom_call.1
= control target key start
LH: loop header
LB: loop body
LE: loop exit
PB: predicated region body
PF: predicated region fallthrough
CT: control target
= control target key end

     0   :  { %s6467_s24 = smov 0   ;;  %s8264_s0 = inlined_call_operand.vmem [shape: bf16[2,8,8,8,4], index: 0, kind: input, shape index: {}]   ;;  %s8265_s1 = inlined_call_operand.vmem [shape: bf16[9,12,4], index: 1, kind: input, shape index: {}]   ;;  %s8266_s2 = inlined_call_operand.vmem [shape: bf16[9,12,4], index: 2, kind: input, shape index: {}]   ;;  %s8267_s3 = inlined_call_operand.vmem [shape: f32[1,4], index: 3, kind: input, shape index: {}]   ;;  %s8268_s4 = inlined_call_operand.vmem [shape: f32[1,4], index: 4, kind: input, shape index: {}]   ;;  %s8269_s5 = inlined_call_operand.vmem [shape: f32[1,4], index: 5, kind: input, shape index: {}]   ;;  %s8270_s6 = inlined_call_operand.vmem [shape: f32[1,4], index: 6, kind: input, shape index: {}]   ;;  %s8271_s7 = inlined_call_operand.vmem [shape: f32[2,8,8,8,4], index: 7, kind: output, shape index: {}]  }
   0x1 LB: > { %s5422_s25 = sadd.s32 4294967295, %s6412_s24   ;;  %p5426_p0 = scmp.ge.s32.totalorder %s6412_s24, 1  ;;  %s6412_s24 = sphi %s6467_s24, %s17_s24  }
   0x2   : > { %p237_p1 = scmp.lt.s32.totalorder %s6412_s24, 3 }
   0x4   : > { %p238_p2 = pnand %p5426_p0, %p237_p1 }
   0x5   : > { %p6477_p3 = scmp.lt.s32.totalorder (!%p238_p2), %s5422_s25, 1  ;;  %vm280_vm0 = vcmask (!%p238_p2), 93184   ;;  %v6422_v0 = vmov (!%p238_p2), 0   ;;  %s6423_s12 = smov (!%p238_p2), 4   ;;  %vm1058_vm1 = vcmask (!%p238_p2), 27648   ;;  %vm1573_vm4 = vcmask (!%p238_p2), 60448  }
   0x6   : > { %241 = sbr.rel (%p238_p2) target bundleno = 1179 (0x49b), region = 48  ;;  %294 = vst.msk [vmem:[#allocation2 + $0x34] sm:$0xf] (!%p238_p2), %vm280_vm0, %v6422_v0  ;;  %281 = vst.msk [vmem:[#allocation2] sm:$0xf] (!%p238_p2), %vm280_vm0, %v6422_v0  ;;  %s6424_s13 = smov (!%p238_p2), 8  }
   0x7   : > { %282 = vst.msk [vmem:[#allocation2 + $0x4] sm:$0xf] (!%p238_p2), %vm280_vm0, %v6422_v0  ;;  %283 = vst.msk [vmem:[#allocation2 + $0x8] sm:$0xf] (!%p238_p2), %vm280_vm0, %v6422_v0  ;;  %vm1059_vm2 = vsmask.f32 (!%p238_p2), 7938 }
   0x8   : > { %284 = vst.msk [vmem:[#allocation2 + $0xc] sm:$0xf] (!%p238_p2), %vm280_vm0, %v6422_v0  ;;  %285 = vst.msk [vmem:[#allocation2 + $0x10] sm:$0xf] (!%p238_p2), %vm280_vm0, %v6422_v0  ;;  %vm2470_vm5 = vcmask (!%p238_p2), 93248   ;;  %s7798_s18 = smov (!%p238_p2), 0  }
   0x9   : > { %286 = vst.msk [vmem:[#allocation2 + $0x14] sm:$0xf] (!%p238_p2), %vm280_vm0, %v6422_v0  ;;  %287 = vst.msk [vmem:[#allocation2 + $0x18] sm:$0xf] (!%p238_p2), %vm280_vm0, %v6422_v0  ;;  %vm2471_vm6 = vsmask.f32 (!%p238_p2), 3328 }
   0xa   : > { %288 = vst.msk [vmem:[#allocation2 + $0x1c] sm:$0xf] (!%p238_p2), %vm280_vm0, %v6422_v0  ;;  %289 = vst.msk [vmem:[#allocation2 + $0x20] sm:$0xf] (!%p238_p2), %vm280_vm0, %v6422_v0 }
   0xb   : > { %290 = vst.msk [vmem:[#allocation2 + $0x24] sm:$0xf] (!%p238_p2), %vm280_vm0, %v6422_v0  ;;  %291 = vst.msk [vmem:[#allocation2 + $0x28] sm:$0xf] (!%p238_p2), %vm280_vm0, %v6422_v0 }
   0xc   : > { %292 = vst.msk [vmem:[#allocation2 + $0x2c] sm:$0xf] (!%p238_p2), %vm280_vm0, %v6422_v0  ;;  %293 = vst.msk [vmem:[#allocation2 + $0x30] sm:$0xf] (!%p238_p2), %vm280_vm0, %v6422_v0 }
   0xd   : > { %295 = vst.msk [vmem:[#allocation2 + $0x38] sm:$0xf] %vm280_vm0, %v6422_v0  ;;  %296 = vst.msk [vmem:[#allocation2 + $0x3c] sm:$0xf] %vm280_vm0, %v6422_v0  ;;  %s8278_s25 = smov (!%p6477_p3, %s5422_s25), 1 }
   0xe   : > { %297 = vst.msk [vmem:[#allocation2 + $0x40] sm:$0xf] %vm280_vm0, %v6422_v0  ;;  %298 = vst.msk [vmem:[#allocation2 + $0x44] sm:$0xf] %vm280_vm0, %v6422_v0  ;;  %s5825_s27 = sshll.u32 %s8278_s25, 8  ;;  %s5826_s28 = sshll.u32 %s8278_s25, 9 }
   0xf   : > { %299 = vst.msk [vmem:[#allocation2 + $0x48] sm:$0xf] %vm280_vm0, %v6422_v0  ;;  %300 = vst.msk [vmem:[#allocation2 + $0x4c] sm:$0xf] %vm280_vm0, %v6422_v0  ;;  %s6888_s8 = scalar_lea.vmem %s8264_s0, %s5825_s27  ;;  %s6893_s11 = scalar_lea.vmem %s8271_s7, %s5826_s28  ;;  %v1067_v24 = vld [vmem:[#allocation2 + $0x34] sm:$0xf] }
  0x10   : > { %301 = vst.msk [vmem:[#allocation2 + $0x50] sm:$0xf] %vm280_vm0, %v6422_v0  ;;  %302 = vst.msk [vmem:[#allocation2 + $0x54] sm:$0xf] %vm280_vm0, %v6422_v0  ;;  %v1255_v1 = vld [vmem:[%s6888_s8 + $0x8] sm:$0xf] }
  0x11   : > { %303 = vst.msk [vmem:[#allocation2 + $0x58] sm:$0xf] %vm280_vm0, %v6422_v0  ;;  %304 = vst.msk [vmem:[#allocation2 + $0x5c] sm:$0xf] %vm280_vm0, %v6422_v0  ;;  %v1253_v2 = vld [vmem:[%s6888_s8] sm:$0xf]  ;;  %1385 = vrot.lane.b32.xlu1 %v1255_v1, %s6423_s12 }
  0x12   : > { %305 = vst.msk [vmem:[#allocation2 + $0x60] sm:$0xf] %vm280_vm0, %v6422_v0  ;;  %306 = vst.msk [vmem:[#allocation2 + $0x64] sm:$0xf] %vm280_vm0, %v6422_v0  ;;  %1381 = vrot.lane.b32.xlu0 %v1253_v2, %s6423_s12  ;;  %v1256_v3 = vld [vmem:[%s6888_s8 + $0xc] sm:$0xf] }
  0x13   : > { %307 = vst.msk [vmem:[#allocation2 + $0x68] sm:$0xf] %vm280_vm0, %v6422_v0  ;;  %308 = vst.msk [vmem:[#allocation2 + $0x6c] sm:$0xf] %vm280_vm0, %v6422_v0  ;;  %v1254_v4 = vld [vmem:[%s6888_s8 + $0x4] sm:$0xf] }
  0x14   : > { %309 = vst.msk [vmem:[#allocation2 + $0x70] sm:$0xf] %vm280_vm0, %v6422_v0  ;;  %310 = vst.msk [vmem:[#allocation2 + $0x74] sm:$0xf] %vm280_vm0, %v6422_v0  ;;  %v1258_v5 = vld [vmem:[%s6888_s8 + $0x14] sm:$0xf] }
  0x15   : > { %311 = vst.msk [vmem:[#allocation2 + $0x78] sm:$0xf] %vm280_vm0, %v6422_v0  ;;  %312 = vst.msk [vmem:[#allocation2 + $0x7c] sm:$0xf] %vm280_vm0, %v6422_v0  ;;  %1387 = vrot.lane.b32.xlu1 %v1256_v3, %s6423_s12  ;;  %v1257_v6 = vld [vmem:[%s6888_s8 + $0x10] sm:$0xf] }
  0x16   : > { %313 = vst.msk [vmem:[#allocation2 + $0x80] sm:$0xf] %vm280_vm0, %v6422_v0  ;;  %314 = vst.msk [vmem:[#allocation2 + $0x84] sm:$0xf] %vm280_vm0, %v6422_v0  ;;  %1383 = vrot.lane.b32.xlu0 %v1254_v4, %s6423_s12  ;;  %v1260_v7 = vld [vmem:[%s6888_s8 + $0x1c] sm:$0xf] }
  0x17   : > { %315 = vst.msk [vmem:[#allocation2 + $0x88] sm:$0xf] %vm280_vm0, %v6422_v0  ;;  %316 = vst.msk [vmem:[#allocation2 + $0x8c] sm:$0xf] %vm280_vm0, %v6422_v0  ;;  %v1259_v8 = vld [vmem:[%s6888_s8 + $0x18] sm:$0xf] }
  0x18   : > { %317 = vst.msk [vmem:[#allocation2 + $0x90] sm:$0xf] %vm280_vm0, %v6422_v0  ;;  %318 = vst.msk [vmem:[#allocation2 + $0x94] sm:$0xf] %vm280_vm0, %v6422_v0  ;;  %v1262_v9 = vld [vmem:[%s6888_s8 + $0x24] sm:$0xf] }
  0x19   : > { %319 = vst.msk [vmem:[#allocation2 + $0x98] sm:$0xf] %vm280_vm0, %v6422_v0  ;;  %320 = vst.msk [vmem:[#allocation2 + $0x9c] sm:$0xf] %vm280_vm0, %v6422_v0  ;;  %1391 = vrot.lane.b32.xlu1 %v1258_v5, %s6423_s12  ;;  %v1261_v10 = vld [vmem:[%s6888_s8 + $0x20] sm:$0xf] }
  0x1a   : > { %321 = vst.msk [vmem:[#allocation2 + $0xa0] sm:$0xf] %vm280_vm0, %v6422_v0  ;;  %322 = vst.msk [vmem:[#allocation2 + $0xa4] sm:$0xf] %vm280_vm0, %v6422_v0  ;;  %1389 = vrot.lane.b32.xlu0 %v1257_v6, %s6423_s12  ;;  %v1264_v11 = vld [vmem:[%s6888_s8 + $0x2c] sm:$0xf] }
  0x1b   : > { %323 = vst.msk [vmem:[#allocation2 + $0xa8] sm:$0xf] %vm280_vm0, %v6422_v0  ;;  %324 = vst.msk [vmem:[#allocation2 + $0xac] sm:$0xf] %vm280_vm0, %v6422_v0  ;;  %v1263_v12 = vld [vmem:[%s6888_s8 + $0x28] sm:$0xf] }
  0x1c   : > { %325 = vst.msk [vmem:[#allocation2 + $0xb0] sm:$0xf] %vm280_vm0, %v6422_v0  ;;  %326 = vst.msk [vmem:[#allocation2 + $0xb4] sm:$0xf] %vm280_vm0, %v6422_v0  ;;  %v1266_v13 = vld [vmem:[%s6888_s8 + $0x34] sm:$0xf] }
  0x1d   : > { %327 = vst.msk [vmem:[#allocation2 + $0xb8] sm:$0xf] %vm280_vm0, %v6422_v0  ;;  %328 = vst.msk [vmem:[#allocation2 + $0xbc] sm:$0xf] %vm280_vm0, %v6422_v0  ;;  %1395 = vrot.lane.b32.xlu1 %v1260_v7, %s6423_s12  ;;  %v483_v14 = vld [vmem:[%s6888_s8 + $0x8] sm:$0xf] }
  0x1e   : > { %329 = vst.msk [vmem:[#allocation2 + $0xc0] sm:$0xf] %vm280_vm0, %v6422_v0  ;;  %330 = vst.msk [vmem:[#allocation2 + $0xc4] sm:$0xf] %vm280_vm0, %v6422_v0  ;;  %1393 = vrot.lane.b32.xlu0 %v1259_v8, %s6423_s12  ;;  %v481_v15 = vld [vmem:[%s6888_s8] sm:$0xf] }
  0x1f   : > { %331 = vst.msk [vmem:[#allocation2 + $0xc8] sm:$0xf] %vm280_vm0, %v6422_v0  ;;  %332 = vst.msk [vmem:[#allocation2 + $0xcc] sm:$0xf] %vm280_vm0, %v6422_v0  ;;  %v1265_v16 = vld [vmem:[%s6888_s8 + $0x30] sm:$0xf] }
  0x20   : > { %333 = vst.msk [vmem:[#allocation2 + $0xd0] sm:$0xf] %vm280_vm0, %v6422_v0  ;;  %334 = vst.msk [vmem:[#allocation2 + $0xd4] sm:$0xf] %vm280_vm0, %v6422_v0  ;;  %v560_v17 = vshrl.u32 %v483_v14, 16  ;;  %v563_v18 = vshll.u32 %v483_v14, 16 }
  0x21   : > { %335 = vst.msk [vmem:[#allocation2 + $0xd8] sm:$0xf] %vm280_vm0, %v6422_v0  ;;  %336 = vst.msk [vmem:[#allocation2 + $0xdc] sm:$0xf] %vm280_vm0, %v6422_v0  ;;  %1399 = vrot.lane.b32.xlu1 %v1262_v9, %s6423_s12  ;;  %v546_v19 = vshrl.u32 %v481_v15, 16  ;;  %v549_v20 = vshll.u32 %v481_v15, 16 }
  0x22   : > { %337 = vst.msk [vmem:[#allocation2 + $0xe0] sm:$0xf] %vm280_vm0, %v6422_v0  ;;  %338 = vst.msk [vmem:[#allocation2 + $0xe4] sm:$0xf] %vm280_vm0, %v6422_v0  ;;  %1397 = vrot.lane.b32.xlu0 %v1261_v10, %s6423_s12  ;;  %v484_v21 = vld [vmem:[%s6888_s8 + $0xc] sm:$0xf] }
  0x23   : > { %339 = vst.msk [vmem:[#allocation2 + $0xe8] sm:$0xf] %vm280_vm0, %v6422_v0  ;;  %340 = vst.msk [vmem:[#allocation2 + $0xec] sm:$0xf] %vm280_vm0, %v6422_v0  ;;  %v482_v22 = vld [vmem:[%s6888_s8 + $0x4] sm:$0xf] }
  0x24   : > { %341 = vst.msk [vmem:[#allocation2 + $0xf0] sm:$0xf] %vm280_vm0, %v6422_v0  ;;  %342 = vst.msk [vmem:[#allocation2 + $0xf4] sm:$0xf] %vm280_vm0, %v6422_v0  ;;  %v1268_v23 = vld [vmem:[%s6888_s8 + $0x3c] sm:$0xf] }
  0x25   : > { %343 = vst.msk [vmem:[#allocation2 + $0xf8] sm:$0xf] %vm280_vm0, %v6422_v0  ;;  %344 = vst.msk [vmem:[#allocation2 + $0xfc] sm:$0xf] %vm280_vm0, %v6422_v0  ;;  %1403 = vrot.lane.b32.xlu1 %v1264_v11, %s6423_s12  ;;  %v562_v25 = vrot.slane %v560_v17, 7  ;;  %v548_v26 = vrot.slane %v546_v19, 7 }
  0x26   : > { %345 = vst.msk [vmem:[#allocation2 + $0x100] sm:$0xf] %vm280_vm0, %v6422_v0  ;;  %346 = vst.msk [vmem:[#allocation2 + $0x104] sm:$0xf] %vm280_vm0, %v6422_v0  ;;  %1401 = vrot.lane.b32.xlu0 %v1263_v12, %s6423_s12  ;;  %v567_v27 = vshrl.u32 %v484_v21, 16  ;;  %v570_v28 = vshll.u32 %v484_v21, 16 }
  0x27   : > { %347 = vst.msk [vmem:[#allocation2 + $0x108] sm:$0xf] %vm280_vm0, %v6422_v0  ;;  %348 = vst.msk [vmem:[#allocation2 + $0x10c] sm:$0xf] %vm280_vm0, %v6422_v0  ;;  %v1061_v30 = vld [vmem:[#allocation2 + $0x2c] sm:$0xf]  ;;  %v565_v35 = vor.u32 %v563_v18, %v562_v25  ;;  %v551_v36 = vor.u32 %v549_v20, %v548_v26 }
  0x28   : > { %349 = vst.msk [vmem:[#allocation2 + $0x110] sm:$0xf] %vm280_vm0, %v6422_v0  ;;  %350 = vst.msk [vmem:[#allocation2 + $0x114] sm:$0xf] %vm280_vm0, %v6422_v0  ;;  %v553_v31 = vshrl.u32 %v482_v22, 16  ;;  %v556_v32 = vshll.u32 %v482_v22, 16 }
  0x29   : > { %351 = vst.msk [vmem:[#allocation2 + $0x118] sm:$0xf] %vm280_vm0, %v6422_v0  ;;  %352 = vst.msk [vmem:[#allocation2 + $0x11c] sm:$0xf] %vm280_vm0, %v6422_v0  ;;  %1407 = vrot.lane.b32.xlu1 %v1266_v13, %s6423_s12  ;;  %v486_v33 = vld [vmem:[%s6888_s8 + $0x14] sm:$0xf] }
  0x2a   : > { %353 = vst.msk [vmem:[#allocation2 + $0x120] sm:$0xf] %vm280_vm0, %v6422_v0  ;;  %354 = vst.msk [vmem:[#allocation2 + $0x124] sm:$0xf] %vm280_vm0, %v6422_v0  ;;  %1405 = vrot.lane.b32.xlu0 %v1265_v16, %s6423_s12  ;;  %v1267_v34 = vld [vmem:[%s6888_s8 + $0x38] sm:$0xf] }
  0x2b   : > { %355 = vst.msk [vmem:[#allocation2 + $0x128] sm:$0xf] %vm280_vm0, %v6422_v0  ;;  %356 = vst.msk [vmem:[#allocation2 + $0x12c] sm:$0xf] %vm280_vm0, %v6422_v0  ;;  %v569_v37 = vrot.slane %v567_v27, 7  ;;  %v581_v38 = vshrl.u32 %v486_v33, 16 }
  0x2c   : > { %357 = vst.msk [vmem:[#allocation2 + $0x130] sm:$0xf] %vm280_vm0, %v6422_v0  ;;  %358 = vst.msk [vmem:[#allocation2 + $0x134] sm:$0xf] %vm280_vm0, %v6422_v0  ;;  %v485_v39 = vld [vmem:[%s6888_s8 + $0x10] sm:$0xf] }
  0x2d   : > { %359 = vst.msk [vmem:[#allocation2 + $0x138] sm:$0xf] %vm280_vm0, %v6422_v0  ;;  %360 = vst.msk [vmem:[#allocation2 + $0x13c] sm:$0xf] %vm280_vm0, %v6422_v0  ;;  %v1070_v40 = vld [vmem:[#allocation2 + $0x38] sm:$0xf]  ;;  %v572_v49 = vor.u32 %v570_v28, %v569_v37  ;;  %1411 = vrot.lane.b32.xlu1 %v1268_v23, %s6423_s12 }
  0x2e   : > { %361 = vst.msk [vmem:[#allocation2 + $0x140] sm:$0xf] %vm280_vm0, %v6422_v0  ;;  %362 = vst.msk [vmem:[#allocation2 + $0x144] sm:$0xf] %vm280_vm0, %v6422_v0  ;;  %v555_v41 = vrot.slane %v553_v31, 7  ;;  %v584_v42 = vshll.u32 %v486_v33, 16  ;;  %1409 = vrot.lane.b32.xlu0 %v1267_v34, %s6423_s12 }
  0x2f   : > { %363 = vst.msk [vmem:[#allocation2 + $0x148] sm:$0xf] %vm280_vm0, %v6422_v0  ;;  %364 = vst.msk [vmem:[#allocation2 + $0x14c] sm:$0xf] %vm280_vm0, %v6422_v0  ;;  %v574_v43 = vshrl.u32 %v485_v39, 16  ;;  %v577_v44 = vshll.u32 %v485_v39, 16 }
  0x30   : > { %365 = vst.msk [vmem:[#allocation2 + $0x150] sm:$0xf] %vm280_vm0, %v6422_v0  ;;  %366 = vst.msk [vmem:[#allocation2 + $0x154] sm:$0xf] %vm280_vm0, %v6422_v0  ;;  %v1270_v45 = vld [vmem:[%s6888_s8 + $0x44] sm:$0xf]  ;;  %v558_v52 = vor.u32 %v556_v32, %v555_v41 }
  0x31   : > { %367 = vst.msk [vmem:[#allocation2 + $0x158] sm:$0xf] %vm280_vm0, %v6422_v0  ;;  %368 = vst.msk [vmem:[#allocation2 + $0x15c] sm:$0xf] %vm280_vm0, %v6422_v0  ;;  %v1269_v46 = vld [vmem:[%s6888_s8 + $0x40] sm:$0xf]  ;;  %1415 = vrot.lane.b32.xlu1 %v1270_v45, %s6423_s12 }
  0x32   : > { %369 = vst.msk [vmem:[#allocation2 + $0x160] sm:$0xf] %vm280_vm0, %v6422_v0  ;;  %370 = vst.msk [vmem:[#allocation2 + $0x164] sm:$0xf] %vm280_vm0, %v6422_v0  ;;  %v1064_v50 = vld [vmem:[#allocation2 + $0x30] sm:$0xf]  ;;  %1413 = vrot.lane.b32.xlu0 %v1269_v46, %s6423_s12 }
  0x33   : > { %371 = vst.msk [vmem:[#allocation2 + $0x168] sm:$0xf] %vm280_vm0, %v6422_v0  ;;  %372 = vst.msk [vmem:[#allocation2 + $0x16c] sm:$0xf] %vm280_vm0, %v6422_v0  ;;  %v583_v51 = vrot.slane %v581_v38, 7  ;;  %v576_v54 = vrot.slane %v574_v43, 7 }
  0x34   : > { %373 = vst.msk [vmem:[#allocation2 + $0x170] sm:$0xf] %vm280_vm0, %v6422_v0  ;;  %374 = vst.msk [vmem:[#allocation2 + $0x174] sm:$0xf] %vm280_vm0, %v6422_v0  ;;  %v1076_v53 = vld [vmem:[#allocation2 + $0x40] sm:$0xf] }
  0x35   : > { %375 = vst.msk [vmem:[#allocation2 + $0x178] sm:$0xf] %vm280_vm0, %v6422_v0  ;;  %376 = vst.msk [vmem:[#allocation2 + $0x17c] sm:$0xf] %vm280_vm0, %v6422_v0  ;;  %v488_v55 = vld [vmem:[%s6888_s8 + $0x1c] sm:$0xf]  ;;  %v586_v57 = vor.u32 %v584_v42, %v583_v51  ;;  %v579_v63 = vor.u32 %v577_v44, %v576_v54 }
  0x36   : > { %377 = vst.msk [vmem:[#allocation2 + $0x180] sm:$0xf] %vm280_vm0, %v6422_v0  ;;  %378 = vst.msk [vmem:[#allocation2 + $0x184] sm:$0xf] %vm280_vm0, %v6422_v0  ;;  %v1073_v58 = vld [vmem:[#allocation2 + $0x3c] sm:$0xf] }
  0x37   : > { %379 = vst.msk [vmem:[#allocation2 + $0x188] sm:$0xf] %vm280_vm0, %v6422_v0  ;;  %380 = vst.msk [vmem:[#allocation2 + $0x18c] sm:$0xf] %vm280_vm0, %v6422_v0  ;;  %v595_v59 = vshrl.u32 %v488_v55, 16  ;;  %v598_v60 = vshll.u32 %v488_v55, 16 }
  0x38   : > { %381 = vst.msk [vmem:[#allocation3] sm:$0xf] %vm280_vm0, %v6422_v0  ;;  %382 = vst.msk [vmem:[#allocation3 + $0x4] sm:$0xf] %vm280_vm0, %v6422_v0  ;;  %v487_v61 = vld [vmem:[%s6888_s8 + $0x18] sm:$0xf] }
  0x39   : > { %383 = vst.msk [vmem:[#allocation3 + $0x8] sm:$0xf] %vm280_vm0, %v6422_v0  ;;  %384 = vst.msk [vmem:[#allocation3 + $0xc] sm:$0xf] %vm280_vm0, %v6422_v0  ;;  %v591_v1 = vshll.u32 %v487_v61, 16  ;;  %v597_v4 = vrot.slane %v595_v59, 7 }
  0x3a   : > { %385 = vst.msk [vmem:[#allocation3 + $0x10] sm:$0xf] %vm280_vm0, %v6422_v0  ;;  %386 = vst.msk [vmem:[#allocation3 + $0x14] sm:$0xf] %vm280_vm0, %v6422_v0  ;;  %v1272_v2 = vld [vmem:[%s6888_s8 + $0x4c] sm:$0xf] }
  0x3b   : > { %387 = vst.msk [vmem:[#allocation3 + $0x18] sm:$0xf] %vm280_vm0, %v6422_v0  ;;  %388 = vst.msk [vmem:[#allocation3 + $0x1c] sm:$0xf] %vm280_vm0, %v6422_v0  ;;  %v490_v5 = vld [vmem:[%s6888_s8 + $0x24] sm:$0xf]  ;;  %v600_v10 = vor.u32 %v598_v60, %v597_v4  ;;  %1419 = vrot.lane.b32.xlu1 %v1272_v2, %s6423_s12 }
  0x3c   : > { %389 = vst.msk [vmem:[#allocation3 + $0x20] sm:$0xf] %vm280_vm0, %v6422_v0  ;;  %390 = vst.msk [vmem:[#allocation3 + $0x24] sm:$0xf] %vm280_vm0, %v6422_v0  ;;  %v1271_v6 = vld [vmem:[%s6888_s8 + $0x48] sm:$0xf] }
  0x3d   : > { %391 = vst.msk [vmem:[#allocation3 + $0x28] sm:$0xf] %vm280_vm0, %v6422_v0  ;;  %392 = vst.msk [vmem:[#allocation3 + $0x2c] sm:$0xf] %vm280_vm0, %v6422_v0  ;;  %v1082_v8 = vld [vmem:[#allocation2 + $0x48] sm:$0xf]  ;;  %1417 = vrot.lane.b32.xlu0 %v1271_v6, %s6423_s12 }
  0x3e   : > { %393 = vst.msk [vmem:[#allocation3 + $0x30] sm:$0xf] %vm280_vm0, %v6422_v0  ;;  %394 = vst.msk [vmem:[#allocation3 + $0x34] sm:$0xf] %vm280_vm0, %v6422_v0  ;;  %v1079_v11 = vld [vmem:[#allocation2 + $0x44] sm:$0xf] }
  0x3f   : > { %395 = vst.msk [vmem:[#allocation3 + $0x38] sm:$0xf] %vm280_vm0, %v6422_v0  ;;  %396 = vst.msk [vmem:[#allocation3 + $0x3c] sm:$0xf] %vm280_vm0, %v6422_v0  ;;  %v609_v12 = vshrl.u32 %v490_v5, 16  ;;  %v612_v15 = vshll.u32 %v490_v5, 16 }
  0x40   : > { %397 = vst.msk [vmem:[#allocation3 + $0x40] sm:$0xf] %vm280_vm0, %v6422_v0  ;;  %398 = vst.msk [vmem:[#allocation3 + $0x44] sm:$0xf] %vm280_vm0, %v6422_v0  ;;  %v489_v13 = vld [vmem:[%s6888_s8 + $0x20] sm:$0xf] }
  0x41   : > { %399 = vst.msk [vmem:[#allocation3 + $0x48] sm:$0xf] %vm280_vm0, %v6422_v0  ;;  %400 = vst.msk [vmem:[#allocation3 + $0x4c] sm:$0xf] %vm280_vm0, %v6422_v0  ;;  %v1274_v16 = vld [vmem:[%s6888_s8 + $0x54] sm:$0xf] }
  0x42   : > { %401 = vst.msk [vmem:[#allocation3 + $0x50] sm:$0xf] %vm280_vm0, %v6422_v0  ;;  %402 = vst.msk [vmem:[#allocation3 + $0x54] sm:$0xf] %vm280_vm0, %v6422_v0  ;;  %v611_v18 = vrot.slane %v609_v12, 7  ;;  %v602_v19 = vshrl.u32 %v489_v13, 16  ;;  %1423 = vrot.lane.b32.xlu1 %v1274_v16, %s6423_s12 }
  0x43   : > { %403 = vst.msk [vmem:[#allocation3 + $0x58] sm:$0xf] %vm280_vm0, %v6422_v0  ;;  %404 = vst.msk [vmem:[#allocation3 + $0x5c] sm:$0xf] %vm280_vm0, %v6422_v0  ;;  %v1088_v21 = vld [vmem:[#allocation2 + $0x58] sm:$0xf] }
  0x44   : > { %405 = vst.msk [vmem:[#allocation3 + $0x60] sm:$0xf] %vm280_vm0, %v6422_v0  ;;  %406 = vst.msk [vmem:[#allocation3 + $0x64] sm:$0xf] %vm280_vm0, %v6422_v0  ;;  %v605_v22 = vshll.u32 %v489_v13, 16  ;;  %v614_v25 = vor.u32 %v612_v15, %v611_v18  ;;  %v604_v26 = vrot.slane %v602_v19, 7 }
  0x45   : > { %407 = vst.msk [vmem:[#allocation3 + $0x68] sm:$0xf] %vm280_vm0, %v6422_v0  ;;  %408 = vst.msk [vmem:[#allocation3 + $0x6c] sm:$0xf] %vm280_vm0, %v6422_v0  ;;  %v492_v23 = vld [vmem:[%s6888_s8 + $0x2c] sm:$0xf] }
  0x46   : > { %409 = vst.msk [vmem:[#allocation3 + $0x70] sm:$0xf] %vm280_vm0, %v6422_v0  ;;  %410 = vst.msk [vmem:[#allocation3 + $0x74] sm:$0xf] %vm280_vm0, %v6422_v0  ;;  %v491_v27 = vld [vmem:[%s6888_s8 + $0x28] sm:$0xf]  ;;  %v607_v31 = vor.u32 %v605_v22, %v604_v26 }
  0x47   : > { %411 = vst.msk [vmem:[#allocation3 + $0x78] sm:$0xf] %vm280_vm0, %v6422_v0  ;;  %412 = vst.msk [vmem:[#allocation3 + $0x7c] sm:$0xf] %vm280_vm0, %v6422_v0  ;;  %v1085_v28 = vld [vmem:[#allocation2 + $0x54] sm:$0xf] }
  0x48   : > { %413 = vst.msk [vmem:[#allocation3 + $0x80] sm:$0xf] %vm280_vm0, %v6422_v0  ;;  %414 = vst.msk [vmem:[#allocation3 + $0x84] sm:$0xf] %vm280_vm0, %v6422_v0  ;;  %v623_v32 = vshrl.u32 %v492_v23, 16  ;;  %v626_v33 = vshll.u32 %v492_v23, 16 }
  0x49   : > { %415 = vst.msk [vmem:[#allocation3 + $0x88] sm:$0xf] %vm280_vm0, %v6422_v0  ;;  %416 = vst.msk [vmem:[#allocation3 + $0x8c] sm:$0xf] %vm280_vm0, %v6422_v0  ;;  %v616_v34 = vshrl.u32 %v491_v27, 16  ;;  %v619_v39 = vshll.u32 %v491_v27, 16 }
  0x4a   : > { %417 = vst.msk [vmem:[#allocation3 + $0x90] sm:$0xf] %vm280_vm0, %v6422_v0  ;;  %418 = vst.msk [vmem:[#allocation3 + $0x94] sm:$0xf] %vm280_vm0, %v6422_v0  ;;  %v625_v38 = vrot.slane %v623_v32, 7 }
  0x4b   : > { %419 = vst.msk [vmem:[#allocation3 + $0x98] sm:$0xf] %vm280_vm0, %v6422_v0  ;;  %420 = vst.msk [vmem:[#allocation3 + $0x9c] sm:$0xf] %vm280_vm0, %v6422_v0  ;;  %v618_v41 = vrot.slane %v616_v34, 7 }
  0x4c   : > { %421 = vst.msk [vmem:[#allocation3 + $0xa0] sm:$0xf] %vm280_vm0, %v6422_v0  ;;  %422 = vst.msk [vmem:[#allocation3 + $0xa4] sm:$0xf] %vm280_vm0, %v6422_v0  ;;  %v494_v42 = vld [vmem:[%s6888_s8 + $0x34] sm:$0xf]  ;;  %v628_v43 = vor.u32 %v626_v33, %v625_v38 }
  0x4d   : > { %423 = vst.msk [vmem:[#allocation3 + $0xa8] sm:$0xf] %vm280_vm0, %v6422_v0  ;;  %424 = vst.msk [vmem:[#allocation3 + $0xac] sm:$0xf] %vm280_vm0, %v6422_v0  ;;  %v1091_v44 = vld [vmem:[#allocation2 + $0x5c] sm:$0xf]  ;;  %v621_v46 = vor.u32 %v619_v39, %v618_v41 }
  0x4e   : > { %425 = vst.msk [vmem:[#allocation3 + $0xb0] sm:$0xf] %vm280_vm0, %v6422_v0  ;;  %426 = vst.msk [vmem:[#allocation3 + $0xb4] sm:$0xf] %vm280_vm0, %v6422_v0  ;;  %v493_v45 = vld [vmem:[%s6888_s8 + $0x30] sm:$0xf] }
  0x4f   : > { %427 = vst.msk [vmem:[#allocation3 + $0xb8] sm:$0xf] %vm280_vm0, %v6422_v0  ;;  %428 = vst.msk [vmem:[#allocation3 + $0xbc] sm:$0xf] %vm280_vm0, %v6422_v0  ;;  %v633_v55 = vshll.u32 %v493_v45, 16 }
  0x50   : > { %429 = vst.msk [vmem:[#allocation3 + $0xc0] sm:$0xf] %vm280_vm0, %v6422_v0  ;;  %430 = vst.msk [vmem:[#allocation3 + $0xc4] sm:$0xf] %vm280_vm0, %v6422_v0  ;;  %v495_v59 = vld [vmem:[%s6888_s8 + $0x38] sm:$0xf] }
  0x51   : > { %431 = vst.msk [vmem:[#allocation3 + $0xc8] sm:$0xf] %vm280_vm0, %v6422_v0  ;;  %432 = vst.msk [vmem:[#allocation3 + $0xcc] sm:$0xf] %vm280_vm0, %v6422_v0  ;;  %v1280_v60 = vld [vmem:[%s6888_s8 + $0x6c] sm:$0xf] }
  0x52   : > { %433 = vst.msk [vmem:[#allocation3 + $0xd0] sm:$0xf] %vm280_vm0, %v6422_v0  ;;  %434 = vst.msk [vmem:[#allocation3 + $0xd4] sm:$0xf] %vm280_vm0, %v6422_v0  ;;  %v644_v4 = vshrl.u32 %v495_v59, 16 }
  0x53   : > { %435 = vst.msk [vmem:[#allocation3 + $0xd8] sm:$0xf] %vm280_vm0, %v6422_v0  ;;  %436 = vst.msk [vmem:[#allocation3 + $0xdc] sm:$0xf] %vm280_vm0, %v6422_v0  ;;  %v1282_v5 = vld [vmem:[%s6888_s8 + $0x74] sm:$0xf] }
  0x54   : > { %437 = vst.msk [vmem:[#allocation3 + $0xe0] sm:$0xf] %vm280_vm0, %v6422_v0  ;;  %438 = vst.msk [vmem:[#allocation3 + $0xe4] sm:$0xf] %vm280_vm0, %v6422_v0  ;;  %v1281_v6 = vld [vmem:[%s6888_s8 + $0x70] sm:$0xf] }
  0x55   : > { %439 = vst.msk [vmem:[#allocation3 + $0xe8] sm:$0xf] %vm280_vm0, %v6422_v0  ;;  %440 = vst.msk [vmem:[#allocation3 + $0xec] sm:$0xf] %vm280_vm0, %v6422_v0  ;;  %v498_v12 = vld [vmem:[%s6888_s8 + $0x44] sm:$0xf] }
  0x56   : > { %441 = vst.msk [vmem:[#allocation3 + $0xf0] sm:$0xf] %vm280_vm0, %v6422_v0  ;;  %442 = vst.msk [vmem:[#allocation3 + $0xf4] sm:$0xf] %vm280_vm0, %v6422_v0  ;;  %v497_v15 = vld [vmem:[%s6888_s8 + $0x40] sm:$0xf] }
  0x57   : > { %443 = vst.msk [vmem:[#allocation3 + $0xf8] sm:$0xf] %vm280_vm0, %v6422_v0  ;;  %444 = vst.msk [vmem:[#allocation3 + $0xfc] sm:$0xf] %vm280_vm0, %v6422_v0  ;;  %v665_v18 = vshrl.u32 %v498_v12, 16  ;;  %v668_v22 = vshll.u32 %v498_v12, 16 }
  0x58   : > { %445 = vst.msk [vmem:[#allocation3 + $0x100] sm:$0xf] %vm280_vm0, %v6422_v0  ;;  %446 = vst.msk [vmem:[#allocation3 + $0x104] sm:$0xf] %vm280_vm0, %v6422_v0  ;;  %v1284_v19 = vld [vmem:[%s6888_s8 + $0x7c] sm:$0xf] }
  0x59   : > { %447 = vst.msk [vmem:[#allocation3 + $0x108] sm:$0xf] %vm280_vm0, %v6422_v0  ;;  %448 = vst.msk [vmem:[#allocation3 + $0x10c] sm:$0xf] %vm280_vm0, %v6422_v0  ;;  %v658_v23 = vshrl.u32 %v497_v15, 16 }
  0x5a   : > { %449 = vst.msk [vmem:[#allocation3 + $0x110] sm:$0xf] %vm280_vm0, %v6422_v0  ;;  %450 = vst.msk [vmem:[#allocation3 + $0x114] sm:$0xf] %vm280_vm0, %v6422_v0  ;;  %v500_v26 = vld [vmem:[%s6888_s8 + $0x4c] sm:$0xf] }
  0x5b   : > { %451 = vst.msk [vmem:[#allocation3 + $0x118] sm:$0xf] %vm280_vm0, %v6422_v0  ;;  %452 = vst.msk [vmem:[#allocation3 + $0x11c] sm:$0xf] %vm280_vm0, %v6422_v0  ;;  %v1112_v27 = vld [vmem:[#allocation2 + $0x80] sm:$0xf] }
  0x5c   : > { %453 = vst.msk [vmem:[#allocation3 + $0x120] sm:$0xf] %vm280_vm0, %v6422_v0  ;;  %454 = vst.msk [vmem:[#allocation3 + $0x124] sm:$0xf] %vm280_vm0, %v6422_v0  ;;  %v1109_v32 = vld [vmem:[#allocation2 + $0x7c] sm:$0xf] }
  0x5d   : > { %455 = vst.msk [vmem:[#allocation3 + $0x128] sm:$0xf] %vm280_vm0, %v6422_v0  ;;  %456 = vst.msk [vmem:[#allocation3 + $0x12c] sm:$0xf] %vm280_vm0, %v6422_v0  ;;  %v1286_v33 = vld [vmem:[%s6888_s8 + $0x84] sm:$0xf] }
  0x5e   : > { %457 = vst.msk [vmem:[#allocation3 + $0x130] sm:$0xf] %vm280_vm0, %v6422_v0  ;;  %458 = vst.msk [vmem:[#allocation3 + $0x134] sm:$0xf] %vm280_vm0, %v6422_v0  ;;  %v1285_v34 = vld [vmem:[%s6888_s8 + $0x80] sm:$0xf] }
  0x5f   : > { %459 = vst.msk [vmem:[#allocation3 + $0x138] sm:$0xf] %vm280_vm0, %v6422_v0  ;;  %460 = vst.msk [vmem:[#allocation3 + $0x13c] sm:$0xf] %vm280_vm0, %v6422_v0  ;;  %v682_v38 = vshll.u32 %v500_v26, 16 }
  0x60   : > { %461 = vst.msk [vmem:[#allocation3 + $0x140] sm:$0xf] %vm280_vm0, %v6422_v0  ;;  %462 = vst.msk [vmem:[#allocation3 + $0x144] sm:$0xf] %vm280_vm0, %v6422_v0  ;;  %v1639_v41 = vld [vmem:[%s6888_s8 + $0x4] sm:$0xf] }
  0x61   : > { %463 = vst.msk [vmem:[#allocation3 + $0x148] sm:$0xf] %vm280_vm0, %v6422_v0  ;;  %464 = vst.msk [vmem:[#allocation3 + $0x14c] sm:$0xf] %vm280_vm0, %v6422_v0 }
  0x62   : > { %465 = vst.msk [vmem:[#allocation3 + $0x150] sm:$0xf] %vm280_vm0, %v6422_v0  ;;  %466 = vst.msk [vmem:[#allocation3 + $0x154] sm:$0xf] %vm280_vm0, %v6422_v0 }
  0x63   : > { %467 = vst.msk [vmem:[#allocation3 + $0x158] sm:$0xf] %vm280_vm0, %v6422_v0  ;;  %468 = vst.msk [vmem:[#allocation3 + $0x15c] sm:$0xf] %vm280_vm0, %v6422_v0 }
  0x64   : > { %469 = vst.msk [vmem:[#allocation3 + $0x160] sm:$0xf] %vm280_vm0, %v6422_v0  ;;  %470 = vst.msk [vmem:[#allocation3 + $0x164] sm:$0xf] %vm280_vm0, %v6422_v0 }
  0x65   : > { %471 = vst.msk [vmem:[#allocation3 + $0x168] sm:$0xf] %vm280_vm0, %v6422_v0  ;;  %472 = vst.msk [vmem:[#allocation3 + $0x16c] sm:$0xf] %vm280_vm0, %v6422_v0 }
  0x66   : > { %473 = vst.msk [vmem:[#allocation3 + $0x170] sm:$0xf] %vm280_vm0, %v6422_v0  ;;  %474 = vst.msk [vmem:[#allocation3 + $0x174] sm:$0xf] %vm280_vm0, %v6422_v0 }
  0x67   : > { %475 = vst.msk [vmem:[#allocation3 + $0x178] sm:$0xf] %vm280_vm0, %v6422_v0  ;;  %476 = vst.msk [vmem:[#allocation3 + $0x17c] sm:$0xf] %vm280_vm0, %v6422_v0 }
  0x68   : > { %477 = vst.msk [vmem:[#allocation3 + $0x180] sm:$0xf] %vm280_vm0, %v6422_v0  ;;  %478 = vst.msk [vmem:[#allocation3 + $0x184] sm:$0xf] %vm280_vm0, %v6422_v0 }
  0x69   : > { %479 = vst.msk [vmem:[#allocation3 + $0x188] sm:$0xf] %vm280_vm0, %v6422_v0  ;;  %480 = vst.msk [vmem:[#allocation3 + $0x18c] sm:$0xf] %vm280_vm0, %v6422_v0  ;;  %v588_v0 = vshrl.u32 %v487_v61, 16 }
  0x6a   : > { %vm6930_vm3 = vmand %vm1058_vm1, %vm1059_vm2  ;;  %v1279_v61 = vld [vmem:[%s6888_s8 + $0x68] sm:$0xf] }
  0x6b   : > { %v1068_v47 = vsel %vm6930_vm3, %v565_v35, %v1067_v24  ;;  %v1062_v48 = vsel %vm6930_vm3, %v551_v36, %v1061_v30  ;;  %v1071_v56 = vsel %vm6930_vm3, %v572_v49, %v1070_v40  ;;  %v1065_v62 = vsel %vm6930_vm3, %v558_v52, %v1064_v50  ;;  %v1273_v24 = vld [vmem:[%s6888_s8 + $0x50] sm:$0xf]  ;;  %v1276_v35 = vld [vmem:[%s6888_s8 + $0x5c] sm:$0xf]  ;;  %v1275_v36 = vld [vmem:[%s6888_s8 + $0x58] sm:$0xf] }
  0x6c   : > { %1069 = vst [vmem:[#allocation2 + $0x34] sm:$0xf] %v1068_v47  ;;  %1063 = vst [vmem:[#allocation2 + $0x2c] sm:$0xf] %v1062_v48  ;;  %v1077_v3 = vsel %vm6930_vm3, %v586_v57, %v1076_v53  ;;  %v1074_v7 = vsel %vm6930_vm3, %v579_v63, %v1073_v58  ;;  %v590_v9 = vrot.slane %v588_v0, 7  ;;  %v1083_v17 = vsel %vm6930_vm3, %v600_v10, %v1082_v8 }
  0x6d   : > { %1072 = vst [vmem:[#allocation2 + $0x38] sm:$0xf] %v1071_v56  ;;  %1066 = vst [vmem:[#allocation2 + $0x30] sm:$0xf] %v1065_v62  ;;  %v1089_v30 = vsel %vm6930_vm3, %v614_v25, %v1088_v21  ;;  %1421 = vrot.lane.b32.xlu0 %v1273_v24, %s6423_s12  ;;  %v1086_v37 = vsel %vm6930_vm3, %v607_v31, %v1085_v28  ;;  %v1094_v40 = vld [vmem:[#allocation2 + $0x60] sm:$0xf]  ;;  %1427 = vrot.lane.b32.xlu1 %v1276_v35, %s6423_s12 }
  0x6e   : > { %1078 = vst [vmem:[#allocation2 + $0x40] sm:$0xf] %v1077_v3  ;;  %1075 = vst [vmem:[#allocation2 + $0x3c] sm:$0xf] %v1074_v7  ;;  %v593_v14 = vor.u32 %v591_v1, %v590_v9  ;;  %v1278_v47 = vld [vmem:[%s6888_s8 + $0x64] sm:$0xf]  ;;  %v1095_v49 = vsel %vm6930_vm3, %v628_v43, %v1094_v40  ;;  %v1092_v51 = vsel %vm6930_vm3, %v621_v46, %v1091_v44 }
  0x6f   : > { %1084 = vst [vmem:[#allocation2 + $0x48] sm:$0xf] %v1083_v17  ;;  %1090 = vst [vmem:[#allocation2 + $0x58] sm:$0xf] %v1089_v30  ;;  %v1277_v48 = vld [vmem:[%s6888_s8 + $0x60] sm:$0xf] }
  0x70   : > { %v1080_v20 = vsel %vm6930_vm3, %v593_v14, %v1079_v11  ;;  %1087 = vst [vmem:[#allocation2 + $0x54] sm:$0xf] %v1086_v37  ;;  %v637_v50 = vshrl.u32 %v494_v42, 16  ;;  %1096 = vst [vmem:[#allocation2 + $0x60] sm:$0xf] %v1095_v49  ;;  %v640_v52 = vshll.u32 %v494_v42, 16 }
  0x71   : > { %1081 = vst [vmem:[#allocation2 + $0x44] sm:$0xf] %v1080_v20  ;;  %1425 = vrot.lane.b32.xlu0 %v1275_v36, %s6423_s12  ;;  %v630_v53 = vshrl.u32 %v493_v45, 16  ;;  %1093 = vst [vmem:[#allocation2 + $0x5c] sm:$0xf] %v1092_v51  ;;  %1431 = vrot.lane.b32.xlu1 %v1278_v47, %s6423_s12  ;;  %v647_v9 = vshll.u32 %v495_v59, 16 }
  0x72   : > { %v639_v54 = vrot.slane %v637_v50, 7  ;;  %v496_v56 = vld [vmem:[%s6888_s8 + $0x3c] sm:$0xf]  ;;  %v1100_v57 = vld [vmem:[#allocation2 + $0x68] sm:$0xf]  ;;  %v646_v11 = vrot.slane %v644_v4, 7  ;;  %vm7650_vm7 = vmand %vm2470_vm5, %vm2471_vm6 }
  0x73   : > { %v632_v58 = vrot.slane %v630_v53, 7  ;;  %v1097_v63 = vld [vmem:[#allocation2 + $0x64] sm:$0xf]  ;;  %v651_v1 = vshrl.u32 %v496_v56, 16  ;;  %v654_v3 = vshll.u32 %v496_v56, 16  ;;  %v667_v24 = vrot.slane %v665_v18, 7 }
  0x74   : > { %v642_v62 = vor.u32 %v640_v52, %v639_v54  ;;  %v1106_v10 = vld [vmem:[#allocation2 + $0x70] sm:$0xf]  ;;  %v1103_v14 = vld [vmem:[#allocation2 + $0x6c] sm:$0xf]  ;;  %v649_v16 = vor.u32 %v647_v9, %v646_v11  ;;  %v1283_v20 = vld [vmem:[%s6888_s8 + $0x78] sm:$0xf] }
  0x75   : > { %1429 = vrot.lane.b32.xlu0 %v1277_v48, %s6423_s12  ;;  %v635_v0 = vor.u32 %v633_v55, %v632_v58  ;;  %1435 = vrot.lane.b32.xlu1 %v1280_v60, %s6423_s12  ;;  %v653_v8 = vrot.slane %v651_v1, 7  ;;  %v661_v25 = vshll.u32 %v497_v15, 16  ;;  %v660_v28 = vrot.slane %v658_v23, 7  ;;  %v499_v30 = vld [vmem:[%s6888_s8 + $0x48] sm:$0xf] }
  0x76   : > { %v1101_v2 = vsel %vm6930_vm3, %v642_v62, %v1100_v57  ;;  %v1104_v21 = vsel %vm6930_vm3, %v649_v16, %v1103_v14  ;;  %v670_v31 = vor.u32 %v668_v22, %v667_v24  ;;  %v679_v36 = vshrl.u32 %v500_v26, 16  ;;  %v1288_v40 = vld [vmem:[%s6888_s8 + $0x8c] sm:$0xf]  ;;  %v7024_v42 = vld [vmem:[%s6888_s8] sm:$0xf] }
  0x77   : > { %1102 = vst [vmem:[#allocation2 + $0x68] sm:$0xf] %v1101_v2  ;;  %v1098_v7 = vsel %vm6930_vm3, %v635_v0, %v1097_v63  ;;  %v656_v13 = vor.u32 %v654_v3, %v653_v8  ;;  %1105 = vst [vmem:[#allocation2 + $0x6c] sm:$0xf] %v1104_v21  ;;  %v663_v35 = vor.u32 %v661_v25, %v660_v28  ;;  %v672_v39 = vshrl.u32 %v499_v30, 16 }
  0x78   : > { %1099 = vst [vmem:[#allocation2 + $0x64] sm:$0xf] %v1098_v7  ;;  %v1113_v37 = vsel %vm6930_vm3, %v670_v31, %v1112_v27  ;;  %v681_v44 = vrot.slane %v679_v36, 7  ;;  %v675_v45 = vshll.u32 %v499_v30, 16  ;;  %v1118_v46 = vld [vmem:[#allocation2 + $0x88] sm:$0xf] }
  0x79   : > { %1433 = vrot.lane.b32.xlu0 %v1279_v61, %s6423_s12  ;;  %1439 = vrot.lane.b32.xlu1 %v1282_v5, %s6423_s12  ;;  %v1107_v17 = vsel %vm6930_vm3, %v656_v13, %v1106_v10  ;;  %1114 = vst [vmem:[#allocation2 + $0x80] sm:$0xf] %v1113_v37  ;;  %v1110_v43 = vsel %vm6930_vm3, %v663_v35, %v1109_v32  ;;  %v674_v47 = vrot.slane %v672_v39, 7  ;;  %v502_v48 = vld [vmem:[%s6888_s8 + $0x54] sm:$0xf]  ;;  %v1712_v53 = vshrl.u32 %v1639_v41, 16 }
  0x7a   : > { %1108 = vst [vmem:[#allocation2 + $0x70] sm:$0xf] %v1107_v17  ;;  %1111 = vst [vmem:[#allocation2 + $0x7c] sm:$0xf] %v1110_v43  ;;  %v1287_v49 = vld [vmem:[%s6888_s8 + $0x88] sm:$0xf]  ;;  %v684_v50 = vor.u32 %v682_v38, %v681_v44 }
  0x7b   : > { %v1115_v51 = vld [vmem:[#allocation2 + $0x84] sm:$0xf]  ;;  %v501_v52 = vld [vmem:[%s6888_s8 + $0x50] sm:$0xf]  ;;  %v677_v54 = vor.u32 %v675_v45, %v674_v47  ;;  %v1290_v55 = vld [vmem:[%s6888_s8 + $0x94] sm:$0xf] }
  0x7c   : > { %v1289_v56 = vld [vmem:[%s6888_s8 + $0x90] sm:$0xf]  ;;  %v1715_v57 = vshll.u32 %v1639_v41, 16  ;;  %v1703_v58 = vshrl.u32 %v7024_v42, 16  ;;  %v1119_v59 = vsel %vm6930_vm3, %v684_v50, %v1118_v46  ;;  %v693_v60 = vshrl.u32 %v502_v48, 16 }
  0x7d   : > { %1437 = vrot.lane.b32.xlu0 %v1281_v6, %s6423_s12  ;;  %1443 = vrot.lane.b32.xlu1 %v1284_v19, %s6423_s12  ;;  %v1706_v61 = vshll.u32 %v7024_v42, 16  ;;  %v1641_v62 = vld [vmem:[%s6888_s8 + $0xc] sm:$0xf]  ;;  %1120 = vst [vmem:[#allocation2 + $0x88] sm:$0xf] %v1119_v59  ;;  %v1116_v63 = vsel %vm6930_vm3, %v677_v54, %v1115_v51  ;;  %v696_v0 = vshll.u32 %v502_v48, 16 }
  0x7e   : > { %v686_v1 = vshrl.u32 %v501_v52, 16  ;;  %v1640_v2 = vld [vmem:[%s6888_s8 + $0x8] sm:$0xf]  ;;  %1117 = vst [vmem:[#allocation2 + $0x84] sm:$0xf] %v1116_v63  ;;  %v695_v3 = vrot.slane %v693_v60, 7 }
  0x7f   : > { %v689_v4 = vshll.u32 %v501_v52, 16  ;;  %v504_v5 = vld [vmem:[%s6888_s8 + $0x5c] sm:$0xf]  ;;  %v7046_v6 = vrot.slane %v1712_v53, 4  ;;  %v1124_v7 = vld [vmem:[#allocation2 + $0x90] sm:$0xf] }
  0x80   : > { %v688_v8 = vrot.slane %v686_v1, 7  ;;  %v503_v9 = vld [vmem:[%s6888_s8 + $0x58] sm:$0xf]  ;;  %v7049_v10 = vrot.slane %v1715_v57, 5  ;;  %v7051_v11 = vrot.slane %v1703_v58, 4  ;;  %v1730_v12 = vshrl.u32 %v1641_v62, 16 }
  0x81   : > { %1441 = vrot.lane.b32.xlu0 %v1283_v20, %s6423_s12  ;;  %1447 = vrot.lane.b32.xlu1 %v1286_v33, %s6423_s12  ;;  %v698_v13 = vor.u32 %v696_v0, %v695_v3  ;;  %v1121_v14 = vld [vmem:[#allocation2 + $0x8c] sm:$0xf]  ;;  %v1292_v15 = vld [vmem:[%s6888_s8 + $0x9c] sm:$0xf]  ;;  %v1733_v16 = vshll.u32 %v1641_v62, 16  ;;  %v1721_v17 = vshrl.u32 %v1640_v2, 16 }
  0x82   : > { %v691_v18 = vor.u32 %v689_v4, %v688_v8  ;;  %v707_v19 = vshrl.u32 %v504_v5, 16  ;;  %v1291_v20 = vld [vmem:[%s6888_s8 + $0x98] sm:$0xf]  ;;  %v1724_v21 = vshll.u32 %v1640_v2, 16  ;;  %v710_v23 = vshll.u32 %v504_v5, 16 }
  0x83   : > { %v1125_v22 = vsel %vm6930_vm3, %v698_v13, %v1124_v7  ;;  %v700_v24 = vshrl.u32 %v503_v9, 16  ;;  %v1643_v25 = vld [vmem:[%s6888_s8 + $0x14] sm:$0xf]  ;;  %v1642_v26 = vld [vmem:[%s6888_s8 + $0x10] sm:$0xf]  ;;  %v703_v30 = vshll.u32 %v503_v9, 16 }
  0x84   : > { %1126 = vst [vmem:[#allocation2 + $0x90] sm:$0xf] %v1125_v22  ;;  %v1122_v27 = vsel %vm6930_vm3, %v691_v18, %v1121_v14  ;;  %v709_v28 = vrot.slane %v707_v19, 7  ;;  %v1294_v31 = vld [vmem:[%s6888_s8 + $0xa4] sm:$0xf]  ;;  %v7064_v32 = vrot.slane %v1706_v61, 5 }
  0x85   : > { %1445 = vrot.lane.b32.xlu0 %v1285_v34, %s6423_s12  ;;  %1451 = vrot.lane.b32.xlu1 %v1288_v40, %s6423_s12  ;;  %1123 = vst [vmem:[#allocation2 + $0x8c] sm:$0xf] %v1122_v27  ;;  %v1130_v33 = vld [vmem:[#allocation2 + $0x98] sm:$0xf]  ;;  %v702_v34 = vrot.slane %v700_v24, 7  ;;  %v7069_v36 = vrot.slane %v1730_v12, 4 }
  0x86   : > { %v506_v35 = vld [vmem:[%s6888_s8 + $0x64] sm:$0xf]  ;;  %v7071_v37 = vrot.slane %v1733_v16, 5  ;;  %v712_v38 = vor.u32 %v710_v23, %v709_v28  ;;  %v1127_v39 = vld [vmem:[#allocation2 + $0x94] sm:$0xf]  ;;  %v1723_v42 = vrot.slane %v1721_v17, 4  ;;  %v1709_v61 = vor.u32 %v7064_v32, %v7051_v11 }
  0x87   : > { %v505_v40 = vld [vmem:[%s6888_s8 + $0x60] sm:$0xf]  ;;  %v1726_v43 = vrot.slane %v1724_v21, 5  ;;  %v1748_v44 = vshrl.u32 %v1643_v25, 16  ;;  %v705_v45 = vor.u32 %v703_v30, %v702_v34  ;;  %v1751_v46 = vshll.u32 %v1643_v25, 16 }
  0x88   : > { %v1293_v41 = vld [vmem:[%s6888_s8 + $0xa0] sm:$0xf]  ;;  %v1739_v47 = vshrl.u32 %v1642_v26, 16  ;;  %v1131_v48 = vsel %vm6930_vm3, %v712_v38, %v1130_v33  ;;  %v1296_v50 = vld [vmem:[%s6888_s8 + $0xac] sm:$0xf]  ;;  %v1742_v52 = vshll.u32 %v1642_v26, 16  ;;  %v1736_v62 = vor.u32 %v7071_v37, %v7069_v36 }
  0x89   : > { %1449 = vrot.lane.b32.xlu0 %v1287_v49, %s6423_s12  ;;  %1455 = vrot.lane.b32.xlu1 %v1290_v55, %s6423_s12  ;;  %v721_v49 = vshrl.u32 %v506_v35, 16  ;;  %v1295_v51 = vld [vmem:[%s6888_s8 + $0xa8] sm:$0xf]  ;;  %1132 = vst [vmem:[#allocation2 + $0x98] sm:$0xf] %v1131_v48  ;;  %v1128_v53 = vsel %vm6930_vm3, %v705_v45, %v1127_v39  ;;  %v724_v54 = vshll.u32 %v506_v35, 16  ;;  %v1727_v63 = vor.u32 %v1726_v43, %v1723_v42 }
  0x8a   : > { %v714_v55 = vshrl.u32 %v505_v40, 16  ;;  %v1645_v57 = vld [vmem:[%s6888_s8 + $0x1c] sm:$0xf]  ;;  %1129 = vst [vmem:[#allocation2 + $0x94] sm:$0xf] %v1128_v53  ;;  %v717_v59 = vshll.u32 %v505_v40, 16 }
  0x8b   : > { %v723_v58 = vrot.slane %v721_v49, 7  ;;  %v508_v60 = vld [vmem:[%s6888_s8 + $0x6c] sm:$0xf]  ;;  %v1136_v0 = vld [vmem:[#allocation2 + $0xa8] sm:$0xf]  ;;  %v1750_v3 = vrot.slane %v1748_v44, 4 }
  0x8c   : > { %v716_v1 = vrot.slane %v714_v55, 7  ;;  %v507_v2 = vld [vmem:[%s6888_s8 + $0x68] sm:$0xf]  ;;  %v1753_v4 = vrot.slane %v1751_v46, 5  ;;  %v1741_v5 = vrot.slane %v1739_v47, 4  ;;  %v1744_v9 = vrot.slane %v1742_v52, 5 }
  0x8d   : > { %1453 = vrot.lane.b32.xlu0 %v1289_v56, %s6423_s12  ;;  %1459 = vrot.lane.b32.xlu1 %v1292_v15, %s6423_s12  ;;  %v1718_v56 = vor.u32 %v7049_v10, %v7046_v6  ;;  %v726_v6 = vor.u32 %v724_v54, %v723_v58  ;;  %v1133_v7 = vld [vmem:[#allocation2 + $0xa4] sm:$0xf]  ;;  %v1298_v8 = vld [vmem:[%s6888_s8 + $0xb4] sm:$0xf]  ;;  %v1766_v10 = vshrl.u32 %v1645_v57, 16  ;;  %v735_v13 = vshrl.u32 %v508_v60, 16 }
  0x8e   : > { %v719_v12 = vor.u32 %v717_v59, %v716_v1  ;;  %v1297_v11 = vld [vmem:[%s6888_s8 + $0xb0] sm:$0xf]  ;;  %v1769_v14 = vshll.u32 %v1645_v57, 16  ;;  %v738_v16 = vshll.u32 %v508_v60, 16  ;;  %v728_v17 = vshrl.u32 %v507_v2, 16 }
  0x8f   : > { %v1137_v15 = vsel %vm6930_vm3, %v726_v6, %v1136_v0  ;;  %v7098_v18 = vrot.slane %v1718_v56, 4  ;;  %v1644_v19 = vld [vmem:[%s6888_s8 + $0x18] sm:$0xf]  ;;  %v737_v21 = vrot.slane %v735_v13, 7  ;;  %v731_v22 = vshll.u32 %v507_v2, 16 }
  0x90   : > { %1138 = vst [vmem:[#allocation2 + $0xa8] sm:$0xf] %v1137_v15  ;;  %v7103_v23 = vrot.slane %v1709_v61, 4  ;;  %v1754_v24 = vor.u32 %v1753_v4, %v1750_v3  ;;  %v1142_v25 = vld [vmem:[#allocation2 + $0xb0] sm:$0xf]  ;;  %v730_v26 = vrot.slane %v728_v17, 7  ;;  %v1745_v35 = vor.u32 %v1744_v9, %v1741_v5 }
  0x91   : > { %1457 = vrot.lane.b32.xlu0 %v1291_v20, %s6423_s12  ;;  %1463 = vrot.lane.b32.xlu1 %v1294_v31, %s6423_s12  ;;  %v1134_v20 = vsel %vm6930_vm3, %v719_v12, %v1133_v7  ;;  %v510_v27 = vld [vmem:[%s6888_s8 + $0x74] sm:$0xf]  ;;  %v7106_v28 = vrot.slane %v1736_v62, 4  ;;  %v7108_v30 = vrot.slane %v1727_v63, 4  ;;  %v740_v31 = vor.u32 %v738_v16, %v737_v21  ;;  %v1139_v32 = vld [vmem:[#allocation2 + $0xac] sm:$0xf] }
  0x92   : > { %1135 = vst [vmem:[#allocation2 + $0xa4] sm:$0xf] %v1134_v20  ;;  %v509_v33 = vld [vmem:[%s6888_s8 + $0x70] sm:$0xf]  ;;  %v1300_v34 = vld [vmem:[%s6888_s8 + $0xbc] sm:$0xf]  ;;  %v733_v38 = vor.u32 %v731_v22, %v730_v26 }
  0x93   : > { %v1768_v36 = vrot.slane %v1766_v10, 4  ;;  %v1771_v37 = vrot.slane %v1769_v14, 5  ;;  %v1299_v39 = vld [vmem:[%s6888_s8 + $0xb8] sm:$0xf]  ;;  %v1757_v40 = vshrl.u32 %v1644_v19, 16  ;;  %v1143_v42 = vsel %vm6930_vm3, %v740_v31, %v1142_v25 }
  0x94   : > { %v749_v43 = vshrl.u32 %v510_v27, 16  ;;  %v7117_v44 = vrot.slane %v1754_v24, 4  ;;  %v1647_v45 = vld [vmem:[%s6888_s8 + $0x24] sm:$0xf]  ;;  %1144 = vst [vmem:[#allocation2 + $0xb0] sm:$0xf] %v1143_v42  ;;  %v1140_v46 = vsel %vm6930_vm3, %v733_v38, %v1139_v32 }
  0x95   : > { %1461 = vrot.lane.b32.xlu0 %v1293_v41, %s6423_s12  ;;  %1467 = vrot.lane.b32.xlu1 %v1296_v50, %s6423_s12  ;;  %v1760_v41 = vshll.u32 %v1644_v19, 16  ;;  %v752_v47 = vshll.u32 %v510_v27, 16  ;;  %v742_v48 = vshrl.u32 %v509_v33, 16  ;;  %v1302_v49 = vld [vmem:[%s6888_s8 + $0xc4] sm:$0xf]  ;;  %v745_v53 = vshll.u32 %v509_v33, 16 }
  0x96   : > { %v1301_v50 = vld [vmem:[%s6888_s8 + $0xc0] sm:$0xf]  ;;  %1141 = vst [vmem:[#allocation2 + $0xac] sm:$0xf] %v1140_v46  ;;  %v751_v52 = vrot.slane %v749_v43, 7  ;;  %v7128_v55 = vrot.slane %v1745_v35, 4  ;;  %v1772_v56 = vor.u32 %v1771_v37, %v1768_v36 }
  0x97   : > { %v512_v54 = vld [vmem:[%s6888_s8 + $0x7c] sm:$0xf]  ;;  %v1148_v57 = vld [vmem:[#allocation2 + $0xb8] sm:$0xf]  ;;  %v744_v58 = vrot.slane %v742_v48, 7  ;;  %v1759_v60 = vrot.slane %v1757_v40, 4 }
  0x98   : > { %v511_v59 = vld [vmem:[%s6888_s8 + $0x78] sm:$0xf]  ;;  %v1762_v61 = vrot.slane %v1760_v41, 5  ;;  %v1784_v62 = vshrl.u32 %v1647_v45, 16  ;;  %v754_v63 = vor.u32 %v752_v47, %v751_v52  ;;  %v1145_v0 = vld [vmem:[#allocation2 + $0xb4] sm:$0xf] }
  0x99   : > { %1465 = vrot.lane.b32.xlu0 %v1295_v51, %s6423_s12  ;;  %1471 = vrot.lane.b32.xlu1 %v1298_v8, %s6423_s12  ;;  %v1646_v51 = vld [vmem:[%s6888_s8 + $0x20] sm:$0xf]  ;;  %v1787_v1 = vshll.u32 %v1647_v45, 16  ;;  %v747_v3 = vor.u32 %v745_v53, %v744_v58  ;;  %v763_v4 = vshrl.u32 %v512_v54, 16  ;;  %v1304_v5 = vld [vmem:[%s6888_s8 + $0xcc] sm:$0xf] }
  0x9a   : > { %v1775_v2 = vshrl.u32 %v1646_v51, 16  ;;  %v1303_v6 = vld [vmem:[%s6888_s8 + $0xc8] sm:$0xf]  ;;  %v1778_v7 = vshll.u32 %v1646_v51, 16  ;;  %v1649_v8 = vld [vmem:[%s6888_s8 + $0x2c] sm:$0xf]  ;;  %v1149_v9 = vsel %vm6930_vm3, %v754_v63, %v1148_v57  ;;  %v1763_v17 = vor.u32 %v1762_v61, %v1759_v60 }
  0x9b   : > { %v766_v10 = vshll.u32 %v512_v54, 16  ;;  %v756_v12 = vshrl.u32 %v511_v59, 16  ;;  %v7138_v13 = vrot.slane %v1772_v56, 4  ;;  %1150 = vst [vmem:[#allocation2 + $0xb8] sm:$0xf] %v1149_v9  ;;  %v1146_v14 = vsel %vm6930_vm3, %v747_v3, %v1145_v0 }
  0x9c   : > { %v765_v15 = vrot.slane %v763_v4, 7  ;;  %v759_v16 = vshll.u32 %v511_v59, 16  ;;  %v7143_v19 = vrot.slane %v1784_v62, 4  ;;  %1147 = vst [vmem:[#allocation2 + $0xb4] sm:$0xf] %v1146_v14  ;;  %v1789_v24 = vrot.slane %v1787_v1, 5 }
  0x9d   : > { %1469 = vrot.lane.b32.xlu0 %v1297_v11, %s6423_s12  ;;  %1475 = vrot.lane.b32.xlu1 %v1300_v34, %s6423_s12  ;;  %v1648_v11 = vld [vmem:[%s6888_s8 + $0x28] sm:$0xf]  ;;  %v1154_v20 = vld [vmem:[#allocation2 + $0xc0] sm:$0xf]  ;;  %v758_v21 = vrot.slane %v756_v12, 7  ;;  %v7146_v25 = vrot.slane %v1775_v2, 4 }
  0x9e   : > { %v514_v22 = vld [vmem:[%s6888_s8 + $0x84] sm:$0xf]  ;;  %v768_v26 = vor.u32 %v766_v10, %v765_v15  ;;  %v1151_v27 = vld [vmem:[#allocation2 + $0xbc] sm:$0xf]  ;;  %v513_v31 = vld [vmem:[%s6888_s8 + $0x80] sm:$0xf]  ;;  %v1790_v53 = vor.u32 %v1789_v24, %v7143_v19 }
  0x9f   : > { %v1306_v32 = vld [vmem:[%s6888_s8 + $0xd4] sm:$0xf]  ;;  %v1780_v33 = vrot.slane %v1778_v7, 5  ;;  %v1802_v34 = vshrl.u32 %v1649_v8, 16  ;;  %v1805_v35 = vshll.u32 %v1649_v8, 16  ;;  %v761_v36 = vor.u32 %v759_v16, %v758_v21 }
  0xa0   : > { %v1305_v37 = vld [vmem:[%s6888_s8 + $0xd0] sm:$0xf]  ;;  %v1793_v38 = vshrl.u32 %v1648_v11, 16  ;;  %v1155_v40 = vsel %vm6930_vm3, %v768_v26, %v1154_v20  ;;  %v777_v41 = vshrl.u32 %v514_v22, 16  ;;  %v7155_v42 = vrot.slane %v1763_v17, 4 }
  0xa1   : > { %1473 = vrot.lane.b32.xlu0 %v1299_v39, %s6423_s12  ;;  %1479 = vrot.lane.b32.xlu1 %v1302_v49, %s6423_s12  ;;  %v1796_v39 = vshll.u32 %v1648_v11, 16  ;;  %v1651_v43 = vld [vmem:[%s6888_s8 + $0x34] sm:$0xf]  ;;  %1156 = vst [vmem:[#allocation2 + $0xc0] sm:$0xf] %v1155_v40  ;;  %v1152_v45 = vsel %vm6930_vm3, %v761_v36, %v1151_v27  ;;  %v780_v46 = vshll.u32 %v514_v22, 16  ;;  %v1781_v54 = vor.u32 %v1780_v33, %v7146_v25 }
  0xa2   : > { %v770_v47 = vshrl.u32 %v513_v31, 16  ;;  %v1650_v48 = vld [vmem:[%s6888_s8 + $0x30] sm:$0xf]  ;;  %1153 = vst [vmem:[#allocation2 + $0xbc] sm:$0xf] %v1152_v45  ;;  %v779_v49 = vrot.slane %v777_v41, 7 }
  0xa3   : > { %v516_v51 = vld [vmem:[%s6888_s8 + $0x8c] sm:$0xf]  ;;  %v1308_v52 = vld [vmem:[%s6888_s8 + $0xdc] sm:$0xf]  ;;  %v7165_v56 = vrot.slane %v1802_v34, 4  ;;  %v1807_v60 = vrot.slane %v1805_v35, 5 }
  0xa4   : > { %v1160_v57 = vld [vmem:[#allocation2 + $0xd0] sm:$0xf]  ;;  %v772_v58 = vrot.slane %v770_v47, 7  ;;  %v515_v59 = vld [vmem:[%s6888_s8 + $0x88] sm:$0xf]  ;;  %v7170_v61 = vrot.slane %v1793_v38, 4  ;;  %v782_v63 = vor.u32 %v780_v46, %v779_v49 }
  0xa5   : > { %1477 = vrot.lane.b32.xlu0 %v1301_v50, %s6423_s12  ;;  %1483 = vrot.lane.b32.xlu1 %v1304_v5, %s6423_s12  ;;  %v773_v50 = vshll.u32 %v513_v31, 16  ;;  %v7172_v62 = vrot.slane %v1796_v39, 5  ;;  %v1157_v0 = vld [vmem:[#allocation2 + $0xcc] sm:$0xf]  ;;  %v1307_v1 = vld [vmem:[%s6888_s8 + $0xd8] sm:$0xf]  ;;  %v1808_v25 = vor.u32 %v1807_v60, %v7165_v56 }
  0xa6   : > { %v1820_v2 = vshrl.u32 %v1651_v43, 16  ;;  %v1823_v3 = vshll.u32 %v1651_v43, 16  ;;  %v791_v5 = vshrl.u32 %v516_v51, 16  ;;  %v1161_v7 = vsel %vm6930_vm3, %v782_v63, %v1160_v57  ;;  %v1310_v10 = vld [vmem:[%s6888_s8 + $0xe4] sm:$0xf] }
  0xa7   : > { %v775_v4 = vor.u32 %v773_v50, %v772_v58  ;;  %v794_v8 = vshll.u32 %v516_v51, 16  ;;  %v784_v9 = vshrl.u32 %v515_v59, 16  ;;  %v1309_v12 = vld [vmem:[%s6888_s8 + $0xe0] sm:$0xf]  ;;  %v1814_v11 = vshll.u32 %v1650_v48, 16 }
  0xa8   : > { %v1653_v14 = vld [vmem:[%s6888_s8 + $0x3c] sm:$0xf]  ;;  %1162 = vst [vmem:[#allocation2 + $0xd0] sm:$0xf] %v1161_v7  ;;  %v793_v16 = vrot.slane %v791_v5, 7  ;;  %v787_v17 = vshll.u32 %v515_v59, 16  ;;  %v1799_v26 = vor.u32 %v7172_v62, %v7170_v61 }
  0xa9   : > { %1481 = vrot.lane.b32.xlu0 %v1303_v6, %s6423_s12  ;;  %1487 = vrot.lane.b32.xlu1 %v1306_v32, %s6423_s12  ;;  %v1811_v6 = vshrl.u32 %v1650_v48, 16  ;;  %v1158_v15 = vsel %vm6930_vm3, %v775_v4, %v1157_v0  ;;  %v7184_v19 = vrot.slane %v1790_v53, 4  ;;  %v1166_v20 = vld [vmem:[#allocation2 + $0xd8] sm:$0xf]  ;;  %v786_v21 = vrot.slane %v784_v9, 7  ;;  %v1386_v53 = vpop.permute.xlu1 %1385 }
  0xaa   : > { %1159 = vst [vmem:[#allocation2 + $0xcc] sm:$0xf] %v1158_v15  ;;  %v518_v22 = vld [vmem:[%s6888_s8 + $0x94] sm:$0xf]  ;;  %v7187_v24 = vrot.slane %v1781_v54, 4  ;;  %v796_v27 = vor.u32 %v794_v8, %v793_v16  ;;  %v1822_v33 = vrot.slane %v1820_v2, 4  ;;  %v1382_v54 = vpop.permute.xlu0 %1381 }
  0xab   : > { %v1163_v31 = vld [vmem:[#allocation2 + $0xd4] sm:$0xf]  ;;  %v517_v32 = vld [vmem:[%s6888_s8 + $0x90] sm:$0xf]  ;;  %v1825_v34 = vrot.slane %v1823_v3, 5  ;;  %v7193_v35 = vrot.slane %v1811_v6, 4  ;;  %v789_v36 = vor.u32 %v787_v17, %v786_v21 }
  0xac   : > { %v1816_v38 = vrot.slane %v1814_v11, 5  ;;  %v1838_v39 = vshrl.u32 %v1653_v14, 16  ;;  %v1167_v40 = vsel %vm6930_vm3, %v796_v27, %v1166_v20  ;;  %v805_v41 = vshrl.u32 %v518_v22, 16  ;;  %v1311_v43 = vld [vmem:[%s6888_s8 + $0xe8] sm:$0xf] }
  0xad   : > { %1485 = vrot.lane.b32.xlu0 %v1305_v37, %s6423_s12  ;;  %1491 = vrot.lane.b32.xlu1 %v1308_v52, %s6423_s12  ;;  %v1312_v37 = vld [vmem:[%s6888_s8 + $0xec] sm:$0xf]  ;;  %v1841_v45 = vshll.u32 %v1653_v14, 16  ;;  %1168 = vst [vmem:[#allocation2 + $0xd8] sm:$0xf] %v1167_v40  ;;  %v1164_v46 = vsel %vm6930_vm3, %v789_v36, %v1163_v31  ;;  %v808_v47 = vshll.u32 %v518_v22, 16  ;;  %v1826_v61 = vor.u32 %v1825_v34, %v1822_v33 }
  0xae   : > { %v798_v48 = vshrl.u32 %v517_v32, 16  ;;  %v7204_v49 = vld [vmem:[%s6888_s8 + $0x38] sm:$0xf]  ;;  %1165 = vst [vmem:[#allocation2 + $0xd4] sm:$0xf] %v1164_v46  ;;  %v807_v50 = vrot.slane %v805_v41, 7  ;;  %v1817_v62 = vor.u32 %v1816_v38, %v7193_v35  ;;  %v1384_v11 = vpop.permute.xlu0 %1383 }
  0xaf   : > { %v801_v51 = vshll.u32 %v517_v32, 16  ;;  %v520_v52 = vld [vmem:[%s6888_s8 + $0x9c] sm:$0xf]  ;;  %v7207_v56 = vrot.slane %v1808_v25, 4  ;;  %v1172_v57 = vld [vmem:[#allocation2 + $0xe0] sm:$0xf] }
  0xb0   : > { %v800_v58 = vrot.slane %v798_v48, 7  ;;  %v519_v59 = vld [vmem:[%s6888_s8 + $0x98] sm:$0xf]  ;;  %1576 = vst.msk [vmem:[#allocation2 + $0x34] sm:$0xf] %vm1573_vm4, %v1386_v53  ;;  %v7212_v60 = vrot.slane %v1799_v26, 4  ;;  %v810_v63 = vor.u32 %v808_v47, %v807_v50 }
  0xb1   : > { %1489 = vrot.lane.b32.xlu0 %v1307_v1, %s6423_s12  ;;  %1495 = vrot.lane.b32.xlu1 %v1310_v10, %s6423_s12  ;;  %1574 = vst.msk [vmem:[#allocation2 + $0x2c] sm:$0xf] %vm1573_vm4, %v1382_v54  ;;  %v1169_v0 = vld [vmem:[#allocation2 + $0xdc] sm:$0xf]  ;;  %v1314_v1 = vld [vmem:[%s6888_s8 + $0xf4] sm:$0xf] }
  0xb2   : > { %v1840_v2 = vrot.slane %v1838_v39, 4  ;;  %v1843_v3 = vrot.slane %v1841_v45, 5  ;;  %v803_v4 = vor.u32 %v801_v51, %v800_v58  ;;  %v819_v5 = vshrl.u32 %v520_v52, 16  ;;  %v1313_v6 = vld [vmem:[%s6888_s8 + $0xf0] sm:$0xf]  ;;  %v1390_v45 = vpop.permute.xlu0 %1389 }
  0xb3   : > { %v1829_v7 = vshrl.u32 %v7204_v49, 16  ;;  %v1173_v8 = vsel %vm6930_vm3, %v810_v63, %v1172_v57  ;;  %v822_v9 = vshll.u32 %v520_v52, 16  ;;  %v812_v10 = vshrl.u32 %v519_v59, 16  ;;  %v1655_v14 = vld [vmem:[%s6888_s8 + $0x44] sm:$0xf] }
  0xb4   : > { %v1654_v15 = vld [vmem:[%s6888_s8 + $0x40] sm:$0xf]  ;;  %1174 = vst [vmem:[#allocation2 + $0xe0] sm:$0xf] %v1173_v8  ;;  %v1170_v16 = vsel %vm6930_vm3, %v803_v4, %v1169_v0  ;;  %v821_v17 = vrot.slane %v819_v5, 7  ;;  %v815_v20 = vshll.u32 %v519_v59, 16  ;;  %v1844_v32 = vor.u32 %v1843_v3, %v1840_v2 }
  0xb5   : > { %1493 = vrot.lane.b32.xlu0 %v1309_v12, %s6423_s12  ;;  %1499 = vrot.lane.b32.xlu1 %v1312_v37, %s6423_s12  ;;  %v1388_v12 = vpop.permute.xlu1 %1387  ;;  %1575 = vst.msk [vmem:[#allocation2 + $0x30] sm:$0xf] %vm1573_vm4, %v1384_v11  ;;  %v1316_v21 = vld [vmem:[%s6888_s8 + $0xfc] sm:$0xf]  ;;  %v7229_v22 = vrot.slane %v1826_v61, 4  ;;  %v814_v26 = vrot.slane %v812_v10, 7 }
  0xb6   : > { %1577 = vst.msk [vmem:[#allocation2 + $0x38] sm:$0xf] %vm1573_vm4, %v1388_v12  ;;  %1171 = vst [vmem:[#allocation2 + $0xdc] sm:$0xf] %v1170_v16  ;;  %v1178_v25 = vld [vmem:[#allocation2 + $0xe8] sm:$0xf]  ;;  %v824_v34 = vor.u32 %v822_v9, %v821_v17  ;;  %v1394_v4 = vpop.permute.xlu0 %1393 }
  0xb7   : > { %v522_v27 = vld [vmem:[%s6888_s8 + $0xa4] sm:$0xf]  ;;  %v7234_v31 = vrot.slane %v1817_v62, 4  ;;  %v1832_v33 = vshll.u32 %v7204_v49, 16  ;;  %v521_v36 = vld [vmem:[%s6888_s8 + $0xa0] sm:$0xf]  ;;  %v817_v41 = vor.u32 %v815_v20, %v814_v26 }
  0xb8   : > { %v1175_v35 = vld [vmem:[#allocation2 + $0xe4] sm:$0xf]  ;;  %v1315_v37 = vld [vmem:[%s6888_s8 + $0xf8] sm:$0xf]  ;;  %v7239_v38 = vrot.slane %v1829_v7, 4  ;;  %v1856_v39 = vshrl.u32 %v1655_v14, 16  ;;  %v1179_v48 = vsel %vm6930_vm3, %v824_v34, %v1178_v25 }
  0xb9   : > { %1497 = vrot.lane.b32.xlu0 %v1311_v43, %s6423_s12  ;;  %1503 = vrot.lane.b32.xlu1 %v1314_v1, %s6423_s12  ;;  %v1859_v40 = vshll.u32 %v1655_v14, 16  ;;  %v1392_v43 = vpop.permute.xlu1 %1391  ;;  %v1847_v46 = vshrl.u32 %v1654_v15, 16  ;;  %v1850_v47 = vshll.u32 %v1654_v15, 16  ;;  %v833_v50 = vshrl.u32 %v522_v27, 16  ;;  %1578 = vst.msk [vmem:[#allocation2 + $0x3c] sm:$0xf] %vm1573_vm4, %v1390_v45 }
  0xba   : > { %1579 = vst.msk [vmem:[#allocation2 + $0x40] sm:$0xf] %vm1573_vm4, %v1392_v43  ;;  %v7246_v49 = vld [vmem:[%s6888_s8 + $0x4c] sm:$0xf]  ;;  %v7249_v51 = vld [vmem:[%s6888_s8 + $0x48] sm:$0xf]  ;;  %v1176_v52 = vsel %vm6930_vm3, %v817_v41, %v1175_v35 }
  0xbb   : > { %1180 = vst [vmem:[#allocation2 + $0xe8] sm:$0xf] %v1179_v48  ;;  %v836_v53 = vshll.u32 %v522_v27, 16  ;;  %v826_v54 = vshrl.u32 %v521_v36, 16  ;;  %v7255_v57 = vrot.slane %v1844_v32, 4  ;;  %v7257_v58 = vrot.slane %v1832_v33, 5 }
  0xbc   : > { %1177 = vst [vmem:[#allocation2 + $0xe4] sm:$0xf] %v1176_v52  ;;  %v835_v59 = vrot.slane %v833_v50, 7  ;;  %v829_v61 = vshll.u32 %v521_v36, 16  ;;  %v524_v62 = vld [vmem:[%s6888_s8 + $0xac] sm:$0xf] }
  0xbd   : > { %1501 = vrot.lane.b32.xlu0 %v1313_v6, %s6423_s12  ;;  %1507 = vrot.lane.b32.xlu1 %v1316_v21, %s6423_s12  ;;  %v7260_v63 = vrot.slane %v1856_v39, 4  ;;  %v1184_v0 = vld [vmem:[#allocation2 + $0xf8] sm:$0xf]  ;;  %v828_v1 = vrot.slane %v826_v54, 7  ;;  %v523_v2 = vld [vmem:[%s6888_s8 + $0xa8] sm:$0xf]  ;;  %v1396_v3 = vpop.permute.xlu1 %1395  ;;  %v1835_v34 = vor.u32 %v7257_v58, %v7239_v38 }
  0xbe   : > { %v7263_v5 = vrot.slane %v1859_v40, 5  ;;  %v7265_v6 = vrot.slane %v1847_v46, 4  ;;  %v7267_v7 = vrot.slane %v1850_v47, 5  ;;  %v838_v8 = vor.u32 %v836_v53, %v835_v59  ;;  %v1181_v9 = vld [vmem:[#allocation2 + $0xf4] sm:$0xf] }
  0xbf   : > { %1581 = vst.msk [vmem:[#allocation2 + $0x48] sm:$0xf] %vm1573_vm4, %v1396_v3  ;;  %1580 = vst.msk [vmem:[#allocation2 + $0x44] sm:$0xf] %vm1573_vm4, %v1394_v4  ;;  %v1874_v10 = vshrl.u32 %v7246_v49, 16  ;;  %v1877_v12 = vshll.u32 %v7246_v49, 16  ;;  %v831_v14 = vor.u32 %v829_v61, %v828_v1 }
  0xc0   : > { %v1659_v11 = vld [vmem:[%s6888_s8 + $0x54] sm:$0xf]  ;;  %v847_v15 = vshrl.u32 %v524_v62, 16  ;;  %v1865_v16 = vshrl.u32 %v7249_v51, 16  ;;  %v1658_v17 = vld [vmem:[%s6888_s8 + $0x50] sm:$0xf]  ;;  %v1185_v20 = vsel %vm6930_vm3, %v838_v8, %v1184_v0  ;;  %v1862_v35 = vor.u32 %v7263_v5, %v7260_v63 }
  0xc1   : > { %1505 = vrot.lane.b32.xlu0 %v1315_v37, %s6423_s12  ;;  %2280 = vrot.lane.b32.xlu1 %v7098_v18, %s6424_s13  ;;  %v850_v21 = vshll.u32 %v524_v62, 16  ;;  %v840_v25 = vshrl.u32 %v523_v2, 16  ;;  %v1868_v26 = vshll.u32 %v7249_v51, 16  ;;  %1186 = vst [vmem:[#allocation2 + $0xf8] sm:$0xf] %v1185_v20  ;;  %v1182_v27 = vsel %vm6930_vm3, %v831_v14, %v1181_v9  ;;  %v1400_v33 = vpop.permute.xlu1 %1399 }
  0xc2   : > { %v849_v32 = vrot.slane %v847_v15, 7  ;;  %v843_v18 = vshll.u32 %v523_v2, 16  ;;  %v1892_v36 = vshrl.u32 %v1659_v11, 16  ;;  %1183 = vst [vmem:[#allocation2 + $0xf4] sm:$0xf] %v1182_v27  ;;  %v1853_v41 = vor.u32 %v7267_v7, %v7265_v6 }
  0xc3   : > { %v1190_v37 = vld [vmem:[#allocation2 + $0x100] sm:$0xf]  ;;  %v842_v39 = vrot.slane %v840_v25, 7  ;;  %v526_v40 = vld [vmem:[%s6888_s8 + $0xb4] sm:$0xf]  ;;  %v1895_v43 = vshll.u32 %v1659_v11, 16 }
  0xc4   : > { %1583 = vst.msk [vmem:[#allocation2 + $0x58] sm:$0xf] %vm1573_vm4, %v1400_v33  ;;  %v1883_v45 = vshrl.u32 %v1658_v17, 16  ;;  %v852_v46 = vor.u32 %v850_v21, %v849_v32  ;;  %v1187_v47 = vld [vmem:[#allocation2 + $0xfc] sm:$0xf]  ;;  %v1876_v48 = vrot.slane %v1874_v10, 4 }
  0xc5   : > { %2278 = vrot.lane.b32.xlu0 %v7103_v23, %s6424_s13  ;;  %v1398_v23 = vpop.permute.xlu0 %1397  ;;  %v525_v38 = vld [vmem:[%s6888_s8 + $0xb0] sm:$0xf]  ;;  %2284 = vrot.lane.b32.xlu1 %v7106_v28, %s6424_s13  ;;  %v1879_v50 = vrot.slane %v1877_v12, 5  ;;  %v1886_v49 = vshll.u32 %v1658_v17, 16  ;;  %v845_v51 = vor.u32 %v843_v18, %v842_v39  ;;  %v7299_v52 = vrot.slane %v1865_v16, 4  ;;  %v1404_v59 = vpop.permute.xlu1 %1403 }
  0xc6   : > { %1582 = vst.msk [vmem:[#allocation2 + $0x54] sm:$0xf] %vm1573_vm4, %v1398_v23  ;;  %v7301_v53 = vrot.slane %v1868_v26, 5  ;;  %v1191_v54 = vsel %vm6930_vm3, %v852_v46, %v1190_v37  ;;  %v861_v58 = vshrl.u32 %v526_v40, 16  ;;  %v1894_v62 = vrot.slane %v1892_v36, 4 }
  0xc7   : > { %1192 = vst [vmem:[#allocation2 + $0x100] sm:$0xf] %v1191_v54  ;;  %v1188_v28 = vsel %vm6930_vm3, %v845_v51, %v1187_v47  ;;  %v854_v63 = vshrl.u32 %v525_v38, 16  ;;  %1585 = vst.msk [vmem:[#allocation2 + $0x60] sm:$0xf] %vm1573_vm4, %v1404_v59  ;;  %v1897_v0 = vrot.slane %v1895_v43, 5  ;;  %v1880_v12 = vor.u32 %v1879_v50, %v1876_v48 }
  0xc8   : > { %v1885_v1 = vrot.slane %v1883_v45, 4  ;;  %1189 = vst [vmem:[#allocation2 + $0xfc] sm:$0xf] %v1188_v28  ;;  %v863_v2 = vrot.slane %v861_v58, 7  ;;  %v857_v3 = vshll.u32 %v525_v38, 16  ;;  %v1888_v5 = vrot.slane %v1886_v49, 5 }
  0xc9   : > { %2282 = vrot.lane.b32.xlu0 %v7108_v30, %s6424_s13  ;;  %v1402_v61 = vpop.permute.xlu0 %1401  ;;  %v864_v30 = vshll.u32 %v526_v40, 16  ;;  %v528_v4 = vld [vmem:[%s6888_s8 + $0xbc] sm:$0xf]  ;;  %2288 = vrot.lane.b32.xlu1 %v7117_v44, %s6424_s13  ;;  %v1196_v6 = vld [vmem:[#allocation2 + $0x108] sm:$0xf]  ;;  %v856_v7 = vrot.slane %v854_v63, 7  ;;  %v1408_v15 = vpop.permute.xlu1 %1407  ;;  %v1898_v21 = vor.u32 %v1897_v0, %v1894_v62 }
  0xca   : > { %1584 = vst.msk [vmem:[#allocation2 + $0x5c] sm:$0xf] %vm1573_vm4, %v1402_v61  ;;  %v527_v8 = vld [vmem:[%s6888_s8 + $0xb8] sm:$0xf]  ;;  %v7315_v9 = vrot.slane %v1835_v34, 4  ;;  %v7317_v10 = vrot.slane %v1862_v35, 4  ;;  %v1889_v18 = vor.u32 %v1888_v5, %v1885_v1 }
  0xcb   : > { %v866_v11 = vor.u32 %v864_v30, %v863_v2  ;;  %v1193_v14 = vld [vmem:[#allocation2 + $0x104] sm:$0xf]  ;;  %v7319_v44 = vrot.slane %v1853_v41, 4  ;;  %v859_v17 = vor.u32 %v857_v3, %v856_v7  ;;  %v875_v20 = vshrl.u32 %v528_v4, 16  ;;  %1587 = vst.msk [vmem:[#allocation2 + $0x68] sm:$0xf] %vm1573_vm4, %v1408_v15 }
  0xcc   : > { %v1661_v25 = vld [vmem:[%s6888_s8 + $0x5c] sm:$0xf]  ;;  %v878_v27 = vshll.u32 %v528_v4, 16  ;;  %v868_v32 = vshrl.u32 %v527_v8, 16  ;;  %v1660_v33 = vld [vmem:[%s6888_s8 + $0x58] sm:$0xf] }
  0xcd   : > { %2286 = vrot.lane.b32.xlu0 %v7128_v55, %s6424_s13  ;;  %v1406_v16 = vpop.permute.xlu0 %1405  ;;  %v1871_v55 = vor.u32 %v7301_v53, %v7299_v52  ;;  %v1197_v26 = vsel %vm6930_vm3, %v866_v11, %v1196_v6  ;;  %2292 = vrot.lane.b32.xlu1 %v7138_v13, %s6424_s13  ;;  %v7334_v23 = vld [vmem:[%s6888_s8 + $0x64] sm:$0xf]  ;;  %v1194_v34 = vsel %vm6930_vm3, %v859_v17, %v1193_v14  ;;  %v877_v35 = vrot.slane %v875_v20, 7  ;;  %v1202_v39 = vld [vmem:[#allocation2 + $0x110] sm:$0xf]  ;;  %v1412_v41 = vpop.permute.xlu1 %1411 }
  0xce   : > { %1586 = vst.msk [vmem:[#allocation2 + $0x64] sm:$0xf] %vm1573_vm4, %v1406_v16  ;;  %1198 = vst [vmem:[#allocation2 + $0x108] sm:$0xf] %v1197_v26  ;;  %v871_v36 = vshll.u32 %v527_v8, 16  ;;  %v7338_v37 = vrot.slane %v1880_v12, 4 }
  0xcf   : > { %1195 = vst [vmem:[#allocation2 + $0x104] sm:$0xf] %v1194_v34  ;;  %v870_v40 = vrot.slane %v868_v32, 7  ;;  %v530_v13 = vld [vmem:[%s6888_s8 + $0xc4] sm:$0xf]  ;;  %v1913_v45 = vshll.u32 %v1661_v25, 16  ;;  %v880_v46 = vor.u32 %v878_v27, %v877_v35 }
  0xd0   : > { %v1199_v47 = vld [vmem:[#allocation2 + $0x10c] sm:$0xf]  ;;  %v529_v38 = vld [vmem:[%s6888_s8 + $0xc0] sm:$0xf]  ;;  %1589 = vst.msk [vmem:[#allocation2 + $0x70] sm:$0xf] %vm1573_vm4, %v1412_v41 }
  0xd1   : > { %2290 = vrot.lane.b32.xlu0 %v7155_v42, %s6424_s13  ;;  %v1410_v43 = vpop.permute.xlu0 %1409  ;;  %v1910_v42 = vshrl.u32 %v1661_v25, 16  ;;  %v7344_v48 = vrot.slane %v1871_v55, 4  ;;  %v7346_v50 = vrot.slane %v1898_v21, 4  ;;  %v1901_v49 = vshrl.u32 %v1660_v33, 16  ;;  %2296 = vrot.lane.b32.xlu1 %v7184_v19, %s6424_s13  ;;  %v1662_v54 = vld [vmem:[%s6888_s8 + $0x60] sm:$0xf]  ;;  %v1416_v30 = vpop.permute.xlu1 %1415 }
  0xd2   : > { %1588 = vst.msk [vmem:[#allocation2 + $0x6c] sm:$0xf] %vm1573_vm4, %v1410_v43  ;;  %v873_v51 = vor.u32 %v871_v36, %v870_v40  ;;  %v7352_v52 = vrot.slane %v1889_v18, 4  ;;  %v1904_v53 = vshll.u32 %v1660_v33, 16  ;;  %v1203_v58 = vsel %vm6930_vm3, %v880_v46, %v1202_v39  ;;  %v7359_v62 = vld [vmem:[%s6888_s8 + $0x6c] sm:$0xf] }
  0xd3   : > { %v889_v59 = vshrl.u32 %v530_v13, 16  ;;  %v1928_v61 = vshrl.u32 %v7334_v23, 16  ;;  %1204 = vst [vmem:[#allocation2 + $0x110] sm:$0xf] %v1203_v58  ;;  %v892_v28 = vshll.u32 %v530_v13, 16  ;;  %v7363_v0 = vrot.slane %v1910_v42, 4 }
  0xd4   : > { %v1200_v19 = vsel %vm6930_vm3, %v873_v51, %v1199_v47  ;;  %v7365_v1 = vrot.slane %v1913_v45, 5  ;;  %v885_v3 = vshll.u32 %v529_v38, 16  ;;  %v532_v4 = vld [vmem:[%s6888_s8 + $0xcc] sm:$0xf]  ;;  %1591 = vst.msk [vmem:[#allocation2 + $0x80] sm:$0xf] %vm1573_vm4, %v1416_v30 }
  0xd5   : > { %2294 = vrot.lane.b32.xlu0 %v7187_v24, %s6424_s13  ;;  %v882_v24 = vshrl.u32 %v529_v38, 16  ;;  %v1414_v63 = vpop.permute.xlu0 %1413  ;;  %1201 = vst [vmem:[#allocation2 + $0x10c] sm:$0xf] %v1200_v19  ;;  %v891_v2 = vrot.slane %v889_v59, 7  ;;  %v7370_v5 = vrot.slane %v1901_v49, 4  ;;  %2300 = vrot.lane.b32.xlu1 %v7207_v56, %s6424_s13  ;;  %v1906_v12 = vrot.slane %v1904_v53, 5  ;;  %v1420_v25 = vpop.permute.xlu1 %1419 }
  0xd6   : > { %1590 = vst.msk [vmem:[#allocation2 + $0x7c] sm:$0xf] %vm1573_vm4, %v1414_v63  ;;  %v1208_v6 = vld [vmem:[#allocation2 + $0x120] sm:$0xf]  ;;  %v531_v8 = vld [vmem:[%s6888_s8 + $0xc8] sm:$0xf]  ;;  %v1916_v39 = vor.u32 %v7365_v1, %v7363_v0 }
  0xd7   : > { %v884_v7 = vrot.slane %v882_v24, 7  ;;  %v1931_v11 = vshll.u32 %v7334_v23, 16  ;;  %v1919_v14 = vshrl.u32 %v1662_v54, 16  ;;  %v894_v15 = vor.u32 %v892_v28, %v891_v2  ;;  %v1205_v16 = vld [vmem:[#allocation2 + $0x11c] sm:$0xf] }
  0xd8   : > { %v7378_v55 = vrot.slane %v1928_v61, 4  ;;  %v1922_v17 = vshll.u32 %v1662_v54, 16  ;;  %v903_v21 = vshrl.u32 %v532_v4, 16  ;;  %v1946_v27 = vshrl.u32 %v7359_v62, 16  ;;  %v7382_v56 = vld [vmem:[%s6888_s8 + $0x68] sm:$0xf] }
  0xd9   : > { %2298 = vrot.lane.b32.xlu0 %v7212_v60, %s6424_s13  ;;  %v887_v20 = vor.u32 %v885_v3, %v884_v7  ;;  %v1418_v26 = vpop.permute.xlu0 %1417  ;;  %v1209_v60 = vsel %vm6930_vm3, %v894_v15, %v1208_v6  ;;  %v906_v32 = vshll.u32 %v532_v4, 16  ;;  %v896_v18 = vshrl.u32 %v531_v8, 16  ;;  %1593 = vst.msk [vmem:[#allocation2 + $0x88] sm:$0xf] %vm1573_vm4, %v1420_v25  ;;  %v7390_v23 = vld [vmem:[%s6888_s8 + $0x74] sm:$0xf]  ;;  %2304 = vrot.lane.b32.xlu1 %v7229_v22, %s6424_s13 }
  0xda   : > { %1592 = vst.msk [vmem:[#allocation2 + $0x84] sm:$0xf] %vm1573_vm4, %v1418_v26  ;;  %v1949_v33 = vshll.u32 %v7359_v62, 16  ;;  %1210 = vst [vmem:[#allocation2 + $0x120] sm:$0xf] %v1209_v60  ;;  %v905_v35 = vrot.slane %v903_v21, 7  ;;  %v1907_v42 = vor.u32 %v1906_v12, %v7370_v5 }
  0xdb   : > { %v1206_v34 = vsel %vm6930_vm3, %v887_v20, %v1205_v16  ;;  %v899_v36 = vshll.u32 %v531_v8, 16  ;;  %v7400_v40 = vrot.slane %v1931_v11, 5  ;;  %v1214_v13 = vld [vmem:[#allocation2 + $0x128] sm:$0xf]  ;;  %v898_v41 = vrot.slane %v896_v18, 7 }
  0xdc   : > { %1207 = vst [vmem:[#allocation2 + $0x11c] sm:$0xf] %v1206_v34  ;;  %v534_v43 = vld [vmem:[%s6888_s8 + $0xd4] sm:$0xf]  ;;  %v7404_v45 = vrot.slane %v1919_v14, 4  ;;  %v7406_v46 = vrot.slane %v1922_v17, 5  ;;  %v908_v47 = vor.u32 %v906_v32, %v905_v35 }
  0xdd   : > { %2302 = vrot.lane.b32.xlu0 %v7234_v31, %s6424_s13  ;;  %v1211_v22 = vld [vmem:[#allocation2 + $0x124] sm:$0xf]  ;;  %v533_v38 = vld [vmem:[%s6888_s8 + $0xd0] sm:$0xf]  ;;  %v1424_v31 = vpop.permute.xlu1 %1423  ;;  %v7409_v51 = vrot.slane %v1946_v27, 4  ;;  %v1937_v53 = vshrl.u32 %v7382_v56, 16  ;;  %v901_v58 = vor.u32 %v899_v36, %v898_v41  ;;  %2308 = vrot.lane.b32.xlu1 %v7255_v57, %s6424_s13  ;;  %v1934_v6 = vor.u32 %v7400_v40, %v7378_v55 }
  0xde   : > { %v1940_v54 = vshll.u32 %v7382_v56, 16  ;;  %1595 = vst.msk [vmem:[#allocation2 + $0x90] sm:$0xf] %vm1573_vm4, %v1424_v31  ;;  %v1951_v59 = vrot.slane %v1949_v33, 5  ;;  %v1964_v61 = vshrl.u32 %v7390_v23, 16  ;;  %v1215_v62 = vsel %vm6930_vm3, %v908_v47, %v1214_v13 }
  0xdf   : > { %v1422_v49 = vpop.permute.xlu0 %1421  ;;  %v917_v19 = vshrl.u32 %v534_v43, 16  ;;  %v1967_v28 = vshll.u32 %v7390_v23, 16  ;;  %v1666_v24 = vld [vmem:[%s6888_s8 + $0x70] sm:$0xf]  ;;  %1216 = vst [vmem:[#allocation2 + $0x128] sm:$0xf] %v1215_v62  ;;  %v1212_v30 = vsel %vm6930_vm3, %v901_v58, %v1211_v22  ;;  %v1925_v7 = vor.u32 %v7406_v46, %v7404_v45 }
  0xe0   : > { %1594 = vst.msk [vmem:[#allocation2 + $0x8c] sm:$0xf] %vm1573_vm4, %v1422_v49  ;;  %v920_v63 = vshll.u32 %v534_v43, 16  ;;  %v910_v0 = vshrl.u32 %v533_v38, 16  ;;  %v7426_v1 = vrot.slane %v1916_v39, 4  ;;  %v7428_v2 = vrot.slane %v1907_v42, 4 }
  0xe1   : > { %2306 = vrot.lane.b32.xlu0 %v7315_v9, %s6424_s13  ;;  %1213 = vst [vmem:[#allocation2 + $0x124] sm:$0xf] %v1212_v30  ;;  %v919_v3 = vrot.slane %v917_v19, 7  ;;  %v913_v57 = vshll.u32 %v533_v38, 16  ;;  %v536_v4 = vld [vmem:[%s6888_s8 + $0xdc] sm:$0xf]  ;;  %v1428_v5 = vpop.permute.xlu1 %1427  ;;  %v1952_v15 = vor.u32 %v1951_v59, %v7409_v51  ;;  %2312 = vrot.lane.b32.xlu1 %v7317_v10, %s6424_s13 }
  0xe2   : > { %v1939_v8 = vrot.slane %v1937_v53, 4  ;;  %v1220_v12 = vld [vmem:[#allocation2 + $0x130] sm:$0xf]  ;;  %v912_v11 = vrot.slane %v910_v0, 7  ;;  %v535_v14 = vld [vmem:[%s6888_s8 + $0xd8] sm:$0xf] }
  0xe3   : > { %v1426_v9 = vpop.permute.xlu0 %1425  ;;  %1597 = vst.msk [vmem:[#allocation2 + $0x98] sm:$0xf] %vm1573_vm4, %v1428_v5  ;;  %v1942_v16 = vrot.slane %v1940_v54, 5  ;;  %v1955_v17 = vshrl.u32 %v1666_v24, 16  ;;  %v922_v20 = vor.u32 %v920_v63, %v919_v3  ;;  %v1217_v21 = vld [vmem:[#allocation2 + $0x12c] sm:$0xf] }
  0xe4   : > { %1596 = vst.msk [vmem:[#allocation2 + $0x94] sm:$0xf] %vm1573_vm4, %v1426_v9  ;;  %v1966_v55 = vrot.slane %v1964_v61, 4  ;;  %v1969_v25 = vrot.slane %v1967_v28, 5  ;;  %v915_v26 = vor.u32 %v913_v57, %v912_v11  ;;  %v931_v27 = vshrl.u32 %v536_v4, 16 }
  0xe5   : > { %2310 = vrot.lane.b32.xlu0 %v7319_v44, %s6424_s13  ;;  %v1958_v56 = vshll.u32 %v1666_v24, 16  ;;  %v1669_v60 = vld [vmem:[%s6888_s8 + $0x7c] sm:$0xf]  ;;  %v1221_v32 = vsel %vm6930_vm3, %v922_v20, %v1220_v12  ;;  %v934_v18 = vshll.u32 %v536_v4, 16  ;;  %v924_v33 = vshrl.u32 %v535_v14, 16  ;;  %v1432_v23 = vpop.permute.xlu1 %1431  ;;  %2316 = vrot.lane.b32.xlu1 %v7338_v37, %s6424_s13 }
  0xe6   : > { %v7446_v35 = vrot.slane %v1934_v6, 4  ;;  %v1668_v10 = vld [vmem:[%s6888_s8 + $0x78] sm:$0xf]  ;;  %1222 = vst [vmem:[#allocation2 + $0x130] sm:$0xf] %v1221_v32  ;;  %v1218_v44 = vsel %vm6930_vm3, %v915_v26, %v1217_v21  ;;  %v933_v36 = vrot.slane %v931_v27, 7  ;;  %v1943_v13 = vor.u32 %v1942_v16, %v1939_v8 }
  0xe7   : > { %v1430_v34 = vpop.permute.xlu0 %1429  ;;  %v927_v39 = vshll.u32 %v535_v14, 16  ;;  %1599 = vst.msk [vmem:[#allocation2 + $0xa8] sm:$0xf] %vm1573_vm4, %v1432_v23  ;;  %v7453_v40 = vrot.slane %v1925_v7, 4  ;;  %1219 = vst [vmem:[#allocation2 + $0x12c] sm:$0xf] %v1218_v44  ;;  %v1970_v46 = vor.u32 %v1969_v25, %v1966_v55 }
  0xe8   : > { %1598 = vst.msk [vmem:[#allocation2 + $0xa4] sm:$0xf] %vm1573_vm4, %v1430_v34  ;;  %v1226_v41 = vld [vmem:[#allocation2 + $0x138] sm:$0xf]  ;;  %v926_v43 = vrot.slane %v924_v33, 7  ;;  %v7460_v45 = vrot.slane %v1952_v15, 4  ;;  %v936_v22 = vor.u32 %v934_v18, %v933_v36 }
  0xe9   : > { %v538_v42 = vld [vmem:[%s6888_s8 + $0xe4] sm:$0xf]  ;;  %2314 = vrot.lane.b32.xlu0 %v7344_v48, %s6424_s13  ;;  %v1982_v47 = vshrl.u32 %v1669_v60, 16  ;;  %v1223_v38 = vld [vmem:[#allocation2 + $0x134] sm:$0xf]  ;;  %v1957_v49 = vrot.slane %v1955_v17, 4  ;;  %v1436_v58 = vpop.permute.xlu1 %1435  ;;  %2320 = vrot.lane.b32.xlu1 %v7346_v50, %s6424_s13 }
  0xea   : > { %v537_v31 = vld [vmem:[%s6888_s8 + $0xe0] sm:$0xf]  ;;  %v1960_v51 = vrot.slane %v1958_v56, 5  ;;  %v1985_v53 = vshll.u32 %v1669_v60, 16  ;;  %v929_v54 = vor.u32 %v927_v39, %v926_v43  ;;  %v1973_v61 = vshrl.u32 %v1668_v10, 16 }
  0xeb   : > { %v1434_v59 = vpop.permute.xlu0 %1433  ;;  %v1976_v37 = vshll.u32 %v1668_v10, 16  ;;  %v1671_v62 = vld [vmem:[%s6888_s8 + $0x84] sm:$0xf]  ;;  %v1227_v48 = vsel %vm6930_vm3, %v936_v22, %v1226_v41  ;;  %v945_v19 = vshrl.u32 %v538_v42, 16  ;;  %1601 = vst.msk [vmem:[#allocation2 + $0xb0] sm:$0xf] %vm1573_vm4, %v1436_v58 }
  0xec   : > { %1600 = vst.msk [vmem:[#allocation2 + $0xac] sm:$0xf] %vm1573_vm4, %v1434_v59  ;;  %v7468_v28 = vrot.slane %v1943_v13, 4  ;;  %v7471_v24 = vld [vmem:[%s6888_s8 + $0x80] sm:$0xf]  ;;  %v1224_v30 = vsel %vm6930_vm3, %v929_v54, %v1223_v38  ;;  %v948_v63 = vshll.u32 %v538_v42, 16  ;;  %v1961_v6 = vor.u32 %v1960_v51, %v1957_v49 }
  0xed   : > { %1228 = vst [vmem:[#allocation2 + $0x138] sm:$0xf] %v1227_v48  ;;  %v938_v0 = vshrl.u32 %v537_v31, 16  ;;  %2318 = vrot.lane.b32.xlu0 %v7352_v52, %s6424_s13  ;;  %v7479_v3 = vrot.slane %v1970_v46, 4  ;;  %v7481_v57 = vrot.slane %v1982_v47, 4  ;;  %v947_v4 = vrot.slane %v945_v19, 7  ;;  %v1440_v14 = vpop.permute.xlu1 %1439  ;;  %2324 = vrot.lane.b32.xlu1 %v7426_v1, %s6424_s13 }
  0xee   : > { %1225 = vst [vmem:[#allocation2 + $0x134] sm:$0xf] %v1224_v30  ;;  %v941_v5 = vshll.u32 %v537_v31, 16  ;;  %v540_v9 = vld [vmem:[%s6888_s8 + $0xec] sm:$0xf]  ;;  %v1987_v7 = vrot.slane %v1985_v53, 5 }
  0xef   : > { %v1232_v8 = vld [vmem:[#allocation2 + $0x148] sm:$0xf]  ;;  %v940_v12 = vrot.slane %v938_v0, 7  ;;  %v1438_v15 = vpop.permute.xlu0 %1437  ;;  %v1975_v50 = vrot.slane %v1973_v61, 4  ;;  %v1978_v16 = vrot.slane %v1976_v37, 5  ;;  %v2000_v17 = vshrl.u32 %v1671_v62, 16 }
  0xf0   : > { %v539_v11 = vld [vmem:[%s6888_s8 + $0xe8] sm:$0xf]  ;;  %v950_v52 = vor.u32 %v948_v63, %v947_v4  ;;  %v1229_v20 = vld [vmem:[#allocation2 + $0x144] sm:$0xf]  ;;  %1603 = vst.msk [vmem:[#allocation2 + $0xb8] sm:$0xf] %vm1573_vm4, %v1440_v14  ;;  %v1988_v36 = vor.u32 %v1987_v7, %v7481_v57 }
  0xf1   : > { %1602 = vst.msk [vmem:[#allocation2 + $0xb4] sm:$0xf] %vm1573_vm4, %v1438_v15  ;;  %v2003_v21 = vshll.u32 %v1671_v62, 16  ;;  %v1991_v55 = vshrl.u32 %v7471_v24, 16  ;;  %v943_v25 = vor.u32 %v941_v5, %v940_v12  ;;  %v959_v26 = vshrl.u32 %v540_v9, 16  ;;  %2322 = vrot.lane.b32.xlu0 %v7428_v2, %s6424_s13  ;;  %v1444_v2 = vpop.permute.xlu1 %1443  ;;  %2328 = vrot.lane.b32.xlu1 %v7446_v35, %s6424_s13 }
  0xf2   : > { %v1994_v27 = vshll.u32 %v7471_v24, 16  ;;  %v1673_v56 = vld [vmem:[%s6888_s8 + $0x8c] sm:$0xf]  ;;  %v1233_v60 = vsel %vm6930_vm3, %v950_v52, %v1232_v8  ;;  %v962_v32 = vshll.u32 %v540_v9, 16  ;;  %v952_v18 = vshrl.u32 %v539_v11, 16 }
  0xf3   : > { %v7496_v33 = vrot.slane %v1961_v6, 4  ;;  %v1672_v23 = vld [vmem:[%s6888_s8 + $0x88] sm:$0xf]  ;;  %1234 = vst [vmem:[#allocation2 + $0x148] sm:$0xf] %v1233_v60  ;;  %v1230_v34 = vsel %vm6930_vm3, %v943_v25, %v1229_v20  ;;  %v961_v1 = vrot.slane %v959_v26, 7  ;;  %v1442_v44 = vpop.permute.xlu0 %1441  ;;  %v1979_v42 = vor.u32 %v1978_v16, %v1975_v50 }
  0xf4   : > { %v955_v10 = vshll.u32 %v539_v11, 16  ;;  %v7502_v39 = vrot.slane %v2000_v17, 4  ;;  %1231 = vst [vmem:[#allocation2 + $0x144] sm:$0xf] %v1230_v34  ;;  %v1238_v13 = vld [vmem:[#allocation2 + $0x150] sm:$0xf] }
  0xf5   : > { %v954_v41 = vrot.slane %v952_v18, 7  ;;  %v542_v43 = vld [vmem:[%s6888_s8 + $0xf4] sm:$0xf]  ;;  %1605 = vst.msk [vmem:[#allocation2 + $0xc0] sm:$0xf] %vm1573_vm4, %v1444_v2  ;;  %v2005_v46 = vrot.slane %v2003_v21, 5  ;;  %v964_v22 = vor.u32 %v962_v32, %v961_v1  ;;  %2326 = vrot.lane.b32.xlu0 %v7453_v40, %s6424_s13  ;;  %v1448_v48 = vpop.permute.xlu1 %1447  ;;  %2332 = vrot.lane.b32.xlu1 %v7460_v45, %s6424_s13 }
  0xf6   : > { %1604 = vst.msk [vmem:[#allocation2 + $0xbc] sm:$0xf] %vm1573_vm4, %v1442_v44  ;;  %v2018_v47 = vshrl.u32 %v1673_v56, 16  ;;  %v1235_v38 = vld [vmem:[#allocation2 + $0x14c] sm:$0xf]  ;;  %v1993_v49 = vrot.slane %v1991_v55, 4 }
  0xf7   : > { %v541_v31 = vld [vmem:[%s6888_s8 + $0xf0] sm:$0xf]  ;;  %v1996_v51 = vrot.slane %v1994_v27, 5  ;;  %v2021_v53 = vshll.u32 %v1673_v56, 16  ;;  %v957_v54 = vor.u32 %v955_v10, %v954_v41  ;;  %v2009_v58 = vshrl.u32 %v1672_v23, 16  ;;  %v1446_v19 = vpop.permute.xlu0 %1445 }
  0xf8   : > { %v2012_v59 = vshll.u32 %v1672_v23, 16  ;;  %v7513_v61 = vld [vmem:[%s6888_s8 + $0x94] sm:$0xf]  ;;  %v1239_v37 = vsel %vm6930_vm3, %v964_v22, %v1238_v13  ;;  %v973_v62 = vshrl.u32 %v542_v43, 16  ;;  %v7517_v24 = vrot.slane %v1988_v36, 4 }
  0xf9   : > { %v7520_v35 = vld [vmem:[%s6888_s8 + $0x90] sm:$0xf]  ;;  %1240 = vst [vmem:[#allocation2 + $0x150] sm:$0xf] %v1239_v37  ;;  %v1236_v40 = vsel %vm6930_vm3, %v957_v54, %v1235_v38  ;;  %v976_v30 = vshll.u32 %v542_v43, 16  ;;  %v966_v63 = vshrl.u32 %v541_v31, 16  ;;  %2330 = vrot.lane.b32.xlu0 %v7468_v28, %s6424_s13  ;;  %v2006_v6 = vor.u32 %v2005_v46, %v7502_v39  ;;  %v1452_v52 = vpop.permute.xlu1 %1451  ;;  %2336 = vrot.lane.b32.xlu1 %v7479_v3, %s6424_s13 }
  0xfa   : > { %1607 = vst.msk [vmem:[#allocation2 + $0xd0] sm:$0xf] %vm1573_vm4, %v1448_v48  ;;  %1606 = vst.msk [vmem:[#allocation2 + $0xcc] sm:$0xf] %vm1573_vm4, %v1446_v19  ;;  %v1980_v0 = vrot.slane %v1979_v42, 4  ;;  %v7526_v57 = vrot.slane %v2018_v47, 4  ;;  %v1997_v7 = vor.u32 %v1996_v51, %v1993_v49 }
  0xfb   : > { %1237 = vst [vmem:[#allocation2 + $0x14c] sm:$0xf] %v1236_v40  ;;  %v975_v4 = vrot.slane %v973_v62, 7  ;;  %v969_v5 = vshll.u32 %v541_v31, 16  ;;  %v544_v9 = vld [vmem:[%s6888_s8 + $0xfc] sm:$0xf]  ;;  %v1450_v28 = vpop.permute.xlu0 %1449 }
  0xfc   : > { %v7534_v8 = vrot.slane %v2021_v53, 5  ;;  %v1244_v12 = vld [vmem:[#allocation2 + $0x158] sm:$0xf]  ;;  %v968_v11 = vrot.slane %v966_v63, 7  ;;  %v7537_v15 = vrot.slane %v2009_v58, 4  ;;  %v7539_v50 = vrot.slane %v2012_v59, 5 }
  0xfd   : > { %v543_v14 = vld [vmem:[%s6888_s8 + $0xf8] sm:$0xf]  ;;  %v2036_v16 = vshrl.u32 %v7513_v61, 16  ;;  %v978_v45 = vor.u32 %v976_v30, %v975_v4  ;;  %v1241_v17 = vld [vmem:[#allocation2 + $0x154] sm:$0xf]  ;;  %v2039_v20 = vshll.u32 %v7513_v61, 16  ;;  %2334 = vrot.lane.b32.xlu0 %v7496_v33, %s6424_s13  ;;  %v1456_v33 = vpop.permute.xlu1 %1455  ;;  %2340 = vrot.lane.b32.xlu1 %v7517_v24, %s6424_s13 }
  0xfe   : > { %v2027_v21 = vshrl.u32 %v7520_v35, 16  ;;  %v7545_v55 = vld [vmem:[%s6888_s8 + $0x9c] sm:$0xf]  ;;  %v971_v25 = vor.u32 %v969_v5, %v968_v11  ;;  %v987_v26 = vshrl.u32 %v544_v9, 16  ;;  %1609 = vst.msk [vmem:[#allocation2 + $0xd8] sm:$0xf] %vm1573_vm4, %v1452_v52  ;;  %v2024_v36 = vor.u32 %v7534_v8, %v7526_v57 }
  0xff   : > { %1608 = vst.msk [vmem:[#allocation2 + $0xd4] sm:$0xf] %vm1573_vm4, %v1450_v28  ;;  %v2030_v27 = vshll.u32 %v7520_v35, 16  ;;  %v1676_v56 = vld [vmem:[%s6888_s8 + $0x98] sm:$0xf]  ;;  %v1245_v60 = vsel %vm6930_vm3, %v978_v45, %v1244_v12  ;;  %v990_v32 = vshll.u32 %v544_v9, 16  ;;  %v2015_v39 = vor.u32 %v7539_v50, %v7537_v15  ;;  %v1454_v43 = vpop.permute.xlu0 %1453 }
 0x100   : > { %v980_v18 = vshrl.u32 %v543_v14, 16  ;;  %v2007_v23 = vrot.slane %v2006_v6, 4  ;;  %v1679_v34 = vld [vmem:[%s6888_s8 + $0xa4] sm:$0xf]  ;;  %1246 = vst [vmem:[#allocation2 + $0x158] sm:$0xf] %v1245_v60  ;;  %v1242_v1 = vsel %vm6930_vm3, %v971_v25, %v1241_v17 }
 0x101   : > { %v989_v10 = vrot.slane %v987_v26, 7  ;;  %v983_v2 = vshll.u32 %v543_v14, 16  ;;  %v1998_v44 = vrot.slane %v1997_v7, 4  ;;  %v1678_v13 = vld [vmem:[%s6888_s8 + $0xa0] sm:$0xf]  ;;  %v2038_v42 = vrot.slane %v2036_v16, 4  ;;  %2338 = vrot.lane.b32.xlu0 %v1980_v0, %s6424_s13  ;;  %v1460_v35 = vpop.permute.xlu1 %1459 }
 0x102   : > { %1243 = vst [vmem:[#allocation2 + $0x154] sm:$0xf] %v1242_v1  ;;  %v1250_v3 = vld [vmem:[#allocation2 + $0x160] sm:$0xf]  ;;  %v982_v41 = vrot.slane %v980_v18, 7  ;;  %v2041_v46 = vrot.slane %v2039_v20, 5  ;;  %2344 = vrot.lane.b32.xlu1 %v2007_v23, %s6424_s13 }
 0x103   : > { %v2029_v47 = vrot.slane %v2027_v21, 4  ;;  %v992_v22 = vor.u32 %v990_v32, %v989_v10  ;;  %v1247_v38 = vld [vmem:[#allocation2 + $0x15c] sm:$0xf]  ;;  %1611 = vst.msk [vmem:[#allocation2 + $0xe0] sm:$0xf] %vm1573_vm4, %v1456_v33  ;;  %v2032_v31 = vrot.slane %v2030_v27, 5  ;;  %v1458_v40 = vpop.permute.xlu0 %1457 }
 0x104   : > { %1610 = vst.msk [vmem:[#allocation2 + $0xdc] sm:$0xf] %vm1573_vm4, %v1454_v43  ;;  %v2054_v49 = vshrl.u32 %v7545_v55, 16  ;;  %v2057_v51 = vshll.u32 %v7545_v55, 16  ;;  %v985_v53 = vor.u32 %v983_v2, %v982_v41  ;;  %v2045_v54 = vshrl.u32 %v1676_v56, 16 }
 0x105   : > { %v2048_v58 = vshll.u32 %v1676_v56, 16  ;;  %v2072_v59 = vshrl.u32 %v1679_v34, 16  ;;  %v1251_v61 = vsel %vm6930_vm3, %v992_v22, %v1250_v3  ;;  %v2075_v37 = vshll.u32 %v1679_v34, 16  ;;  %1613 = vst.msk [vmem:[#allocation2 + $0xe8] sm:$0xf] %vm1573_vm4, %v1460_v35  ;;  %2342 = vrot.lane.b32.xlu0 %v1998_v44, %s6424_s13  ;;  %v1464_v15 = vpop.permute.xlu1 %1463 }
 0x106   : > { %v2063_v62 = vshrl.u32 %v1678_v13, 16  ;;  %v2066_v48 = vshll.u32 %v1678_v13, 16  ;;  %1252 = vst [vmem:[#allocation2 + $0x160] sm:$0xf] %v1251_v61  ;;  %v1248_v19 = vsel %vm6930_vm3, %v985_v53, %v1247_v38  ;;  %1612 = vst.msk [vmem:[#allocation2 + $0xe4] sm:$0xf] %vm1573_vm4, %v1458_v40  ;;  %v2042_v63 = vor.u32 %v2041_v46, %v2038_v42 }
 0x107   : > { %1249 = vst [vmem:[#allocation2 + $0x15c] sm:$0xf] %v1248_v19  ;;  %v2025_v24 = vrot.slane %v2024_v36, 4  ;;  %v2016_v30 = vrot.slane %v2015_v39, 4  ;;  %v2033_v0 = vor.u32 %v2032_v31, %v2029_v47  ;;  %v1681_v57 = vld [vmem:[%s6888_s8 + $0xac] sm:$0xf]  ;;  %v1462_v50 = vpop.permute.xlu0 %1461 }
 0x108   : > { %v1680_v4 = vld [vmem:[%s6888_s8 + $0xa8] sm:$0xf]  ;;  %v2056_v5 = vrot.slane %v2054_v49, 4  ;;  %v2059_v9 = vrot.slane %v2057_v51, 5  ;;  %v2047_v6 = vrot.slane %v2045_v54, 4  ;;  %v2050_v7 = vrot.slane %v2048_v58, 5 }
 0x109   : > { %v2074_v8 = vrot.slane %v2072_v59, 4  ;;  %v2077_v12 = vrot.slane %v2075_v37, 5  ;;  %v2065_v11 = vrot.slane %v2063_v62, 4  ;;  %v2068_v14 = vrot.slane %v2066_v48, 5  ;;  %1615 = vst.msk [vmem:[#allocation2 + $0xf8] sm:$0xf] %vm1573_vm4, %v1464_v15  ;;  %2348 = vrot.lane.b32.xlu1 %v2025_v24, %s6424_s13  ;;  %2346 = vrot.lane.b32.xlu0 %v2016_v30, %s6424_s13  ;;  %v1468_v60 = vpop.permute.xlu1 %1467 }
 0x10a   : > { %v2090_v16 = vshrl.u32 %v1681_v57, 16  ;;  %v2093_v45 = vshll.u32 %v1681_v57, 16  ;;  %v2081_v17 = vshrl.u32 %v1680_v4, 16  ;;  %v2084_v52 = vshll.u32 %v1680_v4, 16  ;;  %1614 = vst.msk [vmem:[#allocation2 + $0xf4] sm:$0xf] %vm1573_vm4, %v1462_v50 }
 0x10b   : > { %v2043_v28 = vrot.slane %v2042_v63, 4  ;;  %v2034_v20 = vrot.slane %v2033_v0, 4  ;;  %v2060_v21 = vor.u32 %v2059_v9, %v2056_v5  ;;  %v2051_v55 = vor.u32 %v2050_v7, %v2047_v6  ;;  %v1683_v25 = vld [vmem:[%s6888_s8 + $0xb4] sm:$0xf]  ;;  %v1682_v26 = vld [vmem:[%s6888_s8 + $0xb0] sm:$0xf]  ;;  %v1466_v32 = vpop.permute.xlu0 %1465 }
 0x10c   : > { %v2078_v27 = vor.u32 %v2077_v12, %v2074_v8  ;;  %v2069_v56 = vor.u32 %v2068_v14, %v2065_v11  ;;  %v2092_v18 = vrot.slane %v2090_v16, 4  ;;  %v2095_v23 = vrot.slane %v2093_v45, 5  ;;  %1617 = vst.msk [vmem:[#allocation2 + $0x100] sm:$0xf] %vm1573_vm4, %v1468_v60  ;;  %1616 = vst.msk [vmem:[#allocation2 + $0xfc] sm:$0xf] %vm1573_vm4, %v1466_v32 }
 0x10d   : > { %v2083_v34 = vrot.slane %v2081_v17, 4  ;;  %v2086_v1 = vrot.slane %v2084_v52, 5  ;;  %v2108_v10 = vshrl.u32 %v1683_v25, 16  ;;  %v2111_v2 = vshll.u32 %v1683_v25, 16  ;;  %2352 = vrot.lane.b32.xlu1 %v2043_v28, %s6424_s13  ;;  %2350 = vrot.lane.b32.xlu0 %v2034_v20, %s6424_s13  ;;  %v1685_v3 = vld [vmem:[%s6888_s8 + $0xbc] sm:$0xf]  ;;  %v1472_v33 = vpop.permute.xlu1 %1471 }
 0x10e   : > { %v2099_v44 = vshrl.u32 %v1682_v26, 16  ;;  %v2102_v36 = vshll.u32 %v1682_v26, 16  ;;  %v2061_v39 = vrot.slane %v2060_v21, 4  ;;  %v2052_v13 = vrot.slane %v2051_v55, 4  ;;  %v1684_v41 = vld [vmem:[%s6888_s8 + $0xb8] sm:$0xf] }
 0x10f   : > { %v1470_v43 = vpop.permute.xlu0 %1469  ;;  %v2079_v42 = vrot.slane %v2078_v27, 4  ;;  %v2070_v46 = vrot.slane %v2069_v56, 4  ;;  %v2096_v47 = vor.u32 %v2095_v23, %v2092_v18  ;;  %v2087_v22 = vor.u32 %v2086_v1, %v2083_v34  ;;  %v1687_v38 = vld [vmem:[%s6888_s8 + $0xc4] sm:$0xf]  ;;  %v1686_v31 = vld [vmem:[%s6888_s8 + $0xc0] sm:$0xf] }
 0x110   : > { %1619 = vst.msk [vmem:[#allocation2 + $0x108] sm:$0xf] %vm1573_vm4, %v1472_v33  ;;  %1618 = vst.msk [vmem:[#allocation2 + $0x104] sm:$0xf] %vm1573_vm4, %v1470_v43  ;;  %v2110_v49 = vrot.slane %v2108_v10, 4  ;;  %v2113_v51 = vrot.slane %v2111_v2, 5 }
 0x111   : > { %v2101_v53 = vrot.slane %v2099_v44, 4  ;;  %v2104_v54 = vrot.slane %v2102_v36, 5  ;;  %2356 = vrot.lane.b32.xlu1 %v2061_v39, %s6424_s13  ;;  %2354 = vrot.lane.b32.xlu0 %v2052_v13, %s6424_s13  ;;  %v2126_v58 = vshrl.u32 %v1685_v3, 16  ;;  %v2129_v59 = vshll.u32 %v1685_v3, 16  ;;  %v1476_v40 = vpop.permute.xlu1 %1475  ;;  %v1689_v4 = vld [vmem:[%s6888_s8 + $0xcc] sm:$0xf] }
 0x112   : > { %v2117_v61 = vshrl.u32 %v1684_v41, 16  ;;  %v2120_v37 = vshll.u32 %v1684_v41, 16  ;;  %v2144_v62 = vshrl.u32 %v1687_v38, 16  ;;  %v2147_v48 = vshll.u32 %v1687_v38, 16  ;;  %1621 = vst.msk [vmem:[#allocation2 + $0x110] sm:$0xf] %vm1573_vm4, %v1476_v40 }
 0x113   : > { %v2135_v19 = vshrl.u32 %v1686_v31, 16  ;;  %v2138_v35 = vshll.u32 %v1686_v31, 16  ;;  %v1474_v24 = vpop.permute.xlu0 %1473  ;;  %v2097_v30 = vrot.slane %v2096_v47, 4  ;;  %v2088_v63 = vrot.slane %v2087_v22, 4  ;;  %v1688_v5 = vld [vmem:[%s6888_s8 + $0xc8] sm:$0xf] }
 0x114   : > { %1620 = vst.msk [vmem:[#allocation2 + $0x10c] sm:$0xf] %vm1573_vm4, %v1474_v24  ;;  %v2114_v0 = vor.u32 %v2113_v51, %v2110_v49  ;;  %v2105_v57 = vor.u32 %v2104_v54, %v2101_v53  ;;  %v2128_v9 = vrot.slane %v2126_v58, 4  ;;  %v2131_v6 = vrot.slane %v2129_v59, 5  ;;  %v1691_v26 = vld [vmem:[%s6888_s8 + $0xd4] sm:$0xf] }
 0x115   : > { %2360 = vrot.lane.b32.xlu1 %v2079_v42, %s6424_s13  ;;  %2358 = vrot.lane.b32.xlu0 %v2070_v46, %s6424_s13  ;;  %v2119_v7 = vrot.slane %v2117_v61, 4  ;;  %v2122_v8 = vrot.slane %v2120_v37, 5  ;;  %v2146_v12 = vrot.slane %v2144_v62, 4  ;;  %v2149_v11 = vrot.slane %v2147_v48, 5  ;;  %v1480_v50 = vpop.permute.xlu1 %1479  ;;  %v1690_v27 = vld [vmem:[%s6888_s8 + $0xd0] sm:$0xf] }
 0x116   : > { %v2137_v14 = vrot.slane %v2135_v19, 4  ;;  %v2140_v15 = vrot.slane %v2138_v35, 5  ;;  %v2162_v45 = vshrl.u32 %v1689_v4, 16  ;;  %v2165_v17 = vshll.u32 %v1689_v4, 16  ;;  %1623 = vst.msk [vmem:[#allocation2 + $0x120] sm:$0xf] %vm1573_vm4, %v1480_v50 }
 0x117   : > { %v1478_v16 = vpop.permute.xlu0 %1477  ;;  %v2153_v52 = vshrl.u32 %v1688_v5, 16  ;;  %v2156_v28 = vshll.u32 %v1688_v5, 16  ;;  %v2115_v20 = vrot.slane %v2114_v0, 4  ;;  %v2106_v21 = vrot.slane %v2105_v57, 4  ;;  %v1693_v41 = vld [vmem:[%s6888_s8 + $0xdc] sm:$0xf] }
 0x118   : > { %1622 = vst.msk [vmem:[#allocation2 + $0x11c] sm:$0xf] %vm1573_vm4, %v1478_v16  ;;  %v2132_v55 = vor.u32 %v2131_v6, %v2128_v9  ;;  %v2123_v25 = vor.u32 %v2122_v8, %v2119_v7  ;;  %v2150_v56 = vor.u32 %v2149_v11, %v2146_v12  ;;  %v2141_v60 = vor.u32 %v2140_v15, %v2137_v14  ;;  %v1692_v33 = vld [vmem:[%s6888_s8 + $0xd8] sm:$0xf]  ;;  %v1695_v31 = vld [vmem:[%s6888_s8 + $0xe4] sm:$0xf] }
 0x119   : > { %2364 = vrot.lane.b32.xlu1 %v2097_v30, %s6424_s13  ;;  %2362 = vrot.lane.b32.xlu0 %v2088_v63, %s6424_s13  ;;  %v1484_v32 = vpop.permute.xlu1 %1483  ;;  %v2164_v23 = vrot.slane %v2162_v45, 4  ;;  %v2167_v34 = vrot.slane %v2165_v17, 5  ;;  %v2155_v1 = vrot.slane %v2153_v52, 4  ;;  %v2158_v10 = vrot.slane %v2156_v28, 5  ;;  %v1694_v58 = vld [vmem:[%s6888_s8 + $0xe0] sm:$0xf] }
 0x11a   : > { %1625 = vst.msk [vmem:[#allocation2 + $0x128] sm:$0xf] %vm1573_vm4, %v1484_v32  ;;  %v2180_v2 = vshrl.u32 %v1691_v26, 16  ;;  %v2183_v44 = vshll.u32 %v1691_v26, 16  ;;  %v2171_v36 = vshrl.u32 %v1690_v27, 16  ;;  %v2174_v39 = vshll.u32 %v1690_v27, 16 }
 0x11b   : > { %v1482_v18 = vpop.permute.xlu0 %1481  ;;  %v2133_v13 = vrot.slane %v2132_v55, 4  ;;  %v2124_v3 = vrot.slane %v2123_v25, 4  ;;  %v2151_v46 = vrot.slane %v2150_v56, 4  ;;  %v2142_v47 = vrot.slane %v2141_v60, 4  ;;  %v1697_v5 = vld [vmem:[%s6888_s8 + $0xec] sm:$0xf] }
 0x11c   : > { %1624 = vst.msk [vmem:[#allocation2 + $0x124] sm:$0xf] %vm1573_vm4, %v1482_v18  ;;  %v2168_v22 = vor.u32 %v2167_v34, %v2164_v23  ;;  %v2159_v38 = vor.u32 %v2158_v10, %v2155_v1  ;;  %v2182_v49 = vrot.slane %v2180_v2, 4  ;;  %v2185_v51 = vrot.slane %v2183_v44, 5  ;;  %v1696_v12 = vld [vmem:[%s6888_s8 + $0xe8] sm:$0xf] }
 0x11d   : > { %2368 = vrot.lane.b32.xlu1 %v2115_v20, %s6424_s13  ;;  %2366 = vrot.lane.b32.xlu0 %v2106_v21, %s6424_s13  ;;  %v1488_v43 = vpop.permute.xlu1 %1487  ;;  %v2173_v53 = vrot.slane %v2171_v36, 4  ;;  %v2176_v54 = vrot.slane %v2174_v39, 5  ;;  %v2198_v59 = vshrl.u32 %v1693_v41, 16  ;;  %v2201_v61 = vshll.u32 %v1693_v41, 16  ;;  %v1699_v21 = vld [vmem:[%s6888_s8 + $0xf4] sm:$0xf] }
 0x11e   : > { %1627 = vst.msk [vmem:[#allocation2 + $0x130] sm:$0xf] %vm1573_vm4, %v1488_v43  ;;  %v2189_v37 = vshrl.u32 %v1692_v33, 16  ;;  %v2192_v62 = vshll.u32 %v1692_v33, 16  ;;  %v2216_v35 = vshrl.u32 %v1695_v31, 16  ;;  %v2219_v40 = vshll.u32 %v1695_v31, 16 }
 0x11f   : > { %v1486_v42 = vpop.permute.xlu0 %1485  ;;  %v2207_v24 = vshrl.u32 %v1694_v58, 16  ;;  %v2210_v30 = vshll.u32 %v1694_v58, 16  ;;  %v2169_v63 = vrot.slane %v2168_v22, 4  ;;  %v2160_v0 = vrot.slane %v2159_v38, 4  ;;  %v1698_v56 = vld [vmem:[%s6888_s8 + $0xf0] sm:$0xf] }
 0x120   : > { %1626 = vst.msk [vmem:[#allocation2 + $0x12c] sm:$0xf] %vm1573_vm4, %v1486_v42  ;;  %v2186_v57 = vor.u32 %v2185_v51, %v2182_v49  ;;  %v2177_v4 = vor.u32 %v2176_v54, %v2173_v53  ;;  %v2200_v9 = vrot.slane %v2198_v59, 4  ;;  %v2203_v6 = vrot.slane %v2201_v61, 5  ;;  %v1701_v33 = vld [vmem:[%s6888_s8 + $0xfc] sm:$0xf] }
 0x121   : > { %2372 = vrot.lane.b32.xlu1 %v2133_v13, %s6424_s13  ;;  %2370 = vrot.lane.b32.xlu0 %v2124_v3, %s6424_s13  ;;  %v1492_v48 = vpop.permute.xlu1 %1491  ;;  %v2191_v7 = vrot.slane %v2189_v37, 4  ;;  %v2194_v8 = vrot.slane %v2192_v62, 5  ;;  %v2218_v15 = vrot.slane %v2216_v35, 4  ;;  %v2221_v50 = vrot.slane %v2219_v40, 5  ;;  %v1700_v43 = vld [vmem:[%s6888_s8 + $0xf8] sm:$0xf] }
 0x122   : > { %1629 = vst.msk [vmem:[#allocation2 + $0x138] sm:$0xf] %vm1573_vm4, %v1492_v48  ;;  %v2209_v16 = vrot.slane %v2207_v24, 4  ;;  %v2212_v45 = vrot.slane %v2210_v30, 5  ;;  %v2234_v17 = vshrl.u32 %v1697_v5, 16  ;;  %v2237_v52 = vshll.u32 %v1697_v5, 16 }
 0x123   : > { %v1490_v19 = vpop.permute.xlu0 %1489  ;;  %v2225_v28 = vshrl.u32 %v1696_v12, 16  ;;  %v2228_v20 = vshll.u32 %v1696_v12, 16  ;;  %v2187_v55 = vrot.slane %v2186_v57, 4  ;;  %v2178_v25 = vrot.slane %v2177_v4, 4  ;;  %v7657_v5 = vld [vmem:[%s8267_s3] ss:$0 sm:$0xff] }
 0x124   : > { %1628 = vst.msk [vmem:[#allocation2 + $0x134] sm:$0xf] %vm1573_vm4, %v1490_v19  ;;  %v2204_v26 = vor.u32 %v2203_v6, %v2200_v9  ;;  %v2195_v27 = vor.u32 %v2194_v8, %v2191_v7  ;;  %v2222_v18 = vor.u32 %v2221_v50, %v2218_v15  ;;  %v2213_v23 = vor.u32 %v2212_v45, %v2209_v16  ;;  %v7662_v9 = vld [vmem:[%s8268_s4] ss:$0 sm:$0xff]  ;;  %v2476_v7 = vld [vmem:[#allocation2 + $0x30] sm:$0xf] }
 0x125   : > { %2376 = vrot.lane.b32.xlu1 %v2151_v46, %s6424_s13  ;;  %2374 = vrot.lane.b32.xlu0 %v2142_v47, %s6424_s13  ;;  %v1496_v11 = vpop.permute.xlu1 %1495  ;;  %v2252_v34 = vshrl.u32 %v1699_v21, 16  ;;  %v2255_v1 = vshll.u32 %v1699_v21, 16  ;;  %v2236_v10 = vrot.slane %v2234_v17, 4  ;;  %v2239_v2 = vrot.slane %v2237_v52, 5  ;;  %v2473_v12 = vld [vmem:[#allocation2 + $0x2c] sm:$0xf] }
 0x126   : > { %1631 = vst.msk [vmem:[#allocation2 + $0x148] sm:$0xf] %vm1573_vm4, %v1496_v11  ;;  %v2227_v44 = vrot.slane %v2225_v28, 4  ;;  %v2230_v36 = vrot.slane %v2228_v20, 5  ;;  %v2205_v39 = vrot.slane %v2204_v26, 4  ;;  %v2196_v13 = vrot.slane %v2195_v27, 4 }
 0x127   : > { %v1494_v14 = vpop.permute.xlu0 %1493  ;;  %v2243_v3 = vshrl.u32 %v1698_v56, 16  ;;  %v2246_v41 = vshll.u32 %v1698_v56, 16  ;;  %v2223_v47 = vrot.slane %v2222_v18, 4  ;;  %v2214_v22 = vrot.slane %v2213_v23, 4  ;;  %v2482_v52 = vld [vmem:[#allocation2 + $0x38] sm:$0xf] }
 0x128   : > { %1630 = vst.msk [vmem:[#allocation2 + $0x144] sm:$0xf] %vm1573_vm4, %v1494_v14  ;;  %v2254_v38 = vrot.slane %v2252_v34, 4  ;;  %v2257_v31 = vrot.slane %v2255_v1, 5  ;;  %v2240_v49 = vor.u32 %v2239_v2, %v2236_v10  ;;  %v2231_v51 = vor.u32 %v2230_v36, %v2227_v44  ;;  %v2479_v20 = vld [vmem:[#allocation2 + $0x34] sm:$0xf] }
 0x129   : > { %2380 = vrot.lane.b32.xlu1 %v2169_v63, %s6424_s13  ;;  %2378 = vrot.lane.b32.xlu0 %v2160_v0, %s6424_s13  ;;  %v1500_v60 = vpop.permute.xlu1 %1499  ;;  %v2270_v53 = vshrl.u32 %v1701_v33, 16  ;;  %v2273_v54 = vshll.u32 %v1701_v33, 16  ;;  %v2245_v58 = vrot.slane %v2243_v3, 4  ;;  %v2248_v59 = vrot.slane %v2246_v41, 5  ;;  %v2488_v56 = vld [vmem:[#allocation2 + $0x40] sm:$0xf] }
 0x12a   : > { %1633 = vst.msk [vmem:[#allocation2 + $0x150] sm:$0xf] %vm1573_vm4, %v1500_v60  ;;  %v2261_v61 = vshrl.u32 %v1700_v43, 16  ;;  %v2264_v37 = vshll.u32 %v1700_v43, 16  ;;  %v2241_v19 = vrot.slane %v2240_v49, 4  ;;  %v2232_v35 = vrot.slane %v2231_v51, 4 }
 0x12b   : > { %v1498_v32 = vpop.permute.xlu0 %1497  ;;  %v2272_v40 = vrot.slane %v2270_v53, 4  ;;  %v2275_v24 = vrot.slane %v2273_v54, 5  ;;  %v2258_v63 = vor.u32 %v2257_v31, %v2254_v38  ;;  %v2249_v0 = vor.u32 %v2248_v59, %v2245_v58  ;;  %v2494_v1 = vld [vmem:[#allocation2 + $0x48] sm:$0xf]  ;;  %v2491_v2 = vld [vmem:[#allocation2 + $0x44] sm:$0xf] }
 0x12c   : > { %1632 = vst.msk [vmem:[#allocation2 + $0x14c] sm:$0xf] %vm1573_vm4, %v1498_v32  ;;  %v2263_v57 = vrot.slane %v2261_v61, 4  ;;  %v2266_v4 = vrot.slane %v2264_v37, 5  ;;  %v2485_v32 = vld [vmem:[#allocation2 + $0x3c] sm:$0xf] }
 0x12d   : > { %2384 = vrot.lane.b32.xlu1 %v2187_v55, %s6424_s13  ;;  %2382 = vrot.lane.b32.xlu0 %v2178_v25, %s6424_s13  ;;  %v1504_v42 = vpop.permute.xlu1 %1503  ;;  %v2259_v15 = vrot.slane %v2258_v63, 4  ;;  %v2250_v50 = vrot.slane %v2249_v0, 4  ;;  %v2276_v16 = vor.u32 %v2275_v24, %v2272_v40  ;;  %v2497_v41 = vld [vmem:[#allocation2 + $0x54] sm:$0xf]  ;;  %v2512_v51 = vld [vmem:[#allocation2 + $0x68] sm:$0xf] }
 0x12e   : > { %1635 = vst.msk [vmem:[#allocation2 + $0x158] sm:$0xf] %vm1573_vm4, %v1504_v42  ;;  %v2267_v45 = vor.u32 %v2266_v4, %v2263_v57  ;;  %v2509_v54 = vld [vmem:[#allocation2 + $0x64] sm:$0xf]  ;;  %v2518_v37 = vld [vmem:[#allocation2 + $0x70] sm:$0xf] }
 0x12f   : > { %v1502_v46 = vpop.permute.xlu0 %1501  ;;  %v2277_v25 = vrot.slane %v2276_v16, 4  ;;  %v2524_v24 = vld [vmem:[#allocation2 + $0x80] sm:$0xf]  ;;  %v2521_v0 = vld [vmem:[#allocation2 + $0x7c] sm:$0xf] }
 0x130   : > { %1634 = vst.msk [vmem:[#allocation2 + $0x154] sm:$0xf] %vm1573_vm4, %v1502_v46  ;;  %v2268_v26 = vrot.slane %v2267_v45, 4  ;;  %v2506_v46 = vld [vmem:[#allocation2 + $0x60] sm:$0xf] }
 0x131   : > { %2388 = vrot.lane.b32.xlu1 %v2205_v39, %s6424_s13  ;;  %2386 = vrot.lane.b32.xlu0 %v2196_v13, %s6424_s13  ;;  %v1508_v62 = vpop.permute.xlu1 %1507  ;;  %v2500_v13 = vld [vmem:[#allocation2 + $0x58] sm:$0xf]  ;;  %v2533_v45 = vld [vmem:[#allocation2 + $0x8c] sm:$0xf] }
 0x132   : > { %1637 = vst.msk [vmem:[#allocation2 + $0x160] sm:$0xf] %vm1573_vm4, %v1508_v62 }
 0x133   : > { %v1506_v48 = vpop.permute.xlu0 %1505 }
 0x134   : > { %1636 = vst.msk [vmem:[#allocation2 + $0x15c] sm:$0xf] %vm1573_vm4, %v1506_v48  ;;  %v2515_v48 = vld [vmem:[#allocation2 + $0x6c] sm:$0xf] }
 0x135   : > { %2392 = vrot.lane.b32.xlu1 %v2223_v47, %s6424_s13  ;;  %2390 = vrot.lane.b32.xlu0 %v2214_v22, %s6424_s13  ;;  %v2281_v6 = vpop.permute.xlu1 %2280  ;;  %v2503_v22 = vld [vmem:[#allocation2 + $0x5c] sm:$0xf] }
 0x136   : > { %v2477_v11 = vsel %vm7650_vm7, %v2281_v6, %v2476_v7  ;;  %v2530_v7 = vld [vmem:[#allocation2 + $0x88] sm:$0xf] }
 0x137   : > { %v2279_v8 = vpop.permute.xlu0 %2278  ;;  %2478 = vst [vmem:[#allocation2 + $0x30] sm:$0xf] %v2477_v11 }
 0x138   : > { %v2474_v14 = vsel %vm7650_vm7, %v2279_v8, %v2473_v12  ;;  %v2527_v12 = vld [vmem:[#allocation2 + $0x84] sm:$0xf] }
 0x139   : > { %2475 = vst [vmem:[#allocation2 + $0x2c] sm:$0xf] %v2474_v14  ;;  %2396 = vrot.lane.b32.xlu1 %v2241_v19, %s6424_s13  ;;  %2394 = vrot.lane.b32.xlu0 %v2232_v35, %s6424_s13  ;;  %v2285_v17 = vpop.permute.xlu1 %2284 }
 0x13a   : > { %v2483_v21 = vsel %vm7650_vm7, %v2285_v17, %v2482_v52 }
 0x13b   : > { %v2283_v28 = vpop.permute.xlu0 %2282  ;;  %2484 = vst [vmem:[#allocation2 + $0x38] sm:$0xf] %v2483_v21 }
 0x13c   : > { %v2480_v55 = vsel %vm7650_vm7, %v2283_v28, %v2479_v20  ;;  %v2542_v20 = vld [vmem:[#allocation2 + $0x98] sm:$0xf] }
 0x13d   : > { %2481 = vst [vmem:[#allocation2 + $0x34] sm:$0xf] %v2480_v55  ;;  %2400 = vrot.lane.b32.xlu1 %v2259_v15, %s6424_s13  ;;  %2398 = vrot.lane.b32.xlu0 %v2250_v50, %s6424_s13  ;;  %v2289_v27 = vpop.permute.xlu1 %2288  ;;  %v2536_v50 = vld [vmem:[#allocation2 + $0x90] sm:$0xf]  ;;  %v2539_v55 = vld [vmem:[#allocation2 + $0x94] sm:$0xf] }
 0x13e   : > { %v2489_v18 = vsel %vm7650_vm7, %v2289_v27, %v2488_v56  ;;  %v2548_v56 = vld [vmem:[#allocation2 + $0xa8] sm:$0xf] }
 0x13f   : > { %v2287_v60 = vpop.permute.xlu0 %2286  ;;  %2490 = vst [vmem:[#allocation2 + $0x40] sm:$0xf] %v2489_v18 }
 0x140   : > { %v2486_v23 = vsel %vm7650_vm7, %v2287_v60, %v2485_v32  ;;  %v2545_v32 = vld [vmem:[#allocation2 + $0xa4] sm:$0xf] }
 0x141   : > { %2487 = vst [vmem:[#allocation2 + $0x3c] sm:$0xf] %v2486_v23  ;;  %2404 = vrot.lane.b32.xlu1 %v2277_v25, %s6424_s13  ;;  %2402 = vrot.lane.b32.xlu0 %v2268_v26, %s6424_s13  ;;  %v2293_v34 = vpop.permute.xlu1 %2292 }
 0x142   : > { %v2495_v44 = vsel %vm7650_vm7, %v2293_v34, %v2494_v1  ;;  %v2554_v1 = vld [vmem:[#allocation2 + $0xb0] sm:$0xf] }
 0x143   : > { %v2291_v10 = vpop.permute.xlu0 %2290  ;;  %2496 = vst [vmem:[#allocation2 + $0x48] sm:$0xf] %v2495_v44 }
 0x144   : > { %v2492_v36 = vsel %vm7650_vm7, %v2291_v10, %v2491_v2  ;;  %v2551_v2 = vld [vmem:[#allocation2 + $0xac] sm:$0xf] }
 0x145   : > { %2493 = vst [vmem:[#allocation2 + $0x44] sm:$0xf] %v2492_v36  ;;  %v2297_v39 = vpop.permute.xlu1 %2296 }
 0x146   : > { %v2501_v33 = vsel %vm7650_vm7, %v2297_v39, %v2500_v13  ;;  %v2560_v13 = vld [vmem:[#allocation2 + $0xb8] sm:$0xf] }
 0x147   : > { %v2295_v3 = vpop.permute.xlu0 %2294  ;;  %2502 = vst [vmem:[#allocation2 + $0x58] sm:$0xf] %v2501_v33 }
 0x148   : > { %v2498_v43 = vsel %vm7650_vm7, %v2295_v3, %v2497_v41  ;;  %v2557_v41 = vld [vmem:[#allocation2 + $0xb4] sm:$0xf] }
 0x149   : > { %2499 = vst [vmem:[#allocation2 + $0x54] sm:$0xf] %v2498_v43  ;;  %v2301_v42 = vpop.permute.xlu1 %2300 }
 0x14a   : > { %v2507_v38 = vsel %vm7650_vm7, %v2301_v42, %v2506_v46  ;;  %v2566_v46 = vld [vmem:[#allocation2 + $0xc0] sm:$0xf] }
 0x14b   : > { %v2299_v47 = vpop.permute.xlu0 %2298  ;;  %2508 = vst [vmem:[#allocation2 + $0x60] sm:$0xf] %v2507_v38 }
 0x14c   : > { %v2504_v31 = vsel %vm7650_vm7, %v2299_v47, %v2503_v22  ;;  %v2563_v22 = vld [vmem:[#allocation2 + $0xbc] sm:$0xf] }
 0x14d   : > { %2505 = vst [vmem:[#allocation2 + $0x5c] sm:$0xf] %v2504_v31  ;;  %v2305_v49 = vpop.permute.xlu1 %2304 }
 0x14e   : > { %v2513_v58 = vsel %vm7650_vm7, %v2305_v49, %v2512_v51  ;;  %v2572_v51 = vld [vmem:[#allocation2 + $0xd0] sm:$0xf] }
 0x14f   : > { %v2303_v53 = vpop.permute.xlu0 %2302  ;;  %2514 = vst [vmem:[#allocation2 + $0x68] sm:$0xf] %v2513_v58 }
 0x150   : > { %v2510_v59 = vsel %vm7650_vm7, %v2303_v53, %v2509_v54  ;;  %v2569_v54 = vld [vmem:[#allocation2 + $0xcc] sm:$0xf] }
 0x151   : > { %2511 = vst [vmem:[#allocation2 + $0x64] sm:$0xf] %v2510_v59  ;;  %v2309_v61 = vpop.permute.xlu1 %2308 }
 0x152   : > { %v2519_v19 = vsel %vm7650_vm7, %v2309_v61, %v2518_v37  ;;  %v2578_v37 = vld [vmem:[#allocation2 + $0xd8] sm:$0xf] }
 0x153   : > { %v2307_v62 = vpop.permute.xlu0 %2306  ;;  %2520 = vst [vmem:[#allocation2 + $0x70] sm:$0xf] %v2519_v19 }
 0x154   : > { %v2516_v35 = vsel %vm7650_vm7, %v2307_v62, %v2515_v48  ;;  %v2575_v48 = vld [vmem:[#allocation2 + $0xd4] sm:$0xf] }
 0x155   : > { %2517 = vst [vmem:[#allocation2 + $0x6c] sm:$0xf] %v2516_v35  ;;  %v2313_v40 = vpop.permute.xlu1 %2312 }
 0x156   : > { %v2525_v57 = vsel %vm7650_vm7, %v2313_v40, %v2524_v24  ;;  %v2584_v24 = vld [vmem:[#allocation2 + $0xe0] sm:$0xf] }
 0x157   : > { %v2311_v63 = vpop.permute.xlu0 %2310  ;;  %2526 = vst [vmem:[#allocation2 + $0x80] sm:$0xf] %v2525_v57 }
 0x158   : > { %v2522_v4 = vsel %vm7650_vm7, %v2311_v63, %v2521_v0  ;;  %v2581_v0 = vld [vmem:[#allocation2 + $0xdc] sm:$0xf] }
 0x159   : > { %2523 = vst [vmem:[#allocation2 + $0x7c] sm:$0xf] %v2522_v4  ;;  %v2317_v6 = vpop.permute.xlu1 %2316 }
 0x15a   : > { %v2531_v11 = vsel %vm7650_vm7, %v2317_v6, %v2530_v7  ;;  %v2590_v7 = vld [vmem:[#allocation2 + $0xe8] sm:$0xf] }
 0x15b   : > { %v2315_v8 = vpop.permute.xlu0 %2314  ;;  %2532 = vst [vmem:[#allocation2 + $0x88] sm:$0xf] %v2531_v11 }
 0x15c   : > { %v2528_v14 = vsel %vm7650_vm7, %v2315_v8, %v2527_v12  ;;  %v2587_v12 = vld [vmem:[#allocation2 + $0xe4] sm:$0xf] }
 0x15d   : > { %2529 = vst [vmem:[#allocation2 + $0x84] sm:$0xf] %v2528_v14  ;;  %v2321_v15 = vpop.permute.xlu1 %2320 }
 0x15e   : > { %v2537_v17 = vsel %vm7650_vm7, %v2321_v15, %v2536_v50  ;;  %v2596_v50 = vld [vmem:[#allocation2 + $0xf8] sm:$0xf] }
 0x15f   : > { %v2319_v16 = vpop.permute.xlu0 %2318  ;;  %2538 = vst [vmem:[#allocation2 + $0x90] sm:$0xf] %v2537_v17 }
 0x160   : > { %v2534_v52 = vsel %vm7650_vm7, %v2319_v16, %v2533_v45  ;;  %v2593_v45 = vld [vmem:[#allocation2 + $0xf4] sm:$0xf] }
 0x161   : > { %2535 = vst [vmem:[#allocation2 + $0x8c] sm:$0xf] %v2534_v52  ;;  %v2325_v28 = vpop.permute.xlu1 %2324 }
 0x162   : > { %v2543_v25 = vsel %vm7650_vm7, %v2325_v28, %v2542_v20  ;;  %v2602_v20 = vld [vmem:[#allocation2 + $0x100] sm:$0xf] }
 0x163   : > { %v2323_v21 = vpop.permute.xlu0 %2322  ;;  %2544 = vst [vmem:[#allocation2 + $0x98] sm:$0xf] %v2543_v25 }
 0x164   : > { %v2540_v26 = vsel %vm7650_vm7, %v2323_v21, %v2539_v55  ;;  %v2599_v55 = vld [vmem:[#allocation2 + $0xfc] sm:$0xf] }
 0x165   : > { %2541 = vst [vmem:[#allocation2 + $0x94] sm:$0xf] %v2540_v26  ;;  %v2329_v27 = vpop.permute.xlu1 %2328 }
 0x166   : > { %v2549_v18 = vsel %vm7650_vm7, %v2329_v27, %v2548_v56  ;;  %v2608_v56 = vld [vmem:[#allocation2 + $0x108] sm:$0xf] }
 0x167   : > { %v2327_v60 = vpop.permute.xlu0 %2326  ;;  %2550 = vst [vmem:[#allocation2 + $0xa8] sm:$0xf] %v2549_v18 }
 0x168   : > { %v2546_v23 = vsel %vm7650_vm7, %v2327_v60, %v2545_v32  ;;  %v2605_v32 = vld [vmem:[#allocation2 + $0x104] sm:$0xf] }
 0x169   : > { %2547 = vst [vmem:[#allocation2 + $0xa4] sm:$0xf] %v2546_v23  ;;  %v2333_v34 = vpop.permute.xlu1 %2332 }
 0x16a   : > { %v2555_v44 = vsel %vm7650_vm7, %v2333_v34, %v2554_v1  ;;  %v2614_v1 = vld [vmem:[#allocation2 + $0x110] sm:$0xf] }
 0x16b   : > { %v2331_v10 = vpop.permute.xlu0 %2330  ;;  %2556 = vst [vmem:[#allocation2 + $0xb0] sm:$0xf] %v2555_v44 }
 0x16c   : > { %v2552_v36 = vsel %vm7650_vm7, %v2331_v10, %v2551_v2  ;;  %v2611_v2 = vld [vmem:[#allocation2 + $0x10c] sm:$0xf] }
 0x16d   : > { %2553 = vst [vmem:[#allocation2 + $0xac] sm:$0xf] %v2552_v36  ;;  %v2337_v39 = vpop.permute.xlu1 %2336 }
 0x16e   : > { %v2561_v33 = vsel %vm7650_vm7, %v2337_v39, %v2560_v13  ;;  %v2620_v13 = vld [vmem:[#allocation2 + $0x120] sm:$0xf] }
 0x16f   : > { %v2335_v3 = vpop.permute.xlu0 %2334  ;;  %2562 = vst [vmem:[#allocation2 + $0xb8] sm:$0xf] %v2561_v33 }
 0x170   : > { %v2558_v43 = vsel %vm7650_vm7, %v2335_v3, %v2557_v41  ;;  %v2617_v41 = vld [vmem:[#allocation2 + $0x11c] sm:$0xf] }
 0x171   : > { %2559 = vst [vmem:[#allocation2 + $0xb4] sm:$0xf] %v2558_v43  ;;  %v2341_v42 = vpop.permute.xlu1 %2340 }
 0x172   : > { %v2567_v38 = vsel %vm7650_vm7, %v2341_v42, %v2566_v46  ;;  %v2626_v46 = vld [vmem:[#allocation2 + $0x128] sm:$0xf] }
 0x173   : > { %v2339_v47 = vpop.permute.xlu0 %2338  ;;  %2568 = vst [vmem:[#allocation2 + $0xc0] sm:$0xf] %v2567_v38 }
 0x174   : > { %v2564_v31 = vsel %vm7650_vm7, %v2339_v47, %v2563_v22  ;;  %v2623_v22 = vld [vmem:[#allocation2 + $0x124] sm:$0xf] }
 0x175   : > { %2565 = vst [vmem:[#allocation2 + $0xbc] sm:$0xf] %v2564_v31  ;;  %v2345_v49 = vpop.permute.xlu1 %2344 }
 0x176   : > { %v2573_v58 = vsel %vm7650_vm7, %v2345_v49, %v2572_v51  ;;  %v2632_v51 = vld [vmem:[#allocation2 + $0x130] sm:$0xf] }
 0x177   : > { %v2343_v53 = vpop.permute.xlu0 %2342  ;;  %2574 = vst [vmem:[#allocation2 + $0xd0] sm:$0xf] %v2573_v58 }
 0x178   : > { %v2570_v59 = vsel %vm7650_vm7, %v2343_v53, %v2569_v54  ;;  %v2629_v54 = vld [vmem:[#allocation2 + $0x12c] sm:$0xf] }
 0x179   : > { %2571 = vst [vmem:[#allocation2 + $0xcc] sm:$0xf] %v2570_v59 }
 0x17b   : > { %v2349_v61 = vpop.permute.xlu1 %2348  ;;  %v2347_v62 = vpop.permute.xlu0 %2346 }
 0x17c   : > { %v2579_v19 = vsel %vm7650_vm7, %v2349_v61, %v2578_v37  ;;  %v2576_v35 = vsel %vm7650_vm7, %v2347_v62, %v2575_v48  ;;  %v2638_v37 = vld [vmem:[#allocation2 + $0x138] sm:$0xf]  ;;  %v2635_v48 = vld [vmem:[#allocation2 + $0x134] sm:$0xf] }
 0x17d   : > { %2580 = vst [vmem:[#allocation2 + $0xd8] sm:$0xf] %v2579_v19  ;;  %2577 = vst [vmem:[#allocation2 + $0xd4] sm:$0xf] %v2576_v35 }
 0x17f   : > { %v2353_v40 = vpop.permute.xlu1 %2352  ;;  %v2351_v63 = vpop.permute.xlu0 %2350 }
 0x180   : > { %v2585_v57 = vsel %vm7650_vm7, %v2353_v40, %v2584_v24  ;;  %v2582_v4 = vsel %vm7650_vm7, %v2351_v63, %v2581_v0  ;;  %v2644_v24 = vld [vmem:[#allocation2 + $0x148] sm:$0xf]  ;;  %v2641_v0 = vld [vmem:[#allocation2 + $0x144] sm:$0xf] }
 0x181   : > { %2586 = vst [vmem:[#allocation2 + $0xe0] sm:$0xf] %v2585_v57  ;;  %2583 = vst [vmem:[#allocation2 + $0xdc] sm:$0xf] %v2582_v4 }
 0x183   : > { %v2357_v6 = vpop.permute.xlu1 %2356  ;;  %v2355_v8 = vpop.permute.xlu0 %2354 }
 0x184   : > { %v2591_v11 = vsel %vm7650_vm7, %v2357_v6, %v2590_v7  ;;  %v2588_v14 = vsel %vm7650_vm7, %v2355_v8, %v2587_v12  ;;  %v2650_v7 = vld [vmem:[#allocation2 + $0x150] sm:$0xf]  ;;  %v2647_v12 = vld [vmem:[#allocation2 + $0x14c] sm:$0xf] }
 0x185   : > { %2592 = vst [vmem:[#allocation2 + $0xe8] sm:$0xf] %v2591_v11  ;;  %2589 = vst [vmem:[#allocation2 + $0xe4] sm:$0xf] %v2588_v14 }
 0x187   : > { %v2361_v15 = vpop.permute.xlu1 %2360  ;;  %v2359_v16 = vpop.permute.xlu0 %2358 }
 0x188   : > { %v2597_v17 = vsel %vm7650_vm7, %v2361_v15, %v2596_v50  ;;  %v2594_v52 = vsel %vm7650_vm7, %v2359_v16, %v2593_v45  ;;  %v2656_v50 = vld [vmem:[#allocation2 + $0x158] sm:$0xf]  ;;  %v2653_v45 = vld [vmem:[#allocation2 + $0x154] sm:$0xf] }
 0x189   : > { %2598 = vst [vmem:[#allocation2 + $0xf8] sm:$0xf] %v2597_v17  ;;  %2595 = vst [vmem:[#allocation2 + $0xf4] sm:$0xf] %v2594_v52 }
 0x18b   : > { %v2365_v28 = vpop.permute.xlu1 %2364  ;;  %v2363_v21 = vpop.permute.xlu0 %2362 }
 0x18c   : > { %v2603_v25 = vsel %vm7650_vm7, %v2365_v28, %v2602_v20  ;;  %v2600_v26 = vsel %vm7650_vm7, %v2363_v21, %v2599_v55  ;;  %v2662_v20 = vld [vmem:[#allocation2 + $0x160] sm:$0xf]  ;;  %v2659_v55 = vld [vmem:[#allocation2 + $0x15c] sm:$0xf] }
 0x18d   : > { %2604 = vst [vmem:[#allocation2 + $0x100] sm:$0xf] %v2603_v25  ;;  %2601 = vst [vmem:[#allocation2 + $0xfc] sm:$0xf] %v2600_v26 }
 0x18f   : > { %v2369_v27 = vpop.permute.xlu1 %2368  ;;  %v2367_v60 = vpop.permute.xlu0 %2366 }
 0x190   : > { %v2609_v18 = vsel %vm7650_vm7, %v2369_v27, %v2608_v56  ;;  %v2606_v23 = vsel %vm7650_vm7, %v2367_v60, %v2605_v32 }
 0x191   : > { %2610 = vst [vmem:[#allocation2 + $0x108] sm:$0xf] %v2609_v18  ;;  %2607 = vst [vmem:[#allocation2 + $0x104] sm:$0xf] %v2606_v23 }
 0x193   : > { %v2373_v34 = vpop.permute.xlu1 %2372  ;;  %v2371_v10 = vpop.permute.xlu0 %2370 }
 0x194   : > { %v2615_v44 = vsel %vm7650_vm7, %v2373_v34, %v2614_v1  ;;  %v2612_v36 = vsel %vm7650_vm7, %v2371_v10, %v2611_v2 }
 0x195   : > { %2616 = vst [vmem:[#allocation2 + $0x110] sm:$0xf] %v2615_v44  ;;  %2613 = vst [vmem:[#allocation2 + $0x10c] sm:$0xf] %v2612_v36 }
 0x197   : > { %v2377_v39 = vpop.permute.xlu1 %2376  ;;  %v2375_v3 = vpop.permute.xlu0 %2374 }
 0x198   : > { %v2621_v33 = vsel %vm7650_vm7, %v2377_v39, %v2620_v13  ;;  %v2618_v43 = vsel %vm7650_vm7, %v2375_v3, %v2617_v41 }
 0x199   : > { %2622 = vst [vmem:[#allocation2 + $0x120] sm:$0xf] %v2621_v33  ;;  %2619 = vst [vmem:[#allocation2 + $0x11c] sm:$0xf] %v2618_v43 }
 0x19b   : > { %v2381_v42 = vpop.permute.xlu1 %2380  ;;  %v2379_v47 = vpop.permute.xlu0 %2378 }
 0x19c   : > { %v2627_v38 = vsel %vm7650_vm7, %v2381_v42, %v2626_v46  ;;  %v2624_v31 = vsel %vm7650_vm7, %v2379_v47, %v2623_v22 }
 0x19d   : > { %2628 = vst [vmem:[#allocation2 + $0x128] sm:$0xf] %v2627_v38  ;;  %2625 = vst [vmem:[#allocation2 + $0x124] sm:$0xf] %v2624_v31 }
 0x19f   : > { %v2385_v49 = vpop.permute.xlu1 %2384  ;;  %v2383_v53 = vpop.permute.xlu0 %2382 }
 0x1a0   : > { %v2633_v58 = vsel %vm7650_vm7, %v2385_v49, %v2632_v51  ;;  %v2630_v59 = vsel %vm7650_vm7, %v2383_v53, %v2629_v54 }
 0x1a1   : > { %2634 = vst [vmem:[#allocation2 + $0x130] sm:$0xf] %v2633_v58  ;;  %2631 = vst [vmem:[#allocation2 + $0x12c] sm:$0xf] %v2630_v59 }
 0x1a3   : > { %v2389_v61 = vpop.permute.xlu1 %2388  ;;  %v2387_v62 = vpop.permute.xlu0 %2386 }
 0x1a4   : > { %v2639_v19 = vsel %vm7650_vm7, %v2389_v61, %v2638_v37  ;;  %v2636_v35 = vsel %vm7650_vm7, %v2387_v62, %v2635_v48 }
 0x1a5   : > { %2640 = vst [vmem:[#allocation2 + $0x138] sm:$0xf] %v2639_v19  ;;  %2637 = vst [vmem:[#allocation2 + $0x134] sm:$0xf] %v2636_v35 }
 0x1a7   : > { %v2393_v40 = vpop.permute.xlu1 %2392  ;;  %v2391_v63 = vpop.permute.xlu0 %2390 }
 0x1a8   : > { %v2645_v57 = vsel %vm7650_vm7, %v2393_v40, %v2644_v24  ;;  %v2642_v4 = vsel %vm7650_vm7, %v2391_v63, %v2641_v0 }
 0x1a9   : > { %2646 = vst [vmem:[#allocation2 + $0x148] sm:$0xf] %v2645_v57  ;;  %2643 = vst [vmem:[#allocation2 + $0x144] sm:$0xf] %v2642_v4 }
 0x1ab   : > { %v2397_v6 = vpop.permute.xlu1 %2396  ;;  %v2395_v8 = vpop.permute.xlu0 %2394 }
 0x1ac   : > { %v2651_v11 = vsel %vm7650_vm7, %v2397_v6, %v2650_v7  ;;  %v2648_v14 = vsel %vm7650_vm7, %v2395_v8, %v2647_v12 }
 0x1ad   : > { %2652 = vst [vmem:[#allocation2 + $0x150] sm:$0xf] %v2651_v11  ;;  %2649 = vst [vmem:[#allocation2 + $0x14c] sm:$0xf] %v2648_v14 }
 0x1af   : > { %v2401_v15 = vpop.permute.xlu1 %2400  ;;  %v2399_v16 = vpop.permute.xlu0 %2398 }
 0x1b0   : > { %v2657_v17 = vsel %vm7650_vm7, %v2401_v15, %v2656_v50  ;;  %v2654_v52 = vsel %vm7650_vm7, %v2399_v16, %v2653_v45 }
 0x1b1   : > { %2658 = vst [vmem:[#allocation2 + $0x158] sm:$0xf] %v2657_v17  ;;  %2655 = vst [vmem:[#allocation2 + $0x154] sm:$0xf] %v2654_v52 }
 0x1b3   : > { %v2405_v28 = vpop.permute.xlu1 %2404  ;;  %v2403_v21 = vpop.permute.xlu0 %2402 }
 0x1b4   : > { %v2663_v25 = vsel %vm7650_vm7, %v2405_v28, %v2662_v20  ;;  %v2660_v26 = vsel %vm7650_vm7, %v2403_v21, %v2659_v55 }
 0x1b5   : > { %2664 = vst [vmem:[#allocation2 + $0x160] sm:$0xf] %v2663_v25  ;;  %2661 = vst [vmem:[#allocation2 + $0x15c] sm:$0xf] %v2660_v26 }
 0x1b6 LB: >> { %v6308_v27 = vld [vmem:[%s8265_s1 + $0x8] sm:$0x3f]   ;;  %vm2738_vm8 = vcmask 1045504   ;;  %vm2725_vm9 = vcmask 97280   ;;  %v7810_v56 = vld [vmem:[%s8265_s1 + $0x20] sm:$0x3f]   ;;  %s6416_s18 = sphi %s7798_s18, %s2672_s18  }
 0x1b7   : >> { %6259 = vmatprep.subr.msk.bf16.mxu1 %vm2738_vm8, %v6308_v27  ;;  %v2740_v60 = vsel %vm2738_vm8, %v6308_v27, 0  ;;  %s5827_s23 = smul.u32 40, %s6416_s18  ;;  %v6311_v32 = vld [vmem:[%s8265_s1] sm:$0x3f]   ;;  %6263 = vmatprep.subr.msk.bf16.mxu0 %vm2738_vm8, %v7810_v56  ;;  %v7821_v18 = vsel %vm2738_vm8, %v7810_v56, 0  ;;  %s6425_s20 = smov 4  }
 0x1b8   : >> { %5948 = vmatpush3.bf16.msra.mxu1 %v2740_v60  ;;  %v6313_v23 = vld [vmem:[%s8265_s1 + $0x28] sm:$0x3f]   ;;  %5988 = vmatpush3.bf16.msra.mxu0 %v7821_v18  ;;  %v2845_v2 = vsel %vm2738_vm8, %v6311_v32, 0  ;;  %v6319_v3 = vld [vmem:[%s8265_s1 + $0x30] sm:$0x3f]   ;;  %s6426_s21 = smov 8  }
 0x1b9   : >> { %s7829_s29 = scalar_lea.vmem [#allocation2], %s5827_s23  ;;  %6260 = vmatprep.subr.msk.bf16.mxu1 %vm2738_vm8, %v6311_v32  ;;  %6265 = vmatprep.subr.msk.bf16.mxu0 %vm2738_vm8, %v6313_v23  ;;  %v3346_v36 = vsel %vm2738_vm8, %v6313_v23, 0  ;;  %v6322_v43 = vld [vmem:[%s8265_s1 + $0x10] sm:$0x3f]   ;;  %v3474_v47 = vsel %vm2738_vm8, %v6319_v3, 0  ;;  %s7975_s22 = scalar_lea.vmem [#allocation3], %s5827_s23 }
 0x1ba   : >> { %v6329_v31 = vld [vmem:[%s8265_s1 + $0x38] sm:$0x3f]   ;;  %v2964_v49 = vsel %vm2738_vm8, %v6322_v43, 0  ;;  %v6339_v48 = vld [vmem:[%s8265_s1 + $0x40] sm:$0x3f]   ;;  %s2672_s18 = sadd.s32 1, %s6416_s18  }
 0x1bb   : >> { %v6332_v51 = vld [vmem:[%s8265_s1 + $0x18] sm:$0x3f]   ;;  %v3601_v37 = vsel %vm2738_vm8, %v6329_v31, 0  ;;  %v3728_v7 = vsel %vm2738_vm8, %v6339_v48, 0  ;;  %p2669_p4 = scmp.ge.s32.totalorder %s2672_s18, 8  }
 0x1bc   : >> { %v6310_v34 = vld [vmem:[%s7829_s29 + $0x4] sm:$0xff]   ;;  %v6312_v1 = vld [vmem:[%s7829_s29 + $0x2c] sm:$0xff]   ;;  %v6315_v44 = vld [vmem:[%s7829_s29 + $0x34] sm:$0xff]   ;;  %v3092_v40 = vsel %vm2738_vm8, %v6332_v51, 0  ;;  %s8079_s28 = smov (%p2669_p4), 0  }
 0x1bd   : >> { %5949 = vmatprep.mubr.msk.bf16.mxu1 %vm2725_vm9, %v6310_v34  ;;  %v6314_v10 = vld [vmem:[%s7829_s29 + $0xc] sm:$0xff]   ;;  %5989 = vmatprep.mubr.msk.bf16.mxu0 %vm2725_vm9, %v6312_v1  ;;  %v6316_v39 = vld [vmem:[%s7829_s29 + $0x14] sm:$0xff]   ;;  %v6317_v41 = vld [vmem:[%s7829_s29 + $0x1c] sm:$0xff]  }
 0x1be   : >> { %5950 = vmatmul.mubr.msk.bf16.vlgmr.msra.gmra.mrb[0].mxu1 %vm2725_vm9, %v6314_v10  ;;  %5990 = vmatmul.mubr.msk.bf16.vlgmr.msra.gmra.mrb[0].mxu0 %vm2725_vm9, %v6315_v44  ;;  %v6318_v13 = vld [vmem:[%s7829_s29 + $0x30] sm:$0xff]   ;;  %v6321_v33 = vld [vmem:[%s7829_s29] sm:$0xff]   ;;  %v6320_v42 = vld [vmem:[%s7829_s29 + $0x38] sm:$0xff]  }
 0x1bf   : >> { %5958 = vmatpush3.bf16.msra.mxu1 %v2845_v2  ;;  %5998 = vmatpush3.bf16.msra.mxu0 %v3346_v36  ;;  %v6324_v46 = vld [vmem:[%s7829_s29 + $0x40] sm:$0xff]   ;;  %v6323_v22 = vld [vmem:[%s7829_s29 + $0x8] sm:$0xff]   ;;  %v6326_v38 = vld [vmem:[%s7829_s29 + $0x10] sm:$0xff]  }
 0x1c0   : >> { %5953 = vmatprep.mubr.msk.bf16.mxu1 %vm2725_vm9, %v6316_v39  ;;  %5999 = vmatprep.mubr.msk.bf16.mxu0 %vm2725_vm9, %v6318_v13  ;;  %v6325_v53 = vld [vmem:[%s7829_s29 + $0x48] sm:$0xff]   ;;  %v6328_v54 = vld [vmem:[%s7829_s29 + $0x50] sm:$0xff]   ;;  %v6327_v58 = vld [vmem:[%s7829_s29 + $0x18] sm:$0xff]  }
 0x1c1   : >> { %6266 = vmatprep.subr.msk.bf16.mxu0 %vm2738_vm8, %v6319_v3  ;;  %6261 = vmatprep.subr.msk.bf16.mxu1 %vm2738_vm8, %v6322_v43  ;;  %v6331_v59 = vld [vmem:[%s7829_s29 + $0x8] sm:$0xff]   ;;  %v6330_v61 = vld [vmem:[%s7829_s29 + $0x58] sm:$0xff]   ;;  %v6334_v62 = vld [vmem:[%s7829_s29 + $0x60] sm:$0xff]  }
 0x1c2   : >> { %v6333_v19 = vld [vmem:[%s7829_s29 + $0x10] sm:$0xff]   ;;  %v6336_v35 = vld [vmem:[%s7829_s29 + $0x18] sm:$0xff]   ;;  %v6335_v24 = vld [vmem:[%s7829_s29 + $0x68] sm:$0xff]  }
 0x1c3   : >> { %v6338_v63 = vld [vmem:[%s7829_s29 + $0x54] sm:$0xff]   ;;  %v6337_v0 = vld [vmem:[%s7829_s29 + $0x20] sm:$0xff]   ;;  %v6341_v57 = vld [vmem:[%s7829_s29 + $0x28] sm:$0xff]  }
 0x1c4   : >> { %v6340_v4 = vld [vmem:[%s7829_s29 + $0x5c] sm:$0xff]   ;;  %v6343_v6 = vld [vmem:[%s7829_s29 + $0x64] sm:$0xff]   ;;  %v6342_v8 = vld [vmem:[%s7829_s29 + $0x30] sm:$0xff]  }
 0x1c5   : >> { %v6345_v12 = vld [vmem:[%s7829_s29 + $0x38] sm:$0xff]   ;;  %v6344_v11 = vld [vmem:[%s7829_s29 + $0x6c] sm:$0xff]   ;;  %v6346_v15 = vld [vmem:[%s7829_s29 + $0x40] sm:$0xff]  }
 0x1c6   : >> { %5954 = vmatmul.mubr.msk.bf16.gmra.mrb[4].mxu1 %vm2725_vm9, %v6317_v41  ;;  %v6347_v14 = vld [vmem:[%s7829_s29 + $0x58] sm:$0xff]   ;;  %v6348_v16 = vld [vmem:[%s7829_s29 + $0x60] sm:$0xff]   ;;  %v6350_v45 = vld [vmem:[%s7829_s29 + $0x68] sm:$0xff]  }
 0x1c7   : >> { %5959 = vmatprep.mubr.msk.bf16.mxu1 %vm2725_vm9, %v6321_v33  ;;  %v6349_v50 = vld [vmem:[%s7829_s29 + $0x3c] sm:$0xff]   ;;  %v6351_v17 = vld [vmem:[%s7829_s29 + $0x44] sm:$0xff]   ;;  %v6352_v52 = vld [vmem:[%s7829_s29 + $0x70] sm:$0xff]  }
 0x1ca   : >> { %6000 = vmatmul.mubr.msk.bf16.vlgmr.msra.gmra.mrb[0].mxu0 %vm2725_vm9, %v6320_v42 }
 0x1cb   : >> { %6008 = vmatpush3.bf16.msra.mxu0 %v3474_v47  ;;  %6003 = vmatprep.mubr.msk.bf16.mxu0 %vm2725_vm9, %v6324_v46 }
 0x1cc   : >> { %6267 = vmatprep.subr.msk.bf16.mxu0 %vm2738_vm8, %v6329_v31 }
 0x1ce   : >> { %5960 = vmatmul.mubr.msk.bf16.vlgmr.msra.gmra.mrb[0].mxu1 %vm2725_vm9, %v6323_v22 }
 0x1cf   : >> { %5968 = vmatpush3.bf16.msra.mxu1 %v2964_v49  ;;  %5963 = vmatprep.mubr.msk.bf16.mxu1 %vm2725_vm9, %v6326_v38 }
 0x1d0   : >> { %6262 = vmatprep.subr.msk.bf16.mxu1 %vm2738_vm8, %v6332_v51 }
 0x1d2   : >> { %6004 = vmatmul.mubr.msk.bf16.gmra.mrb[4].mxu0 %vm2725_vm9, %v6325_v53 }
 0x1d3   : >> { %6009 = vmatprep.mubr.msk.bf16.mxu0 %vm2725_vm9, %v6328_v54 }
 0x1d6   : >> { %5964 = vmatmul.mubr.msk.bf16.gmra.mrb[4].mxu1 %vm2725_vm9, %v6327_v58 }
 0x1d7   : >> { %5969 = vmatprep.mubr.msk.bf16.mxu1 %vm2725_vm9, %v6331_v59 }
 0x1da   : >> { %6010 = vmatmul.mubr.msk.bf16.vlgmr.msra.gmra.mrb[0].mxu0 %vm2725_vm9, %v6330_v61 }
 0x1db   : >> { %6018 = vmatpush3.bf16.msra.mxu0 %v3601_v37  ;;  %6013 = vmatprep.mubr.msk.bf16.mxu0 %vm2725_vm9, %v6334_v62 }
 0x1dc   : >> { %6268 = vmatprep.subr.msk.bf16.mxu0 %vm2738_vm8, %v6339_v48 }
 0x1de   : >> { %5970 = vmatmul.mubr.msk.bf16.vlgmr.msra.gmra.mrb[0].mxu1 %vm2725_vm9, %v6333_v19 }
 0x1df   : >> { %5978 = vmatpush3.bf16.msra.mxu1 %v3092_v40  ;;  %5973 = vmatprep.mubr.msk.bf16.mxu1 %vm2725_vm9, %v6336_v35 }
 0x1e0   : >> { %6264 = vmatprep.subr.msk.bf16.mxu1 %vm2738_vm8, %v7810_v56 }
 0x1e2   : >> { %6014 = vmatmul.mubr.msk.bf16.gmra.mrb[4].mxu0 %vm2725_vm9, %v6335_v24 }
 0x1e3   : >> { %6019 = vmatprep.mubr.msk.bf16.mxu0 %vm2725_vm9, %v6338_v63 }
 0x1e6   : >> { %5974 = vmatmul.mubr.msk.bf16.gmra.mrb[4].mxu1 %vm2725_vm9, %v6337_v0 }
 0x1e7   : >> { %5979 = vmatprep.mubr.msk.bf16.mxu1 %vm2725_vm9, %v6341_v57 }
 0x1ea   : >> { %6020 = vmatmul.mubr.msk.bf16.vlgmr.msra.gmra.mrb[0].mxu0 %vm2725_vm9, %v6340_v4 }
 0x1eb   : >> { %6028 = vmatpush3.bf16.msra.mxu0 %v3728_v7  ;;  %6023 = vmatprep.mubr.msk.bf16.mxu0 %vm2725_vm9, %v6343_v6 }
 0x1ee   : >> { %5980 = vmatmul.mubr.msk.bf16.vlgmr.msra.gmra.mrb[0].mxu1 %vm2725_vm9, %v6342_v8 }
 0x1ef   : >> { %6128 = vmatpush3.bf16.msra.mxu1 %v7821_v18  ;;  %5983 = vmatprep.mubr.msk.bf16.mxu1 %vm2725_vm9, %v6345_v12 }
 0x1f2   : >> { %6024 = vmatmul.mubr.msk.bf16.gmra.mrb[4].mxu0 %vm2725_vm9, %v6344_v11 }
 0x1f3   : >> { %6029 = vmatprep.mubr.msk.bf16.mxu0 %vm2725_vm9, %v6347_v14 }
 0x1f6   : >> { %5984 = vmatmul.mubr.msk.bf16.gmra.mrb[4].mxu1 %vm2725_vm9, %v6346_v15 }
 0x1f7   : >> { %5993 = vmatprep.mubr.msk.bf16.mxu1 %vm2725_vm9, %v6349_v50 }
 0x1fa   : >> { %6030 = vmatmul.mubr.msk.bf16.vlgmr.msra.gmra.mrb[0].mxu0 %vm2725_vm9, %v6348_v16 }
 0x1fb   : >> { %6033 = vmatprep.mubr.msk.bf16.mxu0 %vm2725_vm9, %v6350_v45 }
 0x202   : >> { %5994 = vmatmul.mubr.msk.bf16.vlgmr.msra.gmra.mrb[4].mxu1 %vm2725_vm9, %v6351_v17  ;;  %6034 = vmatmul.mubr.msk.bf16.gmra.mrb[4].mxu0 %vm2725_vm9, %v6352_v52 }
 0x2c1   : >> { %v5981_v28 = vpop.f32.mrb[0].mxu1 }
 0x2c2   : >> { %v3128_v20 = vpop.f32.mrb[1].mxu1 }
 0x2c3   : >> { %v5982_v21 = vpop.f32.mrb[2].mxu1 }
 0x2c4   : >> { %v3131_v55 = vpop.f32.mrb[3].mxu1 }
 0x2cd   : >> { %v6031_v25 = vpop.f32.mrb[0].mxu0 }
 0x2ce   : >> { %v6129_v26 = vadd.f32 %v6031_v25, %v5981_v28  ;;  %v3764_v27 = vpop.f32.mrb[1].mxu0 }
 0x2cf   : >> { %v6130_v56 = vadd.f32 %v3764_v27, %v3128_v20  ;;  %v6032_v60 = vpop.f32.mrb[2].mxu0 }
 0x2d0   : >> { %v3811_v32 = vmul.f32 %v6129_v26, %v7657_v5  ;;  %v6131_v18 = vadd.f32 %v6032_v60, %v5982_v21  ;;  %v3767_v23 = vpop.f32.mrb[3].mxu0 }
 0x2d1   : >> { %v3809_v34 = vmul.f32 %v6130_v56, %v7657_v5  ;;  %v6132_v1 = vadd.f32 %v3767_v23, %v3131_v55 }
 0x2d2   : >> { %v3825_v10 = vadd.f32 %v7662_v9, %v3811_v32  ;;  %v3812_v2 = vmul.f32 %v6131_v18, %v7657_v5 }
 0x2d3   : >> { %v3823_v44 = vadd.f32 %v7662_v9, %v3809_v34  ;;  %v3810_v36 = vmul.f32 %v6132_v1, %v7657_v5 }
 0x2d4   : >> { %v3833_v39 = vmax.f32 %v3825_v10, 0.0  ;;  %v3826_v13 = vadd.f32 %v7662_v9, %v3812_v2 }
 0x2d5   : >> { %v5995_v3 = vpop.f32.mrb[4].mxu1  ;;  %v3831_v41 = vmax.f32 %v3823_v44, 0.0  ;;  %v3824_v33 = vadd.f32 %v7662_v9, %v3810_v36  ;;  %v6035_v43 = vpop.f32.mrb[4].mxu0 }
 0x2d6   : >> { %v3271_v42 = vpop.f32.mrb[5].mxu1  ;;  %v5830_v46 = vpack.c.bf16 %v3833_v39, %v3833_v39  ;;  %v3834_v47 = vmax.f32 %v3826_v13, 0.0  ;;  %v6133_v22 = vadd.f32 %v6035_v43, %v5995_v3  ;;  %v3780_v38 = vpop.f32.mrb[5].mxu0 }
 0x2d7   : >> { %v5996_v31 = vpop.f32.mrb[6].mxu1  ;;  %v5828_v49 = vpack.c.bf16 %v3831_v41, %v3831_v41  ;;  %v3832_v51 = vmax.f32 %v3824_v33, 0.0  ;;  %v6134_v53 = vadd.f32 %v3780_v38, %v3271_v42  ;;  %v6036_v54 = vpop.f32.mrb[6].mxu0 }
 0x2d8   : >> { %v3274_v58 = vpop.f32.mrb[7].mxu1  ;;  %v5831_v59 = vpack.c.bf16 %v3834_v47, %v3834_v47  ;;  %v3815_v61 = vmul.f32 %v6133_v22, %v7657_v5  ;;  %v3783_v37 = vpop.f32.mrb[7].mxu0  ;;  %3965 = vrot.lane.b32.xlu1 %v5830_v46, %s6425_s20  ;;  %v3886_v62 = vshrl.u32 %v5830_v46, 16  ;;  %v3889_v40 = vshll.u32 %v5830_v46, 16 }
 0x2d9   : >> { %v3813_v48 = vmul.f32 %v6134_v53, %v7657_v5  ;;  %3961 = vrot.lane.b32.xlu0 %v5828_v49, %s6425_s20  ;;  %v3872_v19 = vshrl.u32 %v5828_v49, 16  ;;  %v7948_v24 = vpack.c.bf16 %v3832_v51, %v3832_v51  ;;  %v3875_v0 = vshll.u32 %v5828_v49, 16 }
 0x2da   : >> { %v3829_v35 = vadd.f32 %v7662_v9, %v3815_v61  ;;  %v3893_v57 = vshrl.u32 %v5831_v59, 16  ;;  %v6135_v6 = vadd.f32 %v6036_v54, %v5996_v31  ;;  %v3888_v7 = vrot.slane %v3886_v62, 7  ;;  %v5614_v54 = vld [vmem:[%s7975_s22 + $0x34] sm:$0xf] }
 0x2db   : >> { %v3827_v63 = vadd.f32 %v7662_v9, %v3813_v48  ;;  %v3896_v8 = vshll.u32 %v5831_v59, 16  ;;  %v6136_v11 = vadd.f32 %v3783_v37, %v3274_v58  ;;  %v3874_v14 = vrot.slane %v3872_v19, 7 }
 0x2dc   : >> { %v3837_v4 = vmax.f32 %v3829_v35, 0.0  ;;  %3967 = vrot.lane.b32.xlu1 %v5831_v59, %s6425_s20  ;;  %v3816_v50 = vmul.f32 %v6135_v6, %v7657_v5  ;;  %v4001_v16 = vrot.slane %v3886_v62, 4  ;;  %v3879_v45 = vshrl.u32 %v7948_v24, 16  ;;  %v5610_v62 = vld [vmem:[%s7975_s22 + $0x2c] sm:$0xf] }
 0x2dd   : >> { %v3835_v12 = vmax.f32 %v3827_v63, 0.0  ;;  %3963 = vrot.lane.b32.xlu0 %v7948_v24, %s6425_s20  ;;  %v3814_v52 = vmul.f32 %v6136_v11, %v7657_v5  ;;  %v4002_v28 = vrot.slane %v3889_v40, 5  ;;  %v3895_v20 = vrot.slane %v3893_v57, 7  ;;  %v5612_v63 = vld [vmem:[%s7975_s22 + $0x30] sm:$0xf] }
 0x2de   : >> { %v7954_v15 = vpack.c.bf16 %v3837_v4, %v3837_v4  ;;  %v3882_v21 = vshll.u32 %v7948_v24, 16  ;;  %v3830_v55 = vadd.f32 %v7662_v9, %v3816_v50  ;;  %v4005_v25 = vrot.slane %v3893_v57, 4  ;;  %v5616_v24 = vld [vmem:[%s7975_s22 + $0x38] sm:$0xf]  ;;  %v5624_v50 = vld [vmem:[%s7975_s22 + $0x48] sm:$0xf] }
 0x2df   : >> { %v5832_v17 = vpack.c.bf16 %v3835_v12, %v3835_v12  ;;  %v3828_v56 = vadd.f32 %v7662_v9, %v3814_v52  ;;  %v4003_v60 = vor.u32 %v4002_v28, %v4001_v16  ;;  %v3891_v32 = vor.u32 %v3889_v40, %v3888_v7  ;;  %v5622_v7 = vld [vmem:[%s7975_s22 + $0x44] sm:$0xf]  ;;  %v5620_v16 = vld [vmem:[%s7975_s22 + $0x40] sm:$0xf] }
 0x2e0   : >> { %v3914_v26 = vshrl.u32 %v7954_v15, 16  ;;  %v3838_v18 = vmax.f32 %v3830_v55, 0.0  ;;  %v4006_v23 = vrot.slane %v3896_v8, 5  ;;  %v3993_v34 = vrot.slane %v3872_v19, 4 }
 0x2e1   : >> { %v3900_v27 = vshrl.u32 %v5832_v17, 16  ;;  %3973 = vrot.lane.b32.xlu0 %v7954_v15, %s6425_s20  ;;  %v3877_v1 = vor.u32 %v3875_v0, %v3874_v14  ;;  %v3836_v10 = vmax.f32 %v3828_v56, 0.0  ;;  %v4004_v2 = vrot.slane %v4003_v60, 4 }
 0x2e2   : >> { %v3994_v44 = vrot.slane %v3875_v0, 5  ;;  %v3881_v36 = vrot.slane %v3879_v45, 7  ;;  %v3903_v39 = vshll.u32 %v5832_v17, 16  ;;  %v7965_v13 = vpack.c.bf16 %v3838_v18, %v3838_v18 }
 0x2e3   : >> { %v4007_v3 = vor.u32 %v4006_v23, %v4005_v25  ;;  %v3898_v41 = vor.u32 %v3896_v8, %v3895_v20  ;;  %v3916_v33 = vrot.slane %v3914_v26, 7  ;;  %v3902_v43 = vrot.slane %v3900_v27, 7  ;;  %v5618_v8 = vld [vmem:[%s7975_s22 + $0x3c] sm:$0xf] }
 0x2e4   : >> { %v5833_v42 = vpack.c.bf16 %v3836_v10, %v3836_v10  ;;  %v3921_v46 = vshrl.u32 %v7965_v13, 16  ;;  %3975 = vrot.lane.b32.xlu1 %v7965_v13, %s6425_s20  ;;  %v3995_v47 = vor.u32 %v3994_v44, %v3993_v34  ;;  %v3997_v22 = vrot.slane %v3879_v45, 4 }
 0x2e5   : >> { %4029 = vrot.lane.b32.xlu0 %v4004_v2, %s6426_s21  ;;  %v3998_v38 = vrot.slane %v3882_v21, 5  ;;  %v3917_v31 = vshll.u32 %v7954_v15, 16  ;;  %v3924_v49 = vshll.u32 %v7965_v13, 16  ;;  %v4009_v53 = vrot.slane %v3900_v27, 4 }
 0x2e6   : >> { %v3907_v51 = vshrl.u32 %v5833_v42, 16  ;;  %v3923_v58 = vrot.slane %v3921_v46, 7  ;;  %v3910_v59 = vshll.u32 %v5833_v42, 16  ;;  %v4008_v61 = vrot.slane %v4007_v3, 4 }
 0x2e7   : >> { %v4010_v37 = vrot.slane %v3903_v39, 5  ;;  %v3884_v48 = vor.u32 %v3882_v21, %v3881_v36  ;;  %v3919_v19 = vor.u32 %v3917_v31, %v3916_v33  ;;  %v3905_v35 = vor.u32 %v3903_v39, %v3902_v43 }
 0x2e8   : >> { %v3909_v40 = vrot.slane %v3907_v51, 7  ;;  %v3926_v0 = vor.u32 %v3924_v49, %v3923_v58  ;;  %4031 = vrot.lane.b32.xlu1 %v4008_v61, %s6426_s21  ;;  %v3996_v57 = vrot.slane %v3995_v47, 4  ;;  %v3999_v4 = vor.u32 %v3998_v38, %v3997_v22 }
 0x2e9   : >> { %3969 = vrot.lane.b32.xlu0 %v5832_v17, %s6425_s20  ;;  %v4017_v6 = vrot.slane %v3914_v26, 4  ;;  %v4011_v11 = vor.u32 %v4010_v37, %v4009_v53  ;;  %v4018_v14 = vrot.slane %v3917_v31, 5  ;;  %v3944_v15 = vsel %vm6930_vm3, %v3891_v32, %v5614_v54 }
 0x2ea   : >> { %v3912_v12 = vor.u32 %v3910_v59, %v3909_v40  ;;  %v4013_v45 = vrot.slane %v3907_v51, 4  ;;  %v4014_v17 = vrot.slane %v3910_v59, 5  ;;  %5615 = vst [vmem:[%s7975_s22 + $0x34] sm:$0xf] %v3944_v15  ;;  %v3938_v52 = vsel %vm6930_vm3, %v3877_v1, %v5610_v62 }
 0x2eb   : >> { %v3947_v28 = vsel %vm6930_vm3, %v3898_v41, %v5616_v24  ;;  %5611 = vst [vmem:[%s7975_s22 + $0x2c] sm:$0xf] %v3938_v52  ;;  %v3941_v20 = vsel %vm6930_vm3, %v3884_v48, %v5612_v63  ;;  %v3956_v21 = vsel %vm6930_vm3, %v3919_v19, %v5622_v7  ;;  %v3959_v55 = vsel %vm6930_vm3, %v3926_v0, %v5624_v50  ;;  %v8077_v7 = vld [vmem:[%s8270_s6] ss:$0 sm:$0xff] (%p2669_p4) }
 0x2ec   : >> { %5617 = vst [vmem:[%s7975_s22 + $0x38] sm:$0xf] %v3947_v28  ;;  %3971 = vrot.lane.b32.xlu1 %v5833_v42, %s6425_s20  ;;  %5613 = vst [vmem:[%s7975_s22 + $0x30] sm:$0xf] %v3941_v20  ;;  %v3950_v25 = vsel %vm6930_vm3, %v3905_v35, %v5618_v8  ;;  %v3953_v26 = vsel %vm6930_vm3, %v3912_v12, %v5620_v16  ;;  %v4012_v27 = vrot.slane %v4011_v11, 4  ;;  %v4000_v60 = vrot.slane %v3999_v4, 4 }
 0x2ed   : >> { %4025 = vrot.lane.b32.xlu0 %v3996_v57, %s6426_s21  ;;  %5623 = vst [vmem:[%s7975_s22 + $0x44] sm:$0xf] %v3956_v21  ;;  %v4019_v56 = vor.u32 %v4018_v14, %v4017_v6  ;;  %5625 = vst [vmem:[%s7975_s22 + $0x48] sm:$0xf] %v3959_v55  ;;  %v4015_v32 = vor.u32 %v4014_v17, %v4013_v45  ;;  %v4021_v18 = vrot.slane %v3921_v46, 4  ;;  %v4022_v23 = vrot.slane %v3924_v49, 5 }
 0x2ee   : >> { %5619 = vst [vmem:[%s7975_s22 + $0x3c] sm:$0xf] %v3950_v25  ;;  %5621 = vst [vmem:[%s7975_s22 + $0x40] sm:$0xf] %v3953_v26  ;;  %v8072_v6 = vld [vmem:[%s8269_s5] ss:$0 sm:$0xff] (%p2669_p4) }
 0x2ef   : >> { %v4020_v34 = vrot.slane %v4019_v56, 4  ;;  %v4016_v1 = vrot.slane %v4015_v32, 4  ;;  %v4023_v10 = vor.u32 %v4022_v23, %v4021_v18 }
 0x2f0   : >> { %4027 = vrot.lane.b32.xlu1 %v4000_v60, %s6426_s21 }
 0x2f1   : >> { %4033 = vrot.lane.b32.xlu0 %v4012_v27, %s6426_s21  ;;  %v4024_v2 = vrot.slane %v4023_v10, 4 }
 0x2f4   : >> { %4035 = vrot.lane.b32.xlu1 %v4016_v1, %s6426_s21 }
 0x2f5   : >> { %4037 = vrot.lane.b32.xlu0 %v4020_v34, %s6426_s21 }
 0x2f8   : >> { %4039 = vrot.lane.b32.xlu1 %v4024_v2, %s6426_s21 }
 0x34a   : >> { %v3966_v44 = vpop.permute.xlu1 %3965 }
 0x34b   : >> { %5628 = vst.msk [vmem:[%s7975_s22 + $0x34] sm:$0xf] %vm1573_vm4, %v3966_v44  ;;  %v3962_v36 = vpop.permute.xlu0 %3961 }
 0x34c   : >> { %5626 = vst.msk [vmem:[%s7975_s22 + $0x2c] sm:$0xf] %vm1573_vm4, %v3962_v36 }
 0x34e   : >> { %v3968_v39 = vpop.permute.xlu1 %3967 }
 0x34f   : >> { %5629 = vst.msk [vmem:[%s7975_s22 + $0x38] sm:$0xf] %vm1573_vm4, %v3968_v39  ;;  %v3964_v13 = vpop.permute.xlu0 %3963 }
 0x350   : >> { %5627 = vst.msk [vmem:[%s7975_s22 + $0x30] sm:$0xf] %vm1573_vm4, %v3964_v13 }
 0x352   : >> { %v5638_v41 = vld [vmem:[%s7975_s22 + $0x34] sm:$0xf] }
 0x353   : >> { %v3974_v3 = vpop.permute.xlu0 %3973  ;;  %v5634_v31 = vld [vmem:[%s7975_s22 + $0x2c] sm:$0xf] }
 0x354   : >> { %5632 = vst.msk [vmem:[%s7975_s22 + $0x44] sm:$0xf] %vm1573_vm4, %v3974_v3 }
 0x356   : >> { %v3976_v43 = vpop.permute.xlu1 %3975  ;;  %v5640_v47 = vld [vmem:[%s7975_s22 + $0x38] sm:$0xf] }
 0x357   : >> { %v4030_v33 = vpop.permute.xlu0 %4029  ;;  %5633 = vst.msk [vmem:[%s7975_s22 + $0x48] sm:$0xf] %vm1573_vm4, %v3976_v43  ;;  %v5636_v59 = vld [vmem:[%s7975_s22 + $0x30] sm:$0xf] }
 0x358   : >> { %v4056_v42 = vsel %vm7650_vm7, %v4030_v33, %v5638_v41 }
 0x359   : >> { %5639 = vst [vmem:[%s7975_s22 + $0x34] sm:$0xf] %v4056_v42 }
 0x35a   : >> { %v4032_v22 = vpop.permute.xlu1 %4031 }
 0x35b   : >> { %v3970_v46 = vpop.permute.xlu0 %3969  ;;  %v4059_v38 = vsel %vm7650_vm7, %v4032_v22, %v5640_v47  ;;  %v5646_v48 = vld [vmem:[%s7975_s22 + $0x44] sm:$0xf] }
 0x35c   : >> { %5630 = vst.msk [vmem:[%s7975_s22 + $0x3c] sm:$0xf] %vm1573_vm4, %v3970_v46  ;;  %5641 = vst [vmem:[%s7975_s22 + $0x38] sm:$0xf] %v4059_v38 }
 0x35e   : >> { %v3972_v51 = vpop.permute.xlu1 %3971  ;;  %v5648_v0 = vld [vmem:[%s7975_s22 + $0x48] sm:$0xf] }
 0x35f   : >> { %v4026_v49 = vpop.permute.xlu0 %4025  ;;  %5631 = vst.msk [vmem:[%s7975_s22 + $0x40] sm:$0xf] %vm1573_vm4, %v3972_v51 }
 0x360   : >> { %v4050_v53 = vsel %vm7650_vm7, %v4026_v49, %v5634_v31 }
 0x361   : >> { %5635 = vst [vmem:[%s7975_s22 + $0x2c] sm:$0xf] %v4050_v53 }
 0x362   : >> { %v4028_v61 = vpop.permute.xlu1 %4027 }
 0x363   : >> { %v4034_v54 = vpop.permute.xlu0 %4033  ;;  %v5642_v58 = vld [vmem:[%s7975_s22 + $0x3c] sm:$0xf]  ;;  %v4053_v62 = vsel %vm7650_vm7, %v4028_v61, %v5636_v59 }
 0x364   : >> { %v4062_v37 = vsel %vm7650_vm7, %v4034_v54, %v5642_v58  ;;  %5637 = vst [vmem:[%s7975_s22 + $0x30] sm:$0xf] %v4053_v62 }
 0x365   : >> { %5643 = vst [vmem:[%s7975_s22 + $0x3c] sm:$0xf] %v4062_v37 }
 0x366   : >> { %v4036_v35 = vpop.permute.xlu1 %4035  ;;  %v5644_v40 = vld [vmem:[%s7975_s22 + $0x40] sm:$0xf]  ;;  %2671 = sbr.rel (!%p2669_p4) target bundleno = 438 (0x1b6), region = 130 }
 0x367   : >> { %v4038_v19 = vpop.permute.xlu0 %4037  ;;  %v4065_v63 = vsel %vm7650_vm7, %v4036_v35, %v5644_v40 }
 0x368   : >> { %v4068_v24 = vsel %vm7650_vm7, %v4038_v19, %v5646_v48  ;;  %5645 = vst [vmem:[%s7975_s22 + $0x40] sm:$0xf] %v4065_v63 }
 0x369   : >> { %5647 = vst [vmem:[%s7975_s22 + $0x44] sm:$0xf] %v4068_v24 }
 0x36a   : >> { %v4040_v57 = vpop.permute.xlu1 %4039 }
 0x36b   : >> { %v4071_v4 = vsel %vm7650_vm7, %v4040_v57, %v5648_v0 }
 0x36c   : >> { %5649 = vst [vmem:[%s7975_s22 + $0x48] sm:$0xf] %v4071_v4 }
 0x36d LB: >> { %v6353_v29 = vld [vmem:[%s8266_s2 + $0x8] sm:$0x3f]   ;;  %v8090_v30 = vld [vmem:[%s8266_s2 + $0x20] sm:$0x3f]   ;;  %s5836_s10 = smul.u32 40, %s6420_s28  ;;  %s5837_s18 = sshll.u32 %s6420_s28, 5  ;;  %s6420_s28 = sphi %s8079_s28, %s4080_s28  }
 0x36e   : >> { %6269 = vmatprep.subr.msk.bf16.mxu1 %vm2738_vm8, %v6353_v29  ;;  %v4148_v5 = vsel %vm2738_vm8, %v6353_v29, 0  ;;  %6273 = vmatprep.subr.msk.bf16.mxu0 %vm2738_vm8, %v8090_v30  ;;  %v8099_v9 = vsel %vm2738_vm8, %v8090_v30, 0  ;;  %v6356_v8 = vld [vmem:[%s8266_s2] sm:$0x3f]   ;;  %v6358_v12 = vld [vmem:[%s8266_s2 + $0x28] sm:$0x3f]   ;;  %s8216_s30 = scalar_lea.vmem %s6888_s8, %s5837_s18 }
 0x36f   : >> { %6038 = vmatpush3.bf16.msra.mxu1 %v4148_v5  ;;  %6078 = vmatpush3.bf16.msra.mxu0 %v8099_v9  ;;  %s8108_s16 = scalar_lea.vmem [#allocation3], %s5836_s10  ;;  %v4253_v50 = vsel %vm2738_vm8, %v6356_v8, 0  ;;  %v4754_v45 = vsel %vm2738_vm8, %v6358_v12, 0  ;;  %v6364_v28 = vld [vmem:[%s8266_s2 + $0x30] sm:$0x3f]   ;;  %v5854_v0 = vld [vmem:[%s8216_s30 + $0x8] sm:$0xff]  }
 0x370   : >> { %6270 = vmatprep.subr.msk.bf16.mxu1 %vm2738_vm8, %v6356_v8  ;;  %6275 = vmatprep.subr.msk.bf16.mxu0 %vm2738_vm8, %v6358_v12  ;;  %v6367_v55 = vld [vmem:[%s8266_s2 + $0x10] sm:$0x3f]   ;;  %v4882_v27 = vsel %vm2738_vm8, %v6364_v28, 0  ;;  %v6374_v32 = vld [vmem:[%s8266_s2 + $0x38] sm:$0x3f]   ;;  %v5839_v29 = vld [vmem:[%s8216_s30] sm:$0xff]  }
 0x371   : >> { %v4372_v18 = vsel %vm2738_vm8, %v6367_v55, 0  ;;  %v6377_v23 = vld [vmem:[%s8266_s2 + $0x18] sm:$0x3f]   ;;  %v5009_v36 = vsel %vm2738_vm8, %v6374_v32, 0  ;;  %v6384_v13 = vld [vmem:[%s8266_s2 + $0x40] sm:$0x3f]  }
 0x372   : >> { %v4500_v33 = vsel %vm2738_vm8, %v6377_v23, 0  ;;  %v5136_v31 = vsel %vm2738_vm8, %v6384_v13, 0  ;;  %s5822_s9 = sshll.u32 %s6420_s28, 6  ;;  %vm5276_vm10 = vcmask 31744   ;;  %s4080_s28 = sadd.s32 1, %s6420_s28  }
 0x373   : >> { %v6355_v11 = vld [vmem:[%s8108_s16 + $0x4] sm:$0xff]   ;;  %v6357_v14 = vld [vmem:[%s8108_s16 + $0x2c] sm:$0xff]   ;;  %v6360_v16 = vld [vmem:[%s8108_s16 + $0x34] sm:$0xff]   ;;  %s8229_s10 = scalar_lea.vmem %s6893_s11, %s5822_s9  ;;  %p4077_p5 = scmp.ge.s32.totalorder %s4080_s28, 8  }
 0x374   : >> { %6039 = vmatprep.mubr.msk.bf16.mxu1 %vm2725_vm9, %v6355_v11  ;;  %v6359_v15 = vld [vmem:[%s8108_s16 + $0xc] sm:$0xff]   ;;  %6079 = vmatprep.mubr.msk.bf16.mxu0 %vm2725_vm9, %v6357_v14  ;;  %v6361_v17 = vld [vmem:[%s8108_s16 + $0x14] sm:$0xff]   ;;  %v6362_v20 = vld [vmem:[%s8108_s16 + $0x1c] sm:$0xff]   ;;  %v5840_v14 = vunpack.c.l.bf16 %v5839_v29 }
 0x375   : >> { %6040 = vmatmul.mubr.msk.bf16.vlgmr.msra.gmra.mrb[0].mxu1 %vm2725_vm9, %v6359_v15  ;;  %6080 = vmatmul.mubr.msk.bf16.vlgmr.msra.gmra.mrb[0].mxu0 %vm2725_vm9, %v6360_v16  ;;  %v6363_v52 = vld [vmem:[%s8108_s16 + $0x30] sm:$0xff]   ;;  %v6366_v21 = vld [vmem:[%s8108_s16] sm:$0xff]   ;;  %v6365_v25 = vld [vmem:[%s8108_s16 + $0x38] sm:$0xff]  }
 0x376   : >> { %6048 = vmatpush3.bf16.msra.mxu1 %v4253_v50  ;;  %6088 = vmatpush3.bf16.msra.mxu0 %v4754_v45  ;;  %v6369_v26 = vld [vmem:[%s8108_s16 + $0x40] sm:$0xff]   ;;  %v6368_v56 = vld [vmem:[%s8108_s16 + $0x8] sm:$0xff]   ;;  %v6371_v60 = vld [vmem:[%s8108_s16 + $0x10] sm:$0xff]   ;;  %v5845_v45 = vunpack.c.h.bf16 %v5854_v0 }
 0x377   : >> { %6043 = vmatprep.mubr.msk.bf16.mxu1 %vm2725_vm9, %v6361_v17  ;;  %6089 = vmatprep.mubr.msk.bf16.mxu0 %vm2725_vm9, %v6363_v52  ;;  %v6370_v34 = vld [vmem:[%s8108_s16 + $0x48] sm:$0xff]   ;;  %v6373_v1 = vld [vmem:[%s8108_s16 + $0x50] sm:$0xff]   ;;  %v6372_v10 = vld [vmem:[%s8108_s16 + $0x18] sm:$0xff]  }
 0x378   : >> { %6276 = vmatprep.subr.msk.bf16.mxu0 %vm2738_vm8, %v6364_v28  ;;  %6271 = vmatprep.subr.msk.bf16.mxu1 %vm2738_vm8, %v6367_v55  ;;  %v6376_v2 = vld [vmem:[%s8108_s16 + $0x8] sm:$0xff]   ;;  %v6375_v44 = vld [vmem:[%s8108_s16 + $0x58] sm:$0xff]   ;;  %v6379_v39 = vld [vmem:[%s8108_s16 + $0x60] sm:$0xff]   ;;  %v5841_v28 = vunpack.c.h.bf16 %v5839_v29 }
 0x379   : >> { %v6378_v3 = vld [vmem:[%s8108_s16 + $0x10] sm:$0xff]   ;;  %v6381_v41 = vld [vmem:[%s8108_s16 + $0x18] sm:$0xff]   ;;  %v6380_v43 = vld [vmem:[%s8108_s16 + $0x68] sm:$0xff]  }
 0x37a   : >> { %v6383_v42 = vld [vmem:[%s8108_s16 + $0x54] sm:$0xff]   ;;  %v6382_v46 = vld [vmem:[%s8108_s16 + $0x20] sm:$0xff]   ;;  %v6386_v47 = vld [vmem:[%s8108_s16 + $0x28] sm:$0xff]  }
 0x37b   : >> { %v6385_v22 = vld [vmem:[%s8108_s16 + $0x5c] sm:$0xff]   ;;  %v6388_v38 = vld [vmem:[%s8108_s16 + $0x64] sm:$0xff]   ;;  %v6387_v49 = vld [vmem:[%s8108_s16 + $0x30] sm:$0xff]  }
 0x37c   : >> { %v6390_v51 = vld [vmem:[%s8108_s16 + $0x38] sm:$0xff]   ;;  %v6389_v53 = vld [vmem:[%s8108_s16 + $0x6c] sm:$0xff]   ;;  %v6391_v58 = vld [vmem:[%s8108_s16 + $0x40] sm:$0xff]  }
 0x37d   : >> { %6044 = vmatmul.mubr.msk.bf16.gmra.mrb[4].mxu1 %vm2725_vm9, %v6362_v20  ;;  %v6392_v54 = vld [vmem:[%s8108_s16 + $0x58] sm:$0xff]   ;;  %v6393_v61 = vld [vmem:[%s8108_s16 + $0x60] sm:$0xff]   ;;  %v6395_v37 = vld [vmem:[%s8108_s16 + $0x68] sm:$0xff]  }
 0x37e   : >> { %6049 = vmatprep.mubr.msk.bf16.mxu1 %vm2725_vm9, %v6366_v21  ;;  %v6394_v59 = vld [vmem:[%s8108_s16 + $0x3c] sm:$0xff]   ;;  %v6396_v62 = vld [vmem:[%s8108_s16 + $0x44] sm:$0xff]   ;;  %v6397_v48 = vld [vmem:[%s8108_s16 + $0x70] sm:$0xff]  }
 0x381   : >> { %6090 = vmatmul.mubr.msk.bf16.vlgmr.msra.gmra.mrb[0].mxu0 %vm2725_vm9, %v6365_v25 }
 0x382   : >> { %6098 = vmatpush3.bf16.msra.mxu0 %v4882_v27  ;;  %6093 = vmatprep.mubr.msk.bf16.mxu0 %vm2725_vm9, %v6369_v26 }
 0x383   : >> { %6277 = vmatprep.subr.msk.bf16.mxu0 %vm2738_vm8, %v6374_v32 }
 0x385   : >> { %6050 = vmatmul.mubr.msk.bf16.vlgmr.msra.gmra.mrb[0].mxu1 %vm2725_vm9, %v6368_v56 }
 0x386   : >> { %6058 = vmatpush3.bf16.msra.mxu1 %v4372_v18  ;;  %6053 = vmatprep.mubr.msk.bf16.mxu1 %vm2725_vm9, %v6371_v60  ;;  %v5856_v60 = vld [vmem:[%s8216_s30 + $0x18] sm:$0xff]  }
 0x387   : >> { %6272 = vmatprep.subr.msk.bf16.mxu1 %vm2738_vm8, %v6377_v23 }
 0x389   : >> { %6094 = vmatmul.mubr.msk.bf16.gmra.mrb[4].mxu0 %vm2725_vm9, %v6370_v34 }
 0x38a   : >> { %6099 = vmatprep.mubr.msk.bf16.mxu0 %vm2725_vm9, %v6373_v1 }
 0x38d   : >> { %6054 = vmatmul.mubr.msk.bf16.gmra.mrb[4].mxu1 %vm2725_vm9, %v6372_v10  ;;  %v5855_v10 = vld [vmem:[%s8216_s30 + $0x10] sm:$0xff]  }
 0x38e   : >> { %6059 = vmatprep.mubr.msk.bf16.mxu1 %vm2725_vm9, %v6376_v2 }
 0x391   : >> { %6100 = vmatmul.mubr.msk.bf16.vlgmr.msra.gmra.mrb[0].mxu0 %vm2725_vm9, %v6375_v44 }
 0x392   : >> { %6108 = vmatpush3.bf16.msra.mxu0 %v5009_v36  ;;  %6103 = vmatprep.mubr.msk.bf16.mxu0 %vm2725_vm9, %v6379_v39 }
 0x393   : >> { %6278 = vmatprep.subr.msk.bf16.mxu0 %vm2738_vm8, %v6384_v13 }
 0x395   : >> { %6060 = vmatmul.mubr.msk.bf16.vlgmr.msra.gmra.mrb[0].mxu1 %vm2725_vm9, %v6378_v3 }
 0x396   : >> { %6068 = vmatpush3.bf16.msra.mxu1 %v4500_v33  ;;  %6063 = vmatprep.mubr.msk.bf16.mxu1 %vm2725_vm9, %v6381_v41  ;;  %v5852_v33 = vunpack.c.l.bf16 %v5856_v60 }
 0x397   : >> { %6274 = vmatprep.subr.msk.bf16.mxu1 %vm2738_vm8, %v8090_v30 }
 0x399   : >> { %6104 = vmatmul.mubr.msk.bf16.gmra.mrb[4].mxu0 %vm2725_vm9, %v6380_v43 }
 0x39a   : >> { %6109 = vmatprep.mubr.msk.bf16.mxu0 %vm2725_vm9, %v6383_v42 }
 0x39d   : >> { %6064 = vmatmul.mubr.msk.bf16.gmra.mrb[4].mxu1 %vm2725_vm9, %v6382_v46 }
 0x39e   : >> { %6069 = vmatprep.mubr.msk.bf16.mxu1 %vm2725_vm9, %v6386_v47 }
 0x3a1   : >> { %6110 = vmatmul.mubr.msk.bf16.vlgmr.msra.gmra.mrb[0].mxu0 %vm2725_vm9, %v6385_v22  ;;  %v5848_v22 = vunpack.c.l.bf16 %v5855_v10 }
 0x3a2   : >> { %6118 = vmatpush3.bf16.msra.mxu0 %v5136_v31  ;;  %6113 = vmatprep.mubr.msk.bf16.mxu0 %vm2725_vm9, %v6388_v38 }
 0x3a5   : >> { %6070 = vmatmul.mubr.msk.bf16.vlgmr.msra.gmra.mrb[0].mxu1 %vm2725_vm9, %v6387_v49 }
 0x3a6   : >> { %6194 = vmatpush3.bf16.msra.mxu1 %v8099_v9  ;;  %6073 = vmatprep.mubr.msk.bf16.mxu1 %vm2725_vm9, %v6390_v51  ;;  %v5844_v9 = vunpack.c.l.bf16 %v5854_v0  ;;  %v5853_v51 = vunpack.c.h.bf16 %v5856_v60 }
 0x3a9   : >> { %6114 = vmatmul.mubr.msk.bf16.gmra.mrb[4].mxu0 %vm2725_vm9, %v6389_v53 }
 0x3aa   : >> { %6119 = vmatprep.mubr.msk.bf16.mxu0 %vm2725_vm9, %v6392_v54 }
 0x3ad   : >> { %6074 = vmatmul.mubr.msk.bf16.gmra.mrb[4].mxu1 %vm2725_vm9, %v6391_v58  ;;  %v5849_v58 = vunpack.c.h.bf16 %v5855_v10 }
 0x3ae   : >> { %6083 = vmatprep.mubr.msk.bf16.mxu1 %vm2725_vm9, %v6394_v59 }
 0x3b1   : >> { %6120 = vmatmul.mubr.msk.bf16.vlgmr.msra.gmra.mrb[0].mxu0 %vm2725_vm9, %v6393_v61 }
 0x3b2   : >> { %6123 = vmatprep.mubr.msk.bf16.mxu0 %vm2725_vm9, %v6395_v37 }
 0x3b9   : >> { %6084 = vmatmul.mubr.msk.bf16.vlgmr.msra.gmra.mrb[4].mxu1 %vm2725_vm9, %v6396_v62  ;;  %6124 = vmatmul.mubr.msk.bf16.gmra.mrb[4].mxu0 %vm2725_vm9, %v6397_v48 }
 0x478   : >> { %v6071_v19 = vpop.f32.mrb[0].mxu1 }
 0x479   : >> { %v4536_v35 = vpop.f32.mrb[1].mxu1 }
 0x47a   : >> { %v6072_v40 = vpop.f32.mrb[2].mxu1 }
 0x47b   : >> { %v4539_v24 = vpop.f32.mrb[3].mxu1 }
 0x484   : >> { %v6121_v63 = vpop.f32.mrb[0].mxu0 }
 0x485   : >> { %v6195_v57 = vadd.f32 %v6121_v63, %v6071_v19  ;;  %v5172_v4 = vpop.f32.mrb[1].mxu0 }
 0x486   : >> { %v6196_v30 = vadd.f32 %v5172_v4, %v4536_v35  ;;  %v6122_v5 = vpop.f32.mrb[2].mxu0 }
 0x487   : >> { %v5238_v8 = vmul.f32 %v6195_v57, %v8072_v6  ;;  %v6197_v12 = vadd.f32 %v6122_v5, %v6072_v40  ;;  %v5175_v11 = vpop.f32.mrb[3].mxu0 }
 0x488   : >> { %v5236_v15 = vmul.f32 %v6196_v30, %v8072_v6  ;;  %v6198_v50 = vadd.f32 %v5175_v11, %v4539_v24 }
 0x489   : >> { %v5252_v16 = vadd.f32 %v8077_v7, %v5238_v8  ;;  %v5239_v17 = vmul.f32 %v6197_v12, %v8072_v6 }
 0x48a   : >> { %v5250_v52 = vadd.f32 %v8077_v7, %v5236_v15  ;;  %v5237_v20 = vmul.f32 %v6198_v50, %v8072_v6 }
 0x48b   : >> { %v5260_v21 = vadd.f32 %v5844_v9, %v5252_v16  ;;  %v5253_v55 = vadd.f32 %v8077_v7, %v5239_v17 }
 0x48c   : >> { %v6085_v25 = vpop.f32.mrb[4].mxu1  ;;  %v5258_v26 = vadd.f32 %v5840_v14, %v5250_v52  ;;  %v5251_v27 = vadd.f32 %v8077_v7, %v5237_v20  ;;  %v6125_v56 = vpop.f32.mrb[4].mxu0 }
 0x48d   : >> { %v4679_v32 = vpop.f32.mrb[5].mxu1  ;;  %v5268_v18 = vmax.f32 %v5260_v21, 0.0  ;;  %v5261_v23 = vadd.f32 %v5845_v45, %v5253_v55  ;;  %v6199_v34 = vadd.f32 %v6125_v56, %v6085_v25  ;;  %v5188_v1 = vpop.f32.mrb[5].mxu0 }
 0x48e   : >> { %v6086_v2 = vpop.f32.mrb[6].mxu1  ;;  %v5266_v44 = vmax.f32 %v5258_v26, 0.0  ;;  %v5259_v36 = vadd.f32 %v5841_v28, %v5251_v27  ;;  %v6200_v39 = vadd.f32 %v5188_v1, %v4679_v32  ;;  %v6126_v13 = vpop.f32.mrb[6].mxu0 }
 0x48f   : >> { %v4682_v3 = vpop.f32.mrb[7].mxu1  ;;  %5279 = vst.msk [vmem:[%s8229_s10 + $0x10] sm:$0xff] %vm5276_vm10, %v5268_v18  ;;  %v5269_v41 = vmax.f32 %v5261_v23, 0.0  ;;  %v5242_v43 = vmul.f32 %v6199_v34, %v8072_v6  ;;  %v6201_v42 = vadd.f32 %v6126_v13, %v6086_v2  ;;  %v5191_v46 = vpop.f32.mrb[7].mxu0 }
 0x490   : >> { %5277 = vst.msk [vmem:[%s8229_s10] sm:$0xff] %vm5276_vm10, %v5266_v44  ;;  %v5267_v47 = vmax.f32 %v5259_v36, 0.0  ;;  %v5240_v38 = vmul.f32 %v6200_v39, %v8072_v6  ;;  %v6202_v31 = vadd.f32 %v5191_v46, %v4682_v3 }
 0x491   : >> { %5280 = vst.msk [vmem:[%s8229_s10 + $0x18] sm:$0xff] %vm5276_vm10, %v5269_v41  ;;  %v5256_v49 = vadd.f32 %v8077_v7, %v5242_v43  ;;  %v5243_v53 = vmul.f32 %v6201_v42, %v8072_v6 }
 0x492   : >> { %5278 = vst.msk [vmem:[%s8229_s10 + $0x8] sm:$0xff] %vm5276_vm10, %v5267_v47  ;;  %v5254_v54 = vadd.f32 %v8077_v7, %v5240_v38  ;;  %v5241_v59 = vmul.f32 %v6202_v31, %v8072_v6 }
 0x493   : >> { %v5264_v61 = vadd.f32 %v5852_v33, %v5256_v49  ;;  %v5257_v37 = vadd.f32 %v8077_v7, %v5243_v53 }
 0x494   : >> { %v5262_v62 = vadd.f32 %v5848_v22, %v5254_v54  ;;  %v5255_v48 = vadd.f32 %v8077_v7, %v5241_v59  ;;  %4079 = sbr.rel (!%p4077_p5) target bundleno = 877 (0x36d), region = 141 }
 0x495   : >> { %v5272_v19 = vmax.f32 %v5264_v61, 0.0  ;;  %v5265_v35 = vadd.f32 %v5853_v51, %v5257_v37 }
 0x496   : >> { %v5270_v40 = vmax.f32 %v5262_v62, 0.0  ;;  %v5263_v24 = vadd.f32 %v5849_v58, %v5255_v48 }
 0x497   : >> { %5283 = vst.msk [vmem:[%s8229_s10 + $0x30] sm:$0xff] %vm5276_vm10, %v5272_v19  ;;  %v5273_v63 = vmax.f32 %v5265_v35, 0.0 }
 0x498   : >> { %5281 = vst.msk [vmem:[%s8229_s10 + $0x20] sm:$0xff] %vm5276_vm10, %v5270_v40  ;;  %v5271_v0 = vmax.f32 %v5263_v24, 0.0 }
 0x499   : >> { %5284 = vst.msk [vmem:[%s8229_s10 + $0x38] sm:$0xff] %vm5276_vm10, %v5273_v63 }
 0x49a   : >> { %5282 = vst.msk [vmem:[%s8229_s10 + $0x28] sm:$0xff] %vm5276_vm10, %v5271_v0 }
 0x49b PF: > { %s17_s24 = sadd.s32 1, %s6412_s24  }
 0x49c   : > { %p14_p6 = scmp.ge.s32.totalorder %s17_s24, 4  }
 0x49e   :  { %16 = sbr.rel (!%p14_p6) target bundleno = 1 (0x1), region = 152 }

</bundles_post_ra>
